<compile_context>
chip_gen: v7x
topology: tpu7x:2x2x1
jax: 0.10.0
libtpu: 0.0.40
codegen_flags: <defaults>
</compile_context>

<pallas_src>
import functools

import numpy as np
import jax
import jax.numpy as jnp
from jax.experimental import pallas as pl
from jax.experimental.pallas import tpu as pltpu


# -----------------------------------------------------------------------------
# Pallas kernel: entire Conv1d stack, batch folded into lanes (C, B*T)
# -----------------------------------------------------------------------------
def diffeeg_kernel(xin_ref, win_ref, w1_ref, wd_ref, wfb_ref, bfb_ref, vec_ref,
                   o_ref, *, H, T, B, dilations):
    f32, bf16 = jnp.float32, jnp.bfloat16
    N = B * T
    inv_cnt = 1.0 / float(H * T)     # GroupNorm(1, H) element count per sample

    # time index within each sample (compile-time constant pattern)
    tpos = jax.lax.broadcasted_iota(jnp.int32, (1, N), 1) % T

    def mm(W, v):                    # bf16 MXU matmul, f32 accumulation
        return jnp.dot(W, v.astype(bf16), preferred_element_type=f32)

    def col(i):                      # (H, 1) bias / affine column
        return vec_ref[:, i:i + 1]

    def groupnorm(v, gamma=None, beta=None, eps=1e-5):
        # GroupNorm(1, H): per-sample stats over all (H, T) elements.  Samples are
        # lane-contiguous 128-wide blocks -> tile-aligned static slices; stats are
        # XLU reductions (no MXU one-hot dots), rsqrt on the EUP.
        outs = []
        for b in range(B):
            vb = v[:, b * T:(b + 1) * T]
            s1 = jnp.sum(jnp.sum(vb, axis=1, keepdims=True), axis=0, keepdims=True)
            s2 = jnp.sum(jnp.sum(vb * vb, axis=1, keepdims=True), axis=0, keepdims=True)
            mu = s1 * inv_cnt
            var = jnp.maximum(s2 * inv_cnt - mu * mu, 0.0)
            rstd = jax.lax.rsqrt(var + eps)
            outs.append((vb - mu) * rstd)
        out = outs[0] if B == 1 else jnp.concatenate(outs, axis=1)
        if gamma is not None:
            out = out * gamma + beta
        return out

    # ---- fused front end: spectrogram chain + GTU pre-acts + input_conv + cond ----
    pre = jnp.dot(win_ref[...], xin_ref[...], preferred_element_type=f32)   # (3H, N)
    gate = jnp.tanh(pre[0:H, :]) * jax.nn.sigmoid(pre[H:2 * H, :])          # GTU
    h = pre[2 * H:3 * H, :] + gate   # = input_conv(x) + step_emb + class_emb + spec

    # ---- 4 residual blocks: 1x1 -> ReLU -> (dilated k=3 . 1x1 folded) -> GroupNorm --
    # (Dropout is identity in eval mode.)
    skips = None
    for i, d in enumerate(dilations):
        v = jnp.maximum(mm(w1_ref[i], h) + col(4 * i + 0), 0.0)
        # shifted taps on the XLU; edge masks keep samples independent (zero pad)
        vm = jnp.where(tpos >= d, pltpu.roll(v, d, axis=1), 0.0).astype(bf16)       # x[t-d]
        vp = jnp.where(tpos < T - d,
                       pltpu.roll(v, (N - d) % N, axis=1), 0.0).astype(bf16)        # x[t+d]
        stacked = jnp.concatenate([vm, v.astype(bf16), vp], axis=0)                 # (3H, N)
        v = jnp.dot(wd_ref[i], stacked, preferred_element_type=f32) + col(4 * i + 1)
        v = groupnorm(v, col(4 * i + 2), col(4 * i + 3))
        h = v
        skips = v if skips is None else skips + v

    # ---- skip_sum -> layer_norm -> final projection --------------------------------
    y = mm(w1_ref[4], skips) + col(16)           # skip_sum (1x1)
    y = groupnorm(y)                             # layer_norm (affine folded into w1[5])
    y = jnp.maximum(mm(w1_ref[5], y) + col(17), 0.0)
    y = groupnorm(y)                             # final GroupNorm (affine folded into wfb)
    o_ref[...] = mm(wfb_ref[...], y) + bfb_ref[...]


# -----------------------------------------------------------------------------
# F.interpolate(mode='linear', align_corners=False) as a dense (L_in, T) matrix
# -----------------------------------------------------------------------------
def _interp_matrix(L_in, T):
    M = np.zeros((L_in, T), dtype=np.float32)
    scale = L_in / T
    for t in range(T):
        src = max((t + 0.5) * scale - 0.5, 0.0)
        i0 = min(int(np.floor(src)), L_in - 1)
        i1 = min(i0 + 1, L_in - 1)
        lam = src - i0
        M[i0, t] += 1.0 - lam
        M[i1, t] += lam
    return jnp.asarray(M)


# -----------------------------------------------------------------------------
# One-time, param-only weight fusion (hoisted out of the per-step path)
# -----------------------------------------------------------------------------
def fuse_params(params):
    f32, bf16 = jnp.float32, jnp.bfloat16
    H = params['w_sp'].shape[0]
    half = H // 2
    n_ch = params['w_ic'].shape[1]

    # channel_expand -> spectrogram_project -> GTU conv1/conv2 collapse (all 1x1)
    A = params['w_sp'] @ params['w_ce']
    ab = params['w_sp'] @ params['b_ce'] + params['b_sp']
    w_spec = jnp.concatenate([params['w_g1'] @ A, params['w_g2'] @ A], axis=0)      # (2H, H/2)
    b_spec = jnp.concatenate([params['w_g1'] @ ab + params['b_g1'],
                              params['w_g2'] @ ab + params['b_g2']], axis=0)        # (2H,)

    # layer_norm affine folded into final_projection conv a; final GN affine into conv b
    w_fa = params['w_fa'] * params['ln_gamma'][None, :]
    b_fa = params['w_fa'] @ params['ln_beta'] + params['b_fa']
    w_fb = params['w_fb'] * params['fgn_gamma'][None, :]
    b_fb = params['w_fb'] @ params['fgn_beta'] + params['b_fb']

    # static columns of the fused front matmul: [spec cols | raw-x cols | ones col]
    top = jnp.concatenate([w_spec, jnp.zeros((2 * H, n_ch), f32), b_spec[:, None]], axis=1)
    bot = jnp.concatenate([jnp.zeros((H, half), f32), params['w_ic'],
                           params['b_ic'][:, None]], axis=1)
    w_in_static = jnp.concatenate([top, bot], axis=0)                                # (3H, ...)

    # residual blocks: fold the post-dilated 1x1 (rb_w3) into the dilated k=3 weight
    wd = jnp.stack([
        jnp.concatenate([params['rb_w3'][i] @ params['rb_w2'][i, :, :, j] for j in range(3)],
                        axis=1) for i in range(4)], axis=0).astype(bf16)             # (4, H, 3H)
    bd = [params['rb_w3'][i] @ params['rb_b2'][i] + params['rb_b3'][i] for i in range(4)]

    w1 = jnp.stack([params['rb_w1'][i] for i in range(4)]
                   + [params['w_ss'], w_fa], axis=0).astype(bf16)                    # (6, H, H)
    vec = jnp.stack(
        [c for i in range(4) for c in (params['rb_b1'][i], bd[i],
                                       params['rb_gamma'][i], params['rb_beta'][i])]
        + [params['b_ss'], b_fa], axis=1).astype(f32)                                # (H, 18)

    # ConvTranspose2d kernel pre-arranged for lax.conv_general_dilated (OIHW, flipped)
    spec_kern = jnp.flip(params['spec_up_w'], axis=(2, 3)).transpose(1, 0, 2, 3)

    return dict(
        w_in_static=w_in_static, w1=w1, wd=wd, vec=vec,
        w_fb=w_fb.astype(bf16), b_fb=b_fb[:, None].astype(f32),
        spec_kern=spec_kern, spec_up_b=params['spec_up_b'],
        class_emb=params['class_emb'],
        mlp_w0=params['mlp_w0'], mlp_b0=params['mlp_b0'],
        mlp_w1=params['mlp_w1'], mlp_b1=params['mlp_b1'],
        mlp_w2=params['mlp_w2'], mlp_b2=params['mlp_b2'],
    )


# -----------------------------------------------------------------------------
# Per-step forward: tiny JAX glue (embeddings, transpose-conv upsample, cond columns),
# then one Pallas call for the full Conv1d network.
# -----------------------------------------------------------------------------
def diffeeg_forward(fused, x, class_onehot, diffusion_step, spectrogram):
    f32, bf16 = jnp.float32, jnp.bfloat16
    B, n_ch, T = x.shape
    H = fused['w1'].shape[1]
    half = H // 2
    N = B * T

    # ---- sinusoidal step embedding + MLP + class embedding (tiny prep) -------------
    freqs = jnp.exp(jnp.arange(half, dtype=f32) * (-np.log(10000.0) / (half - 1)))
    emb = diffusion_step.reshape(-1, 1).astype(f32) * freqs[None, :]
    step_emb = jnp.concatenate([jnp.sin(emb), jnp.cos(emb)], axis=-1)        # (B, H)
    e = jax.nn.sigmoid(step_emb @ fused['mlp_w0'].T + fused['mlp_b0'])
    e = jnp.maximum(e @ fused['mlp_w1'].T + fused['mlp_b1'], 0.0)
    e = e @ fused['mlp_w2'].T + fused['mlp_b2']
    cond = e + fused['class_emb'][jnp.argmax(class_onehot, axis=1)]          # (B, H)

    # ---- ConvTranspose2d(k=3, stride=(1,8), padding=(1,2)) + ReLU + linear interp ---
    # TODO(synk): the transpose-conv upsample of the tiny raw spectrogram stays in XLA
    # glue; its result enters the Pallas kernel through the fused first matmul.
    spec = jax.lax.conv_general_dilated(
        spectrogram, fused['spec_kern'], window_strides=(1, 1),
        padding=((1, 1), (0, 0)), lhs_dilation=(1, 8),
        dimension_numbers=('NCHW', 'OIHW', 'NCHW'))
    spec = jnp.maximum(spec + fused['spec_up_b'][None, :, None, None], 0.0)
    spec = spec.reshape(B, half, -1)                                          # (B, H/2, L)
    interp = _interp_matrix(spec.shape[-1], T)                                # static const
    spec_i = jnp.einsum('bcl,lt->bct', spec, interp)                          # (B, H/2, T)

    # ---- per-call cond columns + zero padding of K to a bf16 sublane multiple -------
    K_raw = half + n_ch + 1 + B
    K = -(-K_raw // 16) * 16
    w_in = jnp.concatenate(
        [fused['w_in_static'],
         jnp.concatenate([jnp.zeros((2 * H, B), f32), cond.T], axis=0),
         jnp.zeros((3 * H, K - K_raw), f32)], axis=1).astype(bf16)            # (3H, K)

    # ---- fold batch into lanes: (C, B*T) activation slab ----------------------------
    seg_t = jnp.repeat(jnp.eye(B, dtype=f32), T, axis=1)                      # (B, N) indicators
    x_in = jnp.concatenate(
        [spec_i.transpose(1, 0, 2).reshape(half, N),
         x.transpose(1, 0, 2).reshape(n_ch, N).astype(f32),
         jnp.ones((1, N), f32), seg_t,
         jnp.zeros((K - K_raw, N), f32)], axis=0).astype(bf16)                # (K, N)

    kernel = functools.partial(diffeeg_kernel, H=H, T=T, B=B, dilations=(1, 2, 4, 8))
    out = pl.pallas_call(
        kernel,
        out_shape=jax.ShapeDtypeStruct((n_ch, N), f32),
    )(x_in, w_in, fused['w1'], fused['wd'], fused['w_fb'], fused['b_fb'], fused['vec'])

    return out.reshape(n_ch, B, T).transpose(1, 0, 2)                         # (B, n_ch, T)


# -----------------------------------------------------------------------------
# Deterministic synthetic parameters (torch-layout shapes from DiffEEG.__init__)
# -----------------------------------------------------------------------------
def make_params(key, n_ch, n_classes, H):
    keys = iter(jax.random.split(key, 48))

    def w(shape, scale=0.1):
        return scale * jax.random.normal(next(keys), shape, dtype=jnp.float32)

    half = H // 2
    p = {}
    for i in range(3):                                        # step_embedding_mlp
        p[f'mlp_w{i}'] = w((H, H))
        p[f'mlp_b{i}'] = w((H,), 0.01)
    p['class_emb'] = w((n_classes, H))                        # nn.Embedding
    p['spec_up_w'] = w((n_ch, half, 3, 3))                    # ConvTranspose2d (in,out,kH,kW)
    p['spec_up_b'] = w((half,), 0.01)
    p['w_ce'] = w((H, half)); p['b_ce'] = w((H,), 0.01)       # channel_expand
    p['w_sp'] = w((H, H));    p['b_sp'] = w((H,), 0.01)       # spectrogram_project
    p['w_g1'] = w((H, H));    p['b_g1'] = w((H,), 0.01)       # GTU conv1
    p['w_g2'] = w((H, H));    p['b_g2'] = w((H,), 0.01)       # GTU conv2
    p['w_ic'] = w((H, n_ch)); p['b_ic'] = w((H,), 0.01)       # input_conv
    p['rb_w1'] = w((4, H, H));    p['rb_b1'] = w((4, H), 0.01)
    p['rb_w2'] = w((4, H, H, 3)); p['rb_b2'] = w((4, H), 0.01)   # dilated k=3 convs
    p['rb_w3'] = w((4, H, H));    p['rb_b3'] = w((4, H), 0.01)
    p['rb_gamma'] = 1.0 + w((4, H), 0.01); p['rb_beta'] = w((4, H), 0.01)
    p['w_ss'] = w((H, H)); p['b_ss'] = w((H,), 0.01)          # skip_sum
    p['ln_gamma'] = 1.0 + w((H,), 0.01); p['ln_beta'] = w((H,), 0.01)
    p['w_fa'] = w((H, H)); p['b_fa'] = w((H,), 0.01)          # final_projection conv a
    p['fgn_gamma'] = 1.0 + w((H,), 0.01); p['fgn_beta'] = w((H,), 0.01)
    p['w_fb'] = w((n_ch, H)); p['b_fb'] = w((n_ch,), 0.01)    # final_projection conv b
    return p


if __name__ == "__main__":
    B, n_ch, T = 2, 4, 128
    H, n_classes = 32, 3
    Fr, Wt = 4, 8

    k_p, k_x, k_s = jax.random.split(jax.random.PRNGKey(0), 3)
    params = make_params(k_p, n_ch, n_classes, H)
    fused = fuse_params(params)            # param-only fusion, run once (not per step)

    x = jax.random.normal(k_x, (B, n_ch, T), dtype=jnp.float32)
    spectrogram = jax.random.normal(k_s, (B, n_ch, Fr, Wt), dtype=jnp.float32)
    class_onehot = jax.nn.one_hot(jnp.array([0, 2]), n_classes, dtype=jnp.float32)
    diffusion_step = jnp.array([3.0, 17.0], dtype=jnp.float32)

    fwd = jax.jit(diffeeg_forward)
    out = jax.block_until_ready(fwd(fused, x, class_onehot, diffusion_step, spectrogram))
    assert out.shape == (B, n_ch, T)
    assert bool(jnp.all(jnp.isfinite(out)))
    print("KERNEL_OK")
</pallas_src>

<mosaic_0001>
module attributes {stable_mosaic.version = 11 : i64} {
  func.func @diffeeg_kernel(%arg0: memref<32x256xbf16, #tpu.memory_space<vmem>>, %arg1: memref<96x32xbf16, #tpu.memory_space<vmem>>, %arg2: memref<6x32x32xbf16, #tpu.memory_space<vmem>>, %arg3: memref<4x32x96xbf16, #tpu.memory_space<vmem>>, %arg4: memref<4x32xbf16, #tpu.memory_space<vmem>>, %arg5: memref<4x1xf32, #tpu.memory_space<vmem>>, %arg6: memref<32x18xf32, #tpu.memory_space<vmem>>, %arg7: memref<4x256xf32, #tpu.memory_space<vmem>>) attributes {dimension_semantics = [], scalar_prefetch = 0 : i64, scratch_operands = 0 : i64, tpu.core_type = #tpu.core_type<tc>} {
    %0 = tpu.iota {dimensions = array<i32: 1>} : vector<1x256xi32>
    %c128_i32 = arith.constant 128 : i32
    %c0_i32 = arith.constant 0 : i32
    %1 = arith.cmpi eq, %c128_i32, %c0_i32 : i32
    %c1_i32 = arith.constant 1 : i32
    %2 = arith.select %1, %c1_i32, %c128_i32 : i32
    %3 = vector.broadcast %2 : i32 to vector<1x256xi32>
    %4 = arith.remsi %0, %3 : vector<1x256xi32>
    %c0_i32_0 = arith.constant 0 : i32
    %5 = vector.broadcast %c0_i32_0 : i32 to vector<1x256xi32>
    %6 = arith.cmpi ne, %4, %5 : vector<1x256xi32>
    %c0_i32_1 = arith.constant 0 : i32
    %7 = vector.broadcast %c0_i32_1 : i32 to vector<1x256xi32>
    %8 = arith.cmpi slt, %4, %7 : vector<1x256xi32>
    %c0_i32_2 = arith.constant 0 : i32
    %9 = arith.cmpi slt, %2, %c0_i32_2 : i32
    %10 = vector.broadcast %9 : i1 to vector<1x256xi1>
    %11 = vector.broadcast %10 : vector<1x256xi1> to vector<1x256xi1>
    %12 = arith.xori %8, %11 : vector<1x256xi1>
    %13 = arith.andi %12, %6 : vector<1x256xi1>
    %14 = vector.broadcast %2 : i32 to vector<1x256xi32>
    %15 = arith.addi %4, %14 : vector<1x256xi32>
    %16 = arith.select %13, %15, %4 : vector<1x256xi1>, vector<1x256xi32>
    %c0 = arith.constant 0 : index
    %c0_3 = arith.constant 0 : index
    %17 = vector.load %arg1[%c0, %c0_3] : memref<96x32xbf16, #tpu.memory_space<vmem>>, vector<96x32xbf16>
    %c0_4 = arith.constant 0 : index
    %c0_5 = arith.constant 0 : index
    %18 = vector.load %arg0[%c0_4, %c0_5] : memref<32x256xbf16, #tpu.memory_space<vmem>>, vector<32x256xbf16>
    %cst = arith.constant dense<0.000000e+00> : vector<96x256xf32>
    %19 = tpu.matmul %17, %18, %cst {dimension_numbers = #tpu.dot_dimension_numbers<[1], [0], [0], [1], [0, 0, 1, 1], [], []>} : vector<96x32xbf16>, vector<32x256xbf16>, vector<96x256xf32> -> vector<96x256xf32>
    %20 = vector.extract_strided_slice %19 {offsets = [0, 0], sizes = [32, 256], strides = [1, 1]} : vector<96x256xf32> to vector<32x256xf32>
    %21 = math.tanh %20 : vector<32x256xf32>
    %22 = vector.extract_strided_slice %19 {offsets = [32, 0], sizes = [32, 256], strides = [1, 1]} : vector<96x256xf32> to vector<32x256xf32>
    %23 = arith.negf %22 : vector<32x256xf32>
    %24 = math.exp %23 : vector<32x256xf32>
    %cst_6 = arith.constant 1.000000e+00 : f32
    %25 = vector.broadcast %cst_6 : f32 to vector<32x256xf32>
    %26 = arith.addf %25, %24 : vector<32x256xf32>
    %27 = arith.divf %25, %26 : vector<32x256xf32>
    %28 = arith.mulf %21, %27 : vector<32x256xf32>
    %29 = vector.extract_strided_slice %19 {offsets = [64, 0], sizes = [32, 256], strides = [1, 1]} : vector<96x256xf32> to vector<32x256xf32>
    %30 = arith.addf %29, %28 : vector<32x256xf32>
    %c0_7 = arith.constant 0 : index
    %c0_8 = arith.constant 0 : index
    %c0_9 = arith.constant 0 : index
    %31 = vector.load %arg2[%c0_7, %c0_8, %c0_9] : memref<6x32x32xbf16, #tpu.memory_space<vmem>>, vector<1x32x32xbf16>
    %32 = vector.shape_cast %31 : vector<1x32x32xbf16> to vector<32x32xbf16>
    %33 = arith.truncf %30 : vector<32x256xf32> to vector<32x256xbf16>
    %cst_10 = arith.constant dense<0.000000e+00> : vector<32x256xf32>
    %34 = tpu.matmul %32, %33, %cst_10 {dimension_numbers = #tpu.dot_dimension_numbers<[1], [0], [0], [1], [0, 0, 1, 1], [], []>} : vector<32x32xbf16>, vector<32x256xbf16>, vector<32x256xf32> -> vector<32x256xf32>
    %c0_11 = arith.constant 0 : index
    %c0_12 = arith.constant 0 : index
    %35 = vector.load %arg6[%c0_11, %c0_12] : memref<32x18xf32, #tpu.memory_space<vmem>>, vector<32x1xf32>
    %36 = vector.broadcast %35 : vector<32x1xf32> to vector<32x256xf32>
    %37 = arith.addf %34, %36 : vector<32x256xf32>
    %cst_13 = arith.constant 0.000000e+00 : f32
    %38 = vector.broadcast %cst_13 : f32 to vector<32x256xf32>
    %39 = arith.maximumf %37, %38 : vector<32x256xf32>
    %c1_i32_14 = arith.constant 1 : i32
    %40 = vector.broadcast %c1_i32_14 : i32 to vector<1x256xi32>
    %41 = arith.cmpi sge, %16, %40 : vector<1x256xi32>
    %c1_i32_15 = arith.constant 1 : i32
    %42 = tpu.dynamic_rotate %39 by %c1_i32_15 dim 1 : vector<32x256xf32>, i32 -> vector<32x256xf32>
    %cst_16 = arith.constant 0.000000e+00 : f32
    %43 = vector.shape_cast %41 : vector<1x256xi1> to vector<1x256xi1>
    %44 = vector.broadcast %43 : vector<1x256xi1> to vector<32x256xi1>
    %45 = vector.broadcast %cst_16 : f32 to vector<32x256xf32>
    %46 = arith.select %44, %42, %45 : vector<32x256xi1>, vector<32x256xf32>
    %47 = arith.truncf %46 : vector<32x256xf32> to vector<32x256xbf16>
    %c127_i32 = arith.constant 127 : i32
    %48 = vector.broadcast %c127_i32 : i32 to vector<1x256xi32>
    %49 = arith.cmpi slt, %16, %48 : vector<1x256xi32>
    %c255_i32 = arith.constant 255 : i32
    %50 = tpu.dynamic_rotate %39 by %c255_i32 dim 1 : vector<32x256xf32>, i32 -> vector<32x256xf32>
    %cst_17 = arith.constant 0.000000e+00 : f32
    %51 = vector.shape_cast %49 : vector<1x256xi1> to vector<1x256xi1>
    %52 = vector.broadcast %51 : vector<1x256xi1> to vector<32x256xi1>
    %53 = vector.broadcast %cst_17 : f32 to vector<32x256xf32>
    %54 = arith.select %52, %50, %53 : vector<32x256xi1>, vector<32x256xf32>
    %55 = arith.truncf %54 : vector<32x256xf32> to vector<32x256xbf16>
    %56 = arith.truncf %39 : vector<32x256xf32> to vector<32x256xbf16>
    %57 = tpu.concatenate %47, %56, %55 in 0 : vector<32x256xbf16>, vector<32x256xbf16>, vector<32x256xbf16> -> vector<96x256xbf16>
    %c0_18 = arith.constant 0 : index
    %c0_19 = arith.constant 0 : index
    %c0_20 = arith.constant 0 : index
    %58 = vector.load %arg3[%c0_18, %c0_19, %c0_20] : memref<4x32x96xbf16, #tpu.memory_space<vmem>>, vector<1x32x96xbf16>
    %59 = vector.shape_cast %58 : vector<1x32x96xbf16> to vector<32x96xbf16>
    %cst_21 = arith.constant dense<0.000000e+00> : vector<32x256xf32>
    %60 = tpu.matmul %59, %57, %cst_21 {dimension_numbers = #tpu.dot_dimension_numbers<[1], [0], [0], [1], [0, 0, 1, 1], [], []>} : vector<32x96xbf16>, vector<96x256xbf16>, vector<32x256xf32> -> vector<32x256xf32>
    %c0_22 = arith.constant 0 : index
    %c1 = arith.constant 1 : index
    %61 = vector.load %arg6[%c0_22, %c1] : memref<32x18xf32, #tpu.memory_space<vmem>>, vector<32x1xf32>
    %62 = vector.broadcast %61 : vector<32x1xf32> to vector<32x256xf32>
    %63 = arith.addf %60, %62 : vector<32x256xf32>
    %c0_23 = arith.constant 0 : index
    %c2 = arith.constant 2 : index
    %64 = vector.load %arg6[%c0_23, %c2] : memref<32x18xf32, #tpu.memory_space<vmem>>, vector<32x1xf32>
    %c0_24 = arith.constant 0 : index
    %c3 = arith.constant 3 : index
    %65 = vector.load %arg6[%c0_24, %c3] : memref<32x18xf32, #tpu.memory_space<vmem>>, vector<32x1xf32>
    %66 = vector.extract_strided_slice %63 {offsets = [0, 0], sizes = [32, 128], strides = [1, 1]} : vector<32x256xf32> to vector<32x128xf32>
    %cst_25 = arith.constant dense<0.000000e+00> : vector<32xf32>
    %67 = vector.multi_reduction <add>, %66, %cst_25 [1] : vector<32x128xf32> to vector<32xf32>
    %68 = vector.shape_cast %67 : vector<32xf32> to vector<32x1xf32>
    %cst_26 = arith.constant dense<0.000000e+00> : vector<1xf32>
    %69 = vector.multi_reduction <add>, %68, %cst_26 [0] : vector<32x1xf32> to vector<1xf32>
    %70 = vector.shape_cast %69 : vector<1xf32> to vector<1x1xf32>
    %71 = arith.mulf %66, %66 : vector<32x128xf32>
    %cst_27 = arith.constant dense<0.000000e+00> : vector<32xf32>
    %72 = vector.multi_reduction <add>, %71, %cst_27 [1] : vector<32x128xf32> to vector<32xf32>
    %73 = vector.shape_cast %72 : vector<32xf32> to vector<32x1xf32>
    %cst_28 = arith.constant dense<0.000000e+00> : vector<1xf32>
    %74 = vector.multi_reduction <add>, %73, %cst_28 [0] : vector<32x1xf32> to vector<1xf32>
    %75 = vector.shape_cast %74 : vector<1xf32> to vector<1x1xf32>
    %cst_29 = arith.constant 2.44140625E-4 : f32
    %76 = vector.broadcast %cst_29 : f32 to vector<1x1xf32>
    %77 = arith.mulf %70, %76 : vector<1x1xf32>
    %cst_30 = arith.constant 2.44140625E-4 : f32
    %78 = vector.broadcast %cst_30 : f32 to vector<1x1xf32>
    %79 = arith.mulf %75, %78 : vector<1x1xf32>
    %80 = arith.mulf %77, %77 : vector<1x1xf32>
    %81 = arith.subf %79, %80 : vector<1x1xf32>
    %cst_31 = arith.constant 0.000000e+00 : f32
    %82 = vector.broadcast %cst_31 : f32 to vector<1x1xf32>
    %83 = arith.maximumf %81, %82 : vector<1x1xf32>
    %cst_32 = arith.constant 9.99999974E-6 : f32
    %84 = vector.broadcast %cst_32 : f32 to vector<1x1xf32>
    %85 = arith.addf %83, %84 : vector<1x1xf32>
    %86 = math.rsqrt %85 : vector<1x1xf32>
    %87 = vector.broadcast %77 : vector<1x1xf32> to vector<32x128xf32>
    %88 = arith.subf %66, %87 : vector<32x128xf32>
    %89 = vector.broadcast %86 : vector<1x1xf32> to vector<32x128xf32>
    %90 = arith.mulf %88, %89 : vector<32x128xf32>
    %91 = vector.extract_strided_slice %63 {offsets = [0, 128], sizes = [32, 128], strides = [1, 1]} : vector<32x256xf32> to vector<32x128xf32>
    %cst_33 = arith.constant dense<0.000000e+00> : vector<32xf32>
    %92 = vector.multi_reduction <add>, %91, %cst_33 [1] : vector<32x128xf32> to vector<32xf32>
    %93 = vector.shape_cast %92 : vector<32xf32> to vector<32x1xf32>
    %cst_34 = arith.constant dense<0.000000e+00> : vector<1xf32>
    %94 = vector.multi_reduction <add>, %93, %cst_34 [0] : vector<32x1xf32> to vector<1xf32>
    %95 = vector.shape_cast %94 : vector<1xf32> to vector<1x1xf32>
    %96 = arith.mulf %91, %91 : vector<32x128xf32>
    %cst_35 = arith.constant dense<0.000000e+00> : vector<32xf32>
    %97 = vector.multi_reduction <add>, %96, %cst_35 [1] : vector<32x128xf32> to vector<32xf32>
    %98 = vector.shape_cast %97 : vector<32xf32> to vector<32x1xf32>
    %cst_36 = arith.constant dense<0.000000e+00> : vector<1xf32>
    %99 = vector.multi_reduction <add>, %98, %cst_36 [0] : vector<32x1xf32> to vector<1xf32>
    %100 = vector.shape_cast %99 : vector<1xf32> to vector<1x1xf32>
    %cst_37 = arith.constant 2.44140625E-4 : f32
    %101 = vector.broadcast %cst_37 : f32 to vector<1x1xf32>
    %102 = arith.mulf %95, %101 : vector<1x1xf32>
    %cst_38 = arith.constant 2.44140625E-4 : f32
    %103 = vector.broadcast %cst_38 : f32 to vector<1x1xf32>
    %104 = arith.mulf %100, %103 : vector<1x1xf32>
    %105 = arith.mulf %102, %102 : vector<1x1xf32>
    %106 = arith.subf %104, %105 : vector<1x1xf32>
    %cst_39 = arith.constant 0.000000e+00 : f32
    %107 = vector.broadcast %cst_39 : f32 to vector<1x1xf32>
    %108 = arith.maximumf %106, %107 : vector<1x1xf32>
    %cst_40 = arith.constant 9.99999974E-6 : f32
    %109 = vector.broadcast %cst_40 : f32 to vector<1x1xf32>
    %110 = arith.addf %108, %109 : vector<1x1xf32>
    %111 = math.rsqrt %110 : vector<1x1xf32>
    %112 = vector.broadcast %102 : vector<1x1xf32> to vector<32x128xf32>
    %113 = arith.subf %91, %112 : vector<32x128xf32>
    %114 = vector.broadcast %111 : vector<1x1xf32> to vector<32x128xf32>
    %115 = arith.mulf %113, %114 : vector<32x128xf32>
    %116 = tpu.concatenate %90, %115 in 1 : vector<32x128xf32>, vector<32x128xf32> -> vector<32x256xf32>
    %117 = vector.broadcast %64 : vector<32x1xf32> to vector<32x256xf32>
    %118 = arith.mulf %116, %117 : vector<32x256xf32>
    %119 = vector.broadcast %65 : vector<32x1xf32> to vector<32x256xf32>
    %120 = arith.addf %118, %119 : vector<32x256xf32>
    %c1_41 = arith.constant 1 : index
    %c0_42 = arith.constant 0 : index
    %c0_43 = arith.constant 0 : index
    %121 = vector.load %arg2[%c1_41, %c0_42, %c0_43] : memref<6x32x32xbf16, #tpu.memory_space<vmem>>, vector<1x32x32xbf16>
    %122 = vector.shape_cast %121 : vector<1x32x32xbf16> to vector<32x32xbf16>
    %123 = arith.truncf %120 : vector<32x256xf32> to vector<32x256xbf16>
    %cst_44 = arith.constant dense<0.000000e+00> : vector<32x256xf32>
    %124 = tpu.matmul %122, %123, %cst_44 {dimension_numbers = #tpu.dot_dimension_numbers<[1], [0], [0], [1], [0, 0, 1, 1], [], []>} : vector<32x32xbf16>, vector<32x256xbf16>, vector<32x256xf32> -> vector<32x256xf32>
    %c0_45 = arith.constant 0 : index
    %c4 = arith.constant 4 : index
    %125 = vector.load %arg6[%c0_45, %c4] : memref<32x18xf32, #tpu.memory_space<vmem>>, vector<32x1xf32>
    %126 = vector.broadcast %125 : vector<32x1xf32> to vector<32x256xf32>
    %127 = arith.addf %124, %126 : vector<32x256xf32>
    %cst_46 = arith.constant 0.000000e+00 : f32
    %128 = vector.broadcast %cst_46 : f32 to vector<32x256xf32>
    %129 = arith.maximumf %127, %128 : vector<32x256xf32>
    %c2_i32 = arith.constant 2 : i32
    %130 = vector.broadcast %c2_i32 : i32 to vector<1x256xi32>
    %131 = arith.cmpi sge, %16, %130 : vector<1x256xi32>
    %c2_i32_47 = arith.constant 2 : i32
    %132 = tpu.dynamic_rotate %129 by %c2_i32_47 dim 1 : vector<32x256xf32>, i32 -> vector<32x256xf32>
    %cst_48 = arith.constant 0.000000e+00 : f32
    %133 = vector.shape_cast %131 : vector<1x256xi1> to vector<1x256xi1>
    %134 = vector.broadcast %133 : vector<1x256xi1> to vector<32x256xi1>
    %135 = vector.broadcast %cst_48 : f32 to vector<32x256xf32>
    %136 = arith.select %134, %132, %135 : vector<32x256xi1>, vector<32x256xf32>
    %137 = arith.truncf %136 : vector<32x256xf32> to vector<32x256xbf16>
    %c126_i32 = arith.constant 126 : i32
    %138 = vector.broadcast %c126_i32 : i32 to vector<1x256xi32>
    %139 = arith.cmpi slt, %16, %138 : vector<1x256xi32>
    %c254_i32 = arith.constant 254 : i32
    %140 = tpu.dynamic_rotate %129 by %c254_i32 dim 1 : vector<32x256xf32>, i32 -> vector<32x256xf32>
    %cst_49 = arith.constant 0.000000e+00 : f32
    %141 = vector.shape_cast %139 : vector<1x256xi1> to vector<1x256xi1>
    %142 = vector.broadcast %141 : vector<1x256xi1> to vector<32x256xi1>
    %143 = vector.broadcast %cst_49 : f32 to vector<32x256xf32>
    %144 = arith.select %142, %140, %143 : vector<32x256xi1>, vector<32x256xf32>
    %145 = arith.truncf %144 : vector<32x256xf32> to vector<32x256xbf16>
    %146 = arith.truncf %129 : vector<32x256xf32> to vector<32x256xbf16>
    %147 = tpu.concatenate %137, %146, %145 in 0 : vector<32x256xbf16>, vector<32x256xbf16>, vector<32x256xbf16> -> vector<96x256xbf16>
    %c1_50 = arith.constant 1 : index
    %c0_51 = arith.constant 0 : index
    %c0_52 = arith.constant 0 : index
    %148 = vector.load %arg3[%c1_50, %c0_51, %c0_52] : memref<4x32x96xbf16, #tpu.memory_space<vmem>>, vector<1x32x96xbf16>
    %149 = vector.shape_cast %148 : vector<1x32x96xbf16> to vector<32x96xbf16>
    %cst_53 = arith.constant dense<0.000000e+00> : vector<32x256xf32>
    %150 = tpu.matmul %149, %147, %cst_53 {dimension_numbers = #tpu.dot_dimension_numbers<[1], [0], [0], [1], [0, 0, 1, 1], [], []>} : vector<32x96xbf16>, vector<96x256xbf16>, vector<32x256xf32> -> vector<32x256xf32>
    %c0_54 = arith.constant 0 : index
    %c5 = arith.constant 5 : index
    %151 = vector.load %arg6[%c0_54, %c5] : memref<32x18xf32, #tpu.memory_space<vmem>>, vector<32x1xf32>
    %152 = vector.broadcast %151 : vector<32x1xf32> to vector<32x256xf32>
    %153 = arith.addf %150, %152 : vector<32x256xf32>
    %c0_55 = arith.constant 0 : index
    %c6 = arith.constant 6 : index
    %154 = vector.load %arg6[%c0_55, %c6] : memref<32x18xf32, #tpu.memory_space<vmem>>, vector<32x1xf32>
    %c0_56 = arith.constant 0 : index
    %c7 = arith.constant 7 : index
    %155 = vector.load %arg6[%c0_56, %c7] : memref<32x18xf32, #tpu.memory_space<vmem>>, vector<32x1xf32>
    %156 = vector.extract_strided_slice %153 {offsets = [0, 0], sizes = [32, 128], strides = [1, 1]} : vector<32x256xf32> to vector<32x128xf32>
    %cst_57 = arith.constant dense<0.000000e+00> : vector<32xf32>
    %157 = vector.multi_reduction <add>, %156, %cst_57 [1] : vector<32x128xf32> to vector<32xf32>
    %158 = vector.shape_cast %157 : vector<32xf32> to vector<32x1xf32>
    %cst_58 = arith.constant dense<0.000000e+00> : vector<1xf32>
    %159 = vector.multi_reduction <add>, %158, %cst_58 [0] : vector<32x1xf32> to vector<1xf32>
    %160 = vector.shape_cast %159 : vector<1xf32> to vector<1x1xf32>
    %161 = arith.mulf %156, %156 : vector<32x128xf32>
    %cst_59 = arith.constant dense<0.000000e+00> : vector<32xf32>
    %162 = vector.multi_reduction <add>, %161, %cst_59 [1] : vector<32x128xf32> to vector<32xf32>
    %163 = vector.shape_cast %162 : vector<32xf32> to vector<32x1xf32>
    %cst_60 = arith.constant dense<0.000000e+00> : vector<1xf32>
    %164 = vector.multi_reduction <add>, %163, %cst_60 [0] : vector<32x1xf32> to vector<1xf32>
    %165 = vector.shape_cast %164 : vector<1xf32> to vector<1x1xf32>
    %cst_61 = arith.constant 2.44140625E-4 : f32
    %166 = vector.broadcast %cst_61 : f32 to vector<1x1xf32>
    %167 = arith.mulf %160, %166 : vector<1x1xf32>
    %cst_62 = arith.constant 2.44140625E-4 : f32
    %168 = vector.broadcast %cst_62 : f32 to vector<1x1xf32>
    %169 = arith.mulf %165, %168 : vector<1x1xf32>
    %170 = arith.mulf %167, %167 : vector<1x1xf32>
    %171 = arith.subf %169, %170 : vector<1x1xf32>
    %cst_63 = arith.constant 0.000000e+00 : f32
    %172 = vector.broadcast %cst_63 : f32 to vector<1x1xf32>
    %173 = arith.maximumf %171, %172 : vector<1x1xf32>
    %cst_64 = arith.constant 9.99999974E-6 : f32
    %174 = vector.broadcast %cst_64 : f32 to vector<1x1xf32>
    %175 = arith.addf %173, %174 : vector<1x1xf32>
    %176 = math.rsqrt %175 : vector<1x1xf32>
    %177 = vector.broadcast %167 : vector<1x1xf32> to vector<32x128xf32>
    %178 = arith.subf %156, %177 : vector<32x128xf32>
    %179 = vector.broadcast %176 : vector<1x1xf32> to vector<32x128xf32>
    %180 = arith.mulf %178, %179 : vector<32x128xf32>
    %181 = vector.extract_strided_slice %153 {offsets = [0, 128], sizes = [32, 128], strides = [1, 1]} : vector<32x256xf32> to vector<32x128xf32>
    %cst_65 = arith.constant dense<0.000000e+00> : vector<32xf32>
    %182 = vector.multi_reduction <add>, %181, %cst_65 [1] : vector<32x128xf32> to vector<32xf32>
    %183 = vector.shape_cast %182 : vector<32xf32> to vector<32x1xf32>
    %cst_66 = arith.constant dense<0.000000e+00> : vector<1xf32>
    %184 = vector.multi_reduction <add>, %183, %cst_66 [0] : vector<32x1xf32> to vector<1xf32>
    %185 = vector.shape_cast %184 : vector<1xf32> to vector<1x1xf32>
    %186 = arith.mulf %181, %181 : vector<32x128xf32>
    %cst_67 = arith.constant dense<0.000000e+00> : vector<32xf32>
    %187 = vector.multi_reduction <add>, %186, %cst_67 [1] : vector<32x128xf32> to vector<32xf32>
    %188 = vector.shape_cast %187 : vector<32xf32> to vector<32x1xf32>
    %cst_68 = arith.constant dense<0.000000e+00> : vector<1xf32>
    %189 = vector.multi_reduction <add>, %188, %cst_68 [0] : vector<32x1xf32> to vector<1xf32>
    %190 = vector.shape_cast %189 : vector<1xf32> to vector<1x1xf32>
    %cst_69 = arith.constant 2.44140625E-4 : f32
    %191 = vector.broadcast %cst_69 : f32 to vector<1x1xf32>
    %192 = arith.mulf %185, %191 : vector<1x1xf32>
    %cst_70 = arith.constant 2.44140625E-4 : f32
    %193 = vector.broadcast %cst_70 : f32 to vector<1x1xf32>
    %194 = arith.mulf %190, %193 : vector<1x1xf32>
    %195 = arith.mulf %192, %192 : vector<1x1xf32>
    %196 = arith.subf %194, %195 : vector<1x1xf32>
    %cst_71 = arith.constant 0.000000e+00 : f32
    %197 = vector.broadcast %cst_71 : f32 to vector<1x1xf32>
    %198 = arith.maximumf %196, %197 : vector<1x1xf32>
    %cst_72 = arith.constant 9.99999974E-6 : f32
    %199 = vector.broadcast %cst_72 : f32 to vector<1x1xf32>
    %200 = arith.addf %198, %199 : vector<1x1xf32>
    %201 = math.rsqrt %200 : vector<1x1xf32>
    %202 = vector.broadcast %192 : vector<1x1xf32> to vector<32x128xf32>
    %203 = arith.subf %181, %202 : vector<32x128xf32>
    %204 = vector.broadcast %201 : vector<1x1xf32> to vector<32x128xf32>
    %205 = arith.mulf %203, %204 : vector<32x128xf32>
    %206 = tpu.concatenate %180, %205 in 1 : vector<32x128xf32>, vector<32x128xf32> -> vector<32x256xf32>
    %207 = vector.broadcast %154 : vector<32x1xf32> to vector<32x256xf32>
    %208 = arith.mulf %206, %207 : vector<32x256xf32>
    %209 = vector.broadcast %155 : vector<32x1xf32> to vector<32x256xf32>
    %210 = arith.addf %208, %209 : vector<32x256xf32>
    %211 = arith.addf %120, %210 : vector<32x256xf32>
    %c2_73 = arith.constant 2 : index
    %c0_74 = arith.constant 0 : index
    %c0_75 = arith.constant 0 : index
    %212 = vector.load %arg2[%c2_73, %c0_74, %c0_75] : memref<6x32x32xbf16, #tpu.memory_space<vmem>>, vector<1x32x32xbf16>
    %213 = vector.shape_cast %212 : vector<1x32x32xbf16> to vector<32x32xbf16>
    %214 = arith.truncf %210 : vector<32x256xf32> to vector<32x256xbf16>
    %cst_76 = arith.constant dense<0.000000e+00> : vector<32x256xf32>
    %215 = tpu.matmul %213, %214, %cst_76 {dimension_numbers = #tpu.dot_dimension_numbers<[1], [0], [0], [1], [0, 0, 1, 1], [], []>} : vector<32x32xbf16>, vector<32x256xbf16>, vector<32x256xf32> -> vector<32x256xf32>
    %c0_77 = arith.constant 0 : index
    %c8 = arith.constant 8 : index
    %216 = vector.load %arg6[%c0_77, %c8] : memref<32x18xf32, #tpu.memory_space<vmem>>, vector<32x1xf32>
    %217 = vector.broadcast %216 : vector<32x1xf32> to vector<32x256xf32>
    %218 = arith.addf %215, %217 : vector<32x256xf32>
    %cst_78 = arith.constant 0.000000e+00 : f32
    %219 = vector.broadcast %cst_78 : f32 to vector<32x256xf32>
    %220 = arith.maximumf %218, %219 : vector<32x256xf32>
    %c4_i32 = arith.constant 4 : i32
    %221 = vector.broadcast %c4_i32 : i32 to vector<1x256xi32>
    %222 = arith.cmpi sge, %16, %221 : vector<1x256xi32>
    %c4_i32_79 = arith.constant 4 : i32
    %223 = tpu.dynamic_rotate %220 by %c4_i32_79 dim 1 : vector<32x256xf32>, i32 -> vector<32x256xf32>
    %cst_80 = arith.constant 0.000000e+00 : f32
    %224 = vector.shape_cast %222 : vector<1x256xi1> to vector<1x256xi1>
    %225 = vector.broadcast %224 : vector<1x256xi1> to vector<32x256xi1>
    %226 = vector.broadcast %cst_80 : f32 to vector<32x256xf32>
    %227 = arith.select %225, %223, %226 : vector<32x256xi1>, vector<32x256xf32>
    %228 = arith.truncf %227 : vector<32x256xf32> to vector<32x256xbf16>
    %c124_i32 = arith.constant 124 : i32
    %229 = vector.broadcast %c124_i32 : i32 to vector<1x256xi32>
    %230 = arith.cmpi slt, %16, %229 : vector<1x256xi32>
    %c252_i32 = arith.constant 252 : i32
    %231 = tpu.dynamic_rotate %220 by %c252_i32 dim 1 : vector<32x256xf32>, i32 -> vector<32x256xf32>
    %cst_81 = arith.constant 0.000000e+00 : f32
    %232 = vector.shape_cast %230 : vector<1x256xi1> to vector<1x256xi1>
    %233 = vector.broadcast %232 : vector<1x256xi1> to vector<32x256xi1>
    %234 = vector.broadcast %cst_81 : f32 to vector<32x256xf32>
    %235 = arith.select %233, %231, %234 : vector<32x256xi1>, vector<32x256xf32>
    %236 = arith.truncf %235 : vector<32x256xf32> to vector<32x256xbf16>
    %237 = arith.truncf %220 : vector<32x256xf32> to vector<32x256xbf16>
    %238 = tpu.concatenate %228, %237, %236 in 0 : vector<32x256xbf16>, vector<32x256xbf16>, vector<32x256xbf16> -> vector<96x256xbf16>
    %c2_82 = arith.constant 2 : index
    %c0_83 = arith.constant 0 : index
    %c0_84 = arith.constant 0 : index
    %239 = vector.load %arg3[%c2_82, %c0_83, %c0_84] : memref<4x32x96xbf16, #tpu.memory_space<vmem>>, vector<1x32x96xbf16>
    %240 = vector.shape_cast %239 : vector<1x32x96xbf16> to vector<32x96xbf16>
    %cst_85 = arith.constant dense<0.000000e+00> : vector<32x256xf32>
    %241 = tpu.matmul %240, %238, %cst_85 {dimension_numbers = #tpu.dot_dimension_numbers<[1], [0], [0], [1], [0, 0, 1, 1], [], []>} : vector<32x96xbf16>, vector<96x256xbf16>, vector<32x256xf32> -> vector<32x256xf32>
    %c0_86 = arith.constant 0 : index
    %c9 = arith.constant 9 : index
    %242 = vector.load %arg6[%c0_86, %c9] : memref<32x18xf32, #tpu.memory_space<vmem>>, vector<32x1xf32>
    %243 = vector.broadcast %242 : vector<32x1xf32> to vector<32x256xf32>
    %244 = arith.addf %241, %243 : vector<32x256xf32>
    %c0_87 = arith.constant 0 : index
    %c10 = arith.constant 10 : index
    %245 = vector.load %arg6[%c0_87, %c10] : memref<32x18xf32, #tpu.memory_space<vmem>>, vector<32x1xf32>
    %c0_88 = arith.constant 0 : index
    %c11 = arith.constant 11 : index
    %246 = vector.load %arg6[%c0_88, %c11] : memref<32x18xf32, #tpu.memory_space<vmem>>, vector<32x1xf32>
    %247 = vector.extract_strided_slice %244 {offsets = [0, 0], sizes = [32, 128], strides = [1, 1]} : vector<32x256xf32> to vector<32x128xf32>
    %cst_89 = arith.constant dense<0.000000e+00> : vector<32xf32>
    %248 = vector.multi_reduction <add>, %247, %cst_89 [1] : vector<32x128xf32> to vector<32xf32>
    %249 = vector.shape_cast %248 : vector<32xf32> to vector<32x1xf32>
    %cst_90 = arith.constant dense<0.000000e+00> : vector<1xf32>
    %250 = vector.multi_reduction <add>, %249, %cst_90 [0] : vector<32x1xf32> to vector<1xf32>
    %251 = vector.shape_cast %250 : vector<1xf32> to vector<1x1xf32>
    %252 = arith.mulf %247, %247 : vector<32x128xf32>
    %cst_91 = arith.constant dense<0.000000e+00> : vector<32xf32>
    %253 = vector.multi_reduction <add>, %252, %cst_91 [1] : vector<32x128xf32> to vector<32xf32>
    %254 = vector.shape_cast %253 : vector<32xf32> to vector<32x1xf32>
    %cst_92 = arith.constant dense<0.000000e+00> : vector<1xf32>
    %255 = vector.multi_reduction <add>, %254, %cst_92 [0] : vector<32x1xf32> to vector<1xf32>
    %256 = vector.shape_cast %255 : vector<1xf32> to vector<1x1xf32>
    %cst_93 = arith.constant 2.44140625E-4 : f32
    %257 = vector.broadcast %cst_93 : f32 to vector<1x1xf32>
    %258 = arith.mulf %251, %257 : vector<1x1xf32>
    %cst_94 = arith.constant 2.44140625E-4 : f32
    %259 = vector.broadcast %cst_94 : f32 to vector<1x1xf32>
    %260 = arith.mulf %256, %259 : vector<1x1xf32>
    %261 = arith.mulf %258, %258 : vector<1x1xf32>
    %262 = arith.subf %260, %261 : vector<1x1xf32>
    %cst_95 = arith.constant 0.000000e+00 : f32
    %263 = vector.broadcast %cst_95 : f32 to vector<1x1xf32>
    %264 = arith.maximumf %262, %263 : vector<1x1xf32>
    %cst_96 = arith.constant 9.99999974E-6 : f32
    %265 = vector.broadcast %cst_96 : f32 to vector<1x1xf32>
    %266 = arith.addf %264, %265 : vector<1x1xf32>
    %267 = math.rsqrt %266 : vector<1x1xf32>
    %268 = vector.broadcast %258 : vector<1x1xf32> to vector<32x128xf32>
    %269 = arith.subf %247, %268 : vector<32x128xf32>
    %270 = vector.broadcast %267 : vector<1x1xf32> to vector<32x128xf32>
    %271 = arith.mulf %269, %270 : vector<32x128xf32>
    %272 = vector.extract_strided_slice %244 {offsets = [0, 128], sizes = [32, 128], strides = [1, 1]} : vector<32x256xf32> to vector<32x128xf32>
    %cst_97 = arith.constant dense<0.000000e+00> : vector<32xf32>
    %273 = vector.multi_reduction <add>, %272, %cst_97 [1] : vector<32x128xf32> to vector<32xf32>
    %274 = vector.shape_cast %273 : vector<32xf32> to vector<32x1xf32>
    %cst_98 = arith.constant dense<0.000000e+00> : vector<1xf32>
    %275 = vector.multi_reduction <add>, %274, %cst_98 [0] : vector<32x1xf32> to vector<1xf32>
    %276 = vector.shape_cast %275 : vector<1xf32> to vector<1x1xf32>
    %277 = arith.mulf %272, %272 : vector<32x128xf32>
    %cst_99 = arith.constant dense<0.000000e+00> : vector<32xf32>
    %278 = vector.multi_reduction <add>, %277, %cst_99 [1] : vector<32x128xf32> to vector<32xf32>
    %279 = vector.shape_cast %278 : vector<32xf32> to vector<32x1xf32>
    %cst_100 = arith.constant dense<0.000000e+00> : vector<1xf32>
    %280 = vector.multi_reduction <add>, %279, %cst_100 [0] : vector<32x1xf32> to vector<1xf32>
    %281 = vector.shape_cast %280 : vector<1xf32> to vector<1x1xf32>
    %cst_101 = arith.constant 2.44140625E-4 : f32
    %282 = vector.broadcast %cst_101 : f32 to vector<1x1xf32>
    %283 = arith.mulf %276, %282 : vector<1x1xf32>
    %cst_102 = arith.constant 2.44140625E-4 : f32
    %284 = vector.broadcast %cst_102 : f32 to vector<1x1xf32>
    %285 = arith.mulf %281, %284 : vector<1x1xf32>
    %286 = arith.mulf %283, %283 : vector<1x1xf32>
    %287 = arith.subf %285, %286 : vector<1x1xf32>
    %cst_103 = arith.constant 0.000000e+00 : f32
    %288 = vector.broadcast %cst_103 : f32 to vector<1x1xf32>
    %289 = arith.maximumf %287, %288 : vector<1x1xf32>
    %cst_104 = arith.constant 9.99999974E-6 : f32
    %290 = vector.broadcast %cst_104 : f32 to vector<1x1xf32>
    %291 = arith.addf %289, %290 : vector<1x1xf32>
    %292 = math.rsqrt %291 : vector<1x1xf32>
    %293 = vector.broadcast %283 : vector<1x1xf32> to vector<32x128xf32>
    %294 = arith.subf %272, %293 : vector<32x128xf32>
    %295 = vector.broadcast %292 : vector<1x1xf32> to vector<32x128xf32>
    %296 = arith.mulf %294, %295 : vector<32x128xf32>
    %297 = tpu.concatenate %271, %296 in 1 : vector<32x128xf32>, vector<32x128xf32> -> vector<32x256xf32>
    %298 = vector.broadcast %245 : vector<32x1xf32> to vector<32x256xf32>
    %299 = arith.mulf %297, %298 : vector<32x256xf32>
    %300 = vector.broadcast %246 : vector<32x1xf32> to vector<32x256xf32>
    %301 = arith.addf %299, %300 : vector<32x256xf32>
    %302 = arith.addf %211, %301 : vector<32x256xf32>
    %c3_105 = arith.constant 3 : index
    %c0_106 = arith.constant 0 : index
    %c0_107 = arith.constant 0 : index
    %303 = vector.load %arg2[%c3_105, %c0_106, %c0_107] : memref<6x32x32xbf16, #tpu.memory_space<vmem>>, vector<1x32x32xbf16>
    %304 = vector.shape_cast %303 : vector<1x32x32xbf16> to vector<32x32xbf16>
    %305 = arith.truncf %301 : vector<32x256xf32> to vector<32x256xbf16>
    %cst_108 = arith.constant dense<0.000000e+00> : vector<32x256xf32>
    %306 = tpu.matmul %304, %305, %cst_108 {dimension_numbers = #tpu.dot_dimension_numbers<[1], [0], [0], [1], [0, 0, 1, 1], [], []>} : vector<32x32xbf16>, vector<32x256xbf16>, vector<32x256xf32> -> vector<32x256xf32>
    %c0_109 = arith.constant 0 : index
    %c12 = arith.constant 12 : index
    %307 = vector.load %arg6[%c0_109, %c12] : memref<32x18xf32, #tpu.memory_space<vmem>>, vector<32x1xf32>
    %308 = vector.broadcast %307 : vector<32x1xf32> to vector<32x256xf32>
    %309 = arith.addf %306, %308 : vector<32x256xf32>
    %cst_110 = arith.constant 0.000000e+00 : f32
    %310 = vector.broadcast %cst_110 : f32 to vector<32x256xf32>
    %311 = arith.maximumf %309, %310 : vector<32x256xf32>
    %c8_i32 = arith.constant 8 : i32
    %312 = vector.broadcast %c8_i32 : i32 to vector<1x256xi32>
    %313 = arith.cmpi sge, %16, %312 : vector<1x256xi32>
    %c8_i32_111 = arith.constant 8 : i32
    %314 = tpu.dynamic_rotate %311 by %c8_i32_111 dim 1 : vector<32x256xf32>, i32 -> vector<32x256xf32>
    %cst_112 = arith.constant 0.000000e+00 : f32
    %315 = vector.shape_cast %313 : vector<1x256xi1> to vector<1x256xi1>
    %316 = vector.broadcast %315 : vector<1x256xi1> to vector<32x256xi1>
    %317 = vector.broadcast %cst_112 : f32 to vector<32x256xf32>
    %318 = arith.select %316, %314, %317 : vector<32x256xi1>, vector<32x256xf32>
    %319 = arith.truncf %318 : vector<32x256xf32> to vector<32x256xbf16>
    %c120_i32 = arith.constant 120 : i32
    %320 = vector.broadcast %c120_i32 : i32 to vector<1x256xi32>
    %321 = arith.cmpi slt, %16, %320 : vector<1x256xi32>
    %c248_i32 = arith.constant 248 : i32
    %322 = tpu.dynamic_rotate %311 by %c248_i32 dim 1 : vector<32x256xf32>, i32 -> vector<32x256xf32>
    %cst_113 = arith.constant 0.000000e+00 : f32
    %323 = vector.shape_cast %321 : vector<1x256xi1> to vector<1x256xi1>
    %324 = vector.broadcast %323 : vector<1x256xi1> to vector<32x256xi1>
    %325 = vector.broadcast %cst_113 : f32 to vector<32x256xf32>
    %326 = arith.select %324, %322, %325 : vector<32x256xi1>, vector<32x256xf32>
    %327 = arith.truncf %326 : vector<32x256xf32> to vector<32x256xbf16>
    %328 = arith.truncf %311 : vector<32x256xf32> to vector<32x256xbf16>
    %329 = tpu.concatenate %319, %328, %327 in 0 : vector<32x256xbf16>, vector<32x256xbf16>, vector<32x256xbf16> -> vector<96x256xbf16>
    %c3_114 = arith.constant 3 : index
    %c0_115 = arith.constant 0 : index
    %c0_116 = arith.constant 0 : index
    %330 = vector.load %arg3[%c3_114, %c0_115, %c0_116] : memref<4x32x96xbf16, #tpu.memory_space<vmem>>, vector<1x32x96xbf16>
    %331 = vector.shape_cast %330 : vector<1x32x96xbf16> to vector<32x96xbf16>
    %cst_117 = arith.constant dense<0.000000e+00> : vector<32x256xf32>
    %332 = tpu.matmul %331, %329, %cst_117 {dimension_numbers = #tpu.dot_dimension_numbers<[1], [0], [0], [1], [0, 0, 1, 1], [], []>} : vector<32x96xbf16>, vector<96x256xbf16>, vector<32x256xf32> -> vector<32x256xf32>
    %c0_118 = arith.constant 0 : index
    %c13 = arith.constant 13 : index
    %333 = vector.load %arg6[%c0_118, %c13] : memref<32x18xf32, #tpu.memory_space<vmem>>, vector<32x1xf32>
    %334 = vector.broadcast %333 : vector<32x1xf32> to vector<32x256xf32>
    %335 = arith.addf %332, %334 : vector<32x256xf32>
    %c0_119 = arith.constant 0 : index
    %c14 = arith.constant 14 : index
    %336 = vector.load %arg6[%c0_119, %c14] : memref<32x18xf32, #tpu.memory_space<vmem>>, vector<32x1xf32>
    %c0_120 = arith.constant 0 : index
    %c15 = arith.constant 15 : index
    %337 = vector.load %arg6[%c0_120, %c15] : memref<32x18xf32, #tpu.memory_space<vmem>>, vector<32x1xf32>
    %338 = vector.extract_strided_slice %335 {offsets = [0, 0], sizes = [32, 128], strides = [1, 1]} : vector<32x256xf32> to vector<32x128xf32>
    %cst_121 = arith.constant dense<0.000000e+00> : vector<32xf32>
    %339 = vector.multi_reduction <add>, %338, %cst_121 [1] : vector<32x128xf32> to vector<32xf32>
    %340 = vector.shape_cast %339 : vector<32xf32> to vector<32x1xf32>
    %cst_122 = arith.constant dense<0.000000e+00> : vector<1xf32>
    %341 = vector.multi_reduction <add>, %340, %cst_122 [0] : vector<32x1xf32> to vector<1xf32>
    %342 = vector.shape_cast %341 : vector<1xf32> to vector<1x1xf32>
    %343 = arith.mulf %338, %338 : vector<32x128xf32>
    %cst_123 = arith.constant dense<0.000000e+00> : vector<32xf32>
    %344 = vector.multi_reduction <add>, %343, %cst_123 [1] : vector<32x128xf32> to vector<32xf32>
    %345 = vector.shape_cast %344 : vector<32xf32> to vector<32x1xf32>
    %cst_124 = arith.constant dense<0.000000e+00> : vector<1xf32>
    %346 = vector.multi_reduction <add>, %345, %cst_124 [0] : vector<32x1xf32> to vector<1xf32>
    %347 = vector.shape_cast %346 : vector<1xf32> to vector<1x1xf32>
    %cst_125 = arith.constant 2.44140625E-4 : f32
    %348 = vector.broadcast %cst_125 : f32 to vector<1x1xf32>
    %349 = arith.mulf %342, %348 : vector<1x1xf32>
    %cst_126 = arith.constant 2.44140625E-4 : f32
    %350 = vector.broadcast %cst_126 : f32 to vector<1x1xf32>
    %351 = arith.mulf %347, %350 : vector<1x1xf32>
    %352 = arith.mulf %349, %349 : vector<1x1xf32>
    %353 = arith.subf %351, %352 : vector<1x1xf32>
    %cst_127 = arith.constant 0.000000e+00 : f32
    %354 = vector.broadcast %cst_127 : f32 to vector<1x1xf32>
    %355 = arith.maximumf %353, %354 : vector<1x1xf32>
    %cst_128 = arith.constant 9.99999974E-6 : f32
    %356 = vector.broadcast %cst_128 : f32 to vector<1x1xf32>
    %357 = arith.addf %355, %356 : vector<1x1xf32>
    %358 = math.rsqrt %357 : vector<1x1xf32>
    %359 = vector.broadcast %349 : vector<1x1xf32> to vector<32x128xf32>
    %360 = arith.subf %338, %359 : vector<32x128xf32>
    %361 = vector.broadcast %358 : vector<1x1xf32> to vector<32x128xf32>
    %362 = arith.mulf %360, %361 : vector<32x128xf32>
    %363 = vector.extract_strided_slice %335 {offsets = [0, 128], sizes = [32, 128], strides = [1, 1]} : vector<32x256xf32> to vector<32x128xf32>
    %cst_129 = arith.constant dense<0.000000e+00> : vector<32xf32>
    %364 = vector.multi_reduction <add>, %363, %cst_129 [1] : vector<32x128xf32> to vector<32xf32>
    %365 = vector.shape_cast %364 : vector<32xf32> to vector<32x1xf32>
    %cst_130 = arith.constant dense<0.000000e+00> : vector<1xf32>
    %366 = vector.multi_reduction <add>, %365, %cst_130 [0] : vector<32x1xf32> to vector<1xf32>
    %367 = vector.shape_cast %366 : vector<1xf32> to vector<1x1xf32>
    %368 = arith.mulf %363, %363 : vector<32x128xf32>
    %cst_131 = arith.constant dense<0.000000e+00> : vector<32xf32>
    %369 = vector.multi_reduction <add>, %368, %cst_131 [1] : vector<32x128xf32> to vector<32xf32>
    %370 = vector.shape_cast %369 : vector<32xf32> to vector<32x1xf32>
    %cst_132 = arith.constant dense<0.000000e+00> : vector<1xf32>
    %371 = vector.multi_reduction <add>, %370, %cst_132 [0] : vector<32x1xf32> to vector<1xf32>
    %372 = vector.shape_cast %371 : vector<1xf32> to vector<1x1xf32>
    %cst_133 = arith.constant 2.44140625E-4 : f32
    %373 = vector.broadcast %cst_133 : f32 to vector<1x1xf32>
    %374 = arith.mulf %367, %373 : vector<1x1xf32>
    %cst_134 = arith.constant 2.44140625E-4 : f32
    %375 = vector.broadcast %cst_134 : f32 to vector<1x1xf32>
    %376 = arith.mulf %372, %375 : vector<1x1xf32>
    %377 = arith.mulf %374, %374 : vector<1x1xf32>
    %378 = arith.subf %376, %377 : vector<1x1xf32>
    %cst_135 = arith.constant 0.000000e+00 : f32
    %379 = vector.broadcast %cst_135 : f32 to vector<1x1xf32>
    %380 = arith.maximumf %378, %379 : vector<1x1xf32>
    %cst_136 = arith.constant 9.99999974E-6 : f32
    %381 = vector.broadcast %cst_136 : f32 to vector<1x1xf32>
    %382 = arith.addf %380, %381 : vector<1x1xf32>
    %383 = math.rsqrt %382 : vector<1x1xf32>
    %384 = vector.broadcast %374 : vector<1x1xf32> to vector<32x128xf32>
    %385 = arith.subf %363, %384 : vector<32x128xf32>
    %386 = vector.broadcast %383 : vector<1x1xf32> to vector<32x128xf32>
    %387 = arith.mulf %385, %386 : vector<32x128xf32>
    %388 = tpu.concatenate %362, %387 in 1 : vector<32x128xf32>, vector<32x128xf32> -> vector<32x256xf32>
    %389 = vector.broadcast %336 : vector<32x1xf32> to vector<32x256xf32>
    %390 = arith.mulf %388, %389 : vector<32x256xf32>
    %391 = vector.broadcast %337 : vector<32x1xf32> to vector<32x256xf32>
    %392 = arith.addf %390, %391 : vector<32x256xf32>
    %393 = arith.addf %302, %392 : vector<32x256xf32>
    %c4_137 = arith.constant 4 : index
    %c0_138 = arith.constant 0 : index
    %c0_139 = arith.constant 0 : index
    %394 = vector.load %arg2[%c4_137, %c0_138, %c0_139] : memref<6x32x32xbf16, #tpu.memory_space<vmem>>, vector<1x32x32xbf16>
    %395 = vector.shape_cast %394 : vector<1x32x32xbf16> to vector<32x32xbf16>
    %396 = arith.truncf %393 : vector<32x256xf32> to vector<32x256xbf16>
    %cst_140 = arith.constant dense<0.000000e+00> : vector<32x256xf32>
    %397 = tpu.matmul %395, %396, %cst_140 {dimension_numbers = #tpu.dot_dimension_numbers<[1], [0], [0], [1], [0, 0, 1, 1], [], []>} : vector<32x32xbf16>, vector<32x256xbf16>, vector<32x256xf32> -> vector<32x256xf32>
    %c0_141 = arith.constant 0 : index
    %c16 = arith.constant 16 : index
    %398 = vector.load %arg6[%c0_141, %c16] : memref<32x18xf32, #tpu.memory_space<vmem>>, vector<32x1xf32>
    %399 = vector.broadcast %398 : vector<32x1xf32> to vector<32x256xf32>
    %400 = arith.addf %397, %399 : vector<32x256xf32>
    %401 = vector.extract_strided_slice %400 {offsets = [0, 0], sizes = [32, 128], strides = [1, 1]} : vector<32x256xf32> to vector<32x128xf32>
    %cst_142 = arith.constant dense<0.000000e+00> : vector<32xf32>
    %402 = vector.multi_reduction <add>, %401, %cst_142 [1] : vector<32x128xf32> to vector<32xf32>
    %403 = vector.shape_cast %402 : vector<32xf32> to vector<32x1xf32>
    %cst_143 = arith.constant dense<0.000000e+00> : vector<1xf32>
    %404 = vector.multi_reduction <add>, %403, %cst_143 [0] : vector<32x1xf32> to vector<1xf32>
    %405 = vector.shape_cast %404 : vector<1xf32> to vector<1x1xf32>
    %406 = arith.mulf %401, %401 : vector<32x128xf32>
    %cst_144 = arith.constant dense<0.000000e+00> : vector<32xf32>
    %407 = vector.multi_reduction <add>, %406, %cst_144 [1] : vector<32x128xf32> to vector<32xf32>
    %408 = vector.shape_cast %407 : vector<32xf32> to vector<32x1xf32>
    %cst_145 = arith.constant dense<0.000000e+00> : vector<1xf32>
    %409 = vector.multi_reduction <add>, %408, %cst_145 [0] : vector<32x1xf32> to vector<1xf32>
    %410 = vector.shape_cast %409 : vector<1xf32> to vector<1x1xf32>
    %cst_146 = arith.constant 2.44140625E-4 : f32
    %411 = vector.broadcast %cst_146 : f32 to vector<1x1xf32>
    %412 = arith.mulf %405, %411 : vector<1x1xf32>
    %cst_147 = arith.constant 2.44140625E-4 : f32
    %413 = vector.broadcast %cst_147 : f32 to vector<1x1xf32>
    %414 = arith.mulf %410, %413 : vector<1x1xf32>
    %415 = arith.mulf %412, %412 : vector<1x1xf32>
    %416 = arith.subf %414, %415 : vector<1x1xf32>
    %cst_148 = arith.constant 0.000000e+00 : f32
    %417 = vector.broadcast %cst_148 : f32 to vector<1x1xf32>
    %418 = arith.maximumf %416, %417 : vector<1x1xf32>
    %cst_149 = arith.constant 9.99999974E-6 : f32
    %419 = vector.broadcast %cst_149 : f32 to vector<1x1xf32>
    %420 = arith.addf %418, %419 : vector<1x1xf32>
    %421 = math.rsqrt %420 : vector<1x1xf32>
    %422 = vector.broadcast %412 : vector<1x1xf32> to vector<32x128xf32>
    %423 = arith.subf %401, %422 : vector<32x128xf32>
    %424 = vector.broadcast %421 : vector<1x1xf32> to vector<32x128xf32>
    %425 = arith.mulf %423, %424 : vector<32x128xf32>
    %426 = vector.extract_strided_slice %400 {offsets = [0, 128], sizes = [32, 128], strides = [1, 1]} : vector<32x256xf32> to vector<32x128xf32>
    %cst_150 = arith.constant dense<0.000000e+00> : vector<32xf32>
    %427 = vector.multi_reduction <add>, %426, %cst_150 [1] : vector<32x128xf32> to vector<32xf32>
    %428 = vector.shape_cast %427 : vector<32xf32> to vector<32x1xf32>
    %cst_151 = arith.constant dense<0.000000e+00> : vector<1xf32>
    %429 = vector.multi_reduction <add>, %428, %cst_151 [0] : vector<32x1xf32> to vector<1xf32>
    %430 = vector.shape_cast %429 : vector<1xf32> to vector<1x1xf32>
    %431 = arith.mulf %426, %426 : vector<32x128xf32>
    %cst_152 = arith.constant dense<0.000000e+00> : vector<32xf32>
    %432 = vector.multi_reduction <add>, %431, %cst_152 [1] : vector<32x128xf32> to vector<32xf32>
    %433 = vector.shape_cast %432 : vector<32xf32> to vector<32x1xf32>
    %cst_153 = arith.constant dense<0.000000e+00> : vector<1xf32>
    %434 = vector.multi_reduction <add>, %433, %cst_153 [0] : vector<32x1xf32> to vector<1xf32>
    %435 = vector.shape_cast %434 : vector<1xf32> to vector<1x1xf32>
    %cst_154 = arith.constant 2.44140625E-4 : f32
    %436 = vector.broadcast %cst_154 : f32 to vector<1x1xf32>
    %437 = arith.mulf %430, %436 : vector<1x1xf32>
    %cst_155 = arith.constant 2.44140625E-4 : f32
    %438 = vector.broadcast %cst_155 : f32 to vector<1x1xf32>
    %439 = arith.mulf %435, %438 : vector<1x1xf32>
    %440 = arith.mulf %437, %437 : vector<1x1xf32>
    %441 = arith.subf %439, %440 : vector<1x1xf32>
    %cst_156 = arith.constant 0.000000e+00 : f32
    %442 = vector.broadcast %cst_156 : f32 to vector<1x1xf32>
    %443 = arith.maximumf %441, %442 : vector<1x1xf32>
    %cst_157 = arith.constant 9.99999974E-6 : f32
    %444 = vector.broadcast %cst_157 : f32 to vector<1x1xf32>
    %445 = arith.addf %443, %444 : vector<1x1xf32>
    %446 = math.rsqrt %445 : vector<1x1xf32>
    %447 = vector.broadcast %437 : vector<1x1xf32> to vector<32x128xf32>
    %448 = arith.subf %426, %447 : vector<32x128xf32>
    %449 = vector.broadcast %446 : vector<1x1xf32> to vector<32x128xf32>
    %450 = arith.mulf %448, %449 : vector<32x128xf32>
    %451 = tpu.concatenate %425, %450 in 1 : vector<32x128xf32>, vector<32x128xf32> -> vector<32x256xf32>
    %c5_158 = arith.constant 5 : index
    %c0_159 = arith.constant 0 : index
    %c0_160 = arith.constant 0 : index
    %452 = vector.load %arg2[%c5_158, %c0_159, %c0_160] : memref<6x32x32xbf16, #tpu.memory_space<vmem>>, vector<1x32x32xbf16>
    %453 = vector.shape_cast %452 : vector<1x32x32xbf16> to vector<32x32xbf16>
    %454 = arith.truncf %451 : vector<32x256xf32> to vector<32x256xbf16>
    %cst_161 = arith.constant dense<0.000000e+00> : vector<32x256xf32>
    %455 = tpu.matmul %453, %454, %cst_161 {dimension_numbers = #tpu.dot_dimension_numbers<[1], [0], [0], [1], [0, 0, 1, 1], [], []>} : vector<32x32xbf16>, vector<32x256xbf16>, vector<32x256xf32> -> vector<32x256xf32>
    %c0_162 = arith.constant 0 : index
    %c17 = arith.constant 17 : index
    %456 = vector.load %arg6[%c0_162, %c17] : memref<32x18xf32, #tpu.memory_space<vmem>>, vector<32x1xf32>
    %457 = vector.broadcast %456 : vector<32x1xf32> to vector<32x256xf32>
    %458 = arith.addf %455, %457 : vector<32x256xf32>
    %cst_163 = arith.constant 0.000000e+00 : f32
    %459 = vector.broadcast %cst_163 : f32 to vector<32x256xf32>
    %460 = arith.maximumf %458, %459 : vector<32x256xf32>
    %461 = vector.extract_strided_slice %460 {offsets = [0, 0], sizes = [32, 128], strides = [1, 1]} : vector<32x256xf32> to vector<32x128xf32>
    %cst_164 = arith.constant dense<0.000000e+00> : vector<32xf32>
    %462 = vector.multi_reduction <add>, %461, %cst_164 [1] : vector<32x128xf32> to vector<32xf32>
    %463 = vector.shape_cast %462 : vector<32xf32> to vector<32x1xf32>
    %cst_165 = arith.constant dense<0.000000e+00> : vector<1xf32>
    %464 = vector.multi_reduction <add>, %463, %cst_165 [0] : vector<32x1xf32> to vector<1xf32>
    %465 = vector.shape_cast %464 : vector<1xf32> to vector<1x1xf32>
    %466 = arith.mulf %461, %461 : vector<32x128xf32>
    %cst_166 = arith.constant dense<0.000000e+00> : vector<32xf32>
    %467 = vector.multi_reduction <add>, %466, %cst_166 [1] : vector<32x128xf32> to vector<32xf32>
    %468 = vector.shape_cast %467 : vector<32xf32> to vector<32x1xf32>
    %cst_167 = arith.constant dense<0.000000e+00> : vector<1xf32>
    %469 = vector.multi_reduction <add>, %468, %cst_167 [0] : vector<32x1xf32> to vector<1xf32>
    %470 = vector.shape_cast %469 : vector<1xf32> to vector<1x1xf32>
    %cst_168 = arith.constant 2.44140625E-4 : f32
    %471 = vector.broadcast %cst_168 : f32 to vector<1x1xf32>
    %472 = arith.mulf %465, %471 : vector<1x1xf32>
    %cst_169 = arith.constant 2.44140625E-4 : f32
    %473 = vector.broadcast %cst_169 : f32 to vector<1x1xf32>
    %474 = arith.mulf %470, %473 : vector<1x1xf32>
    %475 = arith.mulf %472, %472 : vector<1x1xf32>
    %476 = arith.subf %474, %475 : vector<1x1xf32>
    %cst_170 = arith.constant 0.000000e+00 : f32
    %477 = vector.broadcast %cst_170 : f32 to vector<1x1xf32>
    %478 = arith.maximumf %476, %477 : vector<1x1xf32>
    %cst_171 = arith.constant 9.99999974E-6 : f32
    %479 = vector.broadcast %cst_171 : f32 to vector<1x1xf32>
    %480 = arith.addf %478, %479 : vector<1x1xf32>
    %481 = math.rsqrt %480 : vector<1x1xf32>
    %482 = vector.broadcast %472 : vector<1x1xf32> to vector<32x128xf32>
    %483 = arith.subf %461, %482 : vector<32x128xf32>
    %484 = vector.broadcast %481 : vector<1x1xf32> to vector<32x128xf32>
    %485 = arith.mulf %483, %484 : vector<32x128xf32>
    %486 = vector.extract_strided_slice %460 {offsets = [0, 128], sizes = [32, 128], strides = [1, 1]} : vector<32x256xf32> to vector<32x128xf32>
    %cst_172 = arith.constant dense<0.000000e+00> : vector<32xf32>
    %487 = vector.multi_reduction <add>, %486, %cst_172 [1] : vector<32x128xf32> to vector<32xf32>
    %488 = vector.shape_cast %487 : vector<32xf32> to vector<32x1xf32>
    %cst_173 = arith.constant dense<0.000000e+00> : vector<1xf32>
    %489 = vector.multi_reduction <add>, %488, %cst_173 [0] : vector<32x1xf32> to vector<1xf32>
    %490 = vector.shape_cast %489 : vector<1xf32> to vector<1x1xf32>
    %491 = arith.mulf %486, %486 : vector<32x128xf32>
    %cst_174 = arith.constant dense<0.000000e+00> : vector<32xf32>
    %492 = vector.multi_reduction <add>, %491, %cst_174 [1] : vector<32x128xf32> to vector<32xf32>
    %493 = vector.shape_cast %492 : vector<32xf32> to vector<32x1xf32>
    %cst_175 = arith.constant dense<0.000000e+00> : vector<1xf32>
    %494 = vector.multi_reduction <add>, %493, %cst_175 [0] : vector<32x1xf32> to vector<1xf32>
    %495 = vector.shape_cast %494 : vector<1xf32> to vector<1x1xf32>
    %cst_176 = arith.constant 2.44140625E-4 : f32
    %496 = vector.broadcast %cst_176 : f32 to vector<1x1xf32>
    %497 = arith.mulf %490, %496 : vector<1x1xf32>
    %cst_177 = arith.constant 2.44140625E-4 : f32
    %498 = vector.broadcast %cst_177 : f32 to vector<1x1xf32>
    %499 = arith.mulf %495, %498 : vector<1x1xf32>
    %500 = arith.mulf %497, %497 : vector<1x1xf32>
    %501 = arith.subf %499, %500 : vector<1x1xf32>
    %cst_178 = arith.constant 0.000000e+00 : f32
    %502 = vector.broadcast %cst_178 : f32 to vector<1x1xf32>
    %503 = arith.maximumf %501, %502 : vector<1x1xf32>
    %cst_179 = arith.constant 9.99999974E-6 : f32
    %504 = vector.broadcast %cst_179 : f32 to vector<1x1xf32>
    %505 = arith.addf %503, %504 : vector<1x1xf32>
    %506 = math.rsqrt %505 : vector<1x1xf32>
    %507 = vector.broadcast %497 : vector<1x1xf32> to vector<32x128xf32>
    %508 = arith.subf %486, %507 : vector<32x128xf32>
    %509 = vector.broadcast %506 : vector<1x1xf32> to vector<32x128xf32>
    %510 = arith.mulf %508, %509 : vector<32x128xf32>
    %511 = tpu.concatenate %485, %510 in 1 : vector<32x128xf32>, vector<32x128xf32> -> vector<32x256xf32>
    %c0_180 = arith.constant 0 : index
    %c0_181 = arith.constant 0 : index
    %512 = vector.load %arg4[%c0_180, %c0_181] : memref<4x32xbf16, #tpu.memory_space<vmem>>, vector<4x32xbf16>
    %513 = arith.truncf %511 : vector<32x256xf32> to vector<32x256xbf16>
    %cst_182 = arith.constant dense<0.000000e+00> : vector<4x256xf32>
    %514 = tpu.matmul %512, %513, %cst_182 {dimension_numbers = #tpu.dot_dimension_numbers<[1], [0], [0], [1], [0, 0, 1, 1], [], []>} : vector<4x32xbf16>, vector<32x256xbf16>, vector<4x256xf32> -> vector<4x256xf32>
    %c0_183 = arith.constant 0 : index
    %c0_184 = arith.constant 0 : index
    %515 = vector.load %arg5[%c0_183, %c0_184] : memref<4x1xf32, #tpu.memory_space<vmem>>, vector<4x1xf32>
    %516 = vector.broadcast %515 : vector<4x1xf32> to vector<4x256xf32>
    %517 = arith.addf %514, %516 : vector<4x256xf32>
    %c0_185 = arith.constant 0 : index
    %c0_186 = arith.constant 0 : index
    %518 = vector.load %arg7[%c0_185, %c0_186] : memref<4x256xf32, #tpu.memory_space<vmem>>, vector<4x256xf32>
    tpu.vector_store %arg7[%c0_185, %c0_186], %517 {strides = array<i32>} : memref<4x256xf32, #tpu.memory_space<vmem>>, vector<4x256xf32>,
    return
  }
}

</mosaic_0001>

<bundles_post_ra>
// kernel: diffeeg_forward.1
= control target key start
LH: loop header
LB: loop body
LE: loop exit
PB: predicated region body
PF: predicated region fallthrough
CT: control target
= control target key end

     0   :  { %v3120_v2 = vmov 0   ;;  %vm121_vm0 = vcmask 261120   ;;  %s4188_s0 = inlined_call_operand.vmem [shape: bf16[32,256], index: 0, kind: input, shape index: {}]   ;;  %s4189_s1 = inlined_call_operand.vmem [shape: bf16[96,32], index: 1, kind: input, shape index: {}]   ;;  %s4190_s2 = inlined_call_operand.vmem [shape: bf16[6,32,32], index: 2, kind: input, shape index: {}]   ;;  %s4191_s3 = inlined_call_operand.vmem [shape: bf16[4,32,96], index: 3, kind: input, shape index: {}]   ;;  %s4192_s4 = inlined_call_operand.vmem [shape: bf16[4,32], index: 4, kind: input, shape index: {}]   ;;  %s4193_s5 = inlined_call_operand.vmem [shape: f32[4,1], index: 5, kind: input, shape index: {}]   ;;  %s4194_s6 = inlined_call_operand.vmem [shape: f32[32,18], index: 6, kind: input, shape index: {}]   ;;  %s4195_s7 = inlined_call_operand.hbm [shape: f32[4,256], index: 7, kind: output, shape index: {}]  }
   0x1   :  { %v2984_v0 = vld [vmem:[%s4188_s0 + $0x4] ss:$8 sps:$4 sm:$0xff]   ;;  %v2986_v1 = vld [vmem:[%s4188_s0] ss:$8 sps:$4 sm:$0xff]   ;;  %172 = vmatprep.mubr.bf16.mxu0 %v3120_v2  ;;  %385 = vmatprep.mubr.bf16.mxu1 %v3120_v2  ;;  %v2987_v3 = vld [vmem:[%s4188_s0 + $0x14] ss:$8 sps:$4 sm:$0xff]  }
   0x2   :  { %140 = vmatprep.subr.bf16.mxu0 %v2984_v0  ;;  %2782 = vset.pattern.permute.xlu0 %v3120_v2  ;;  %v2989_v4 = vld [vmem:[%s4188_s0 + $0x10] ss:$8 sps:$4 sm:$0xff]   ;;  %v2990_v5 = vld [vmem:[%s4189_s1] sm:$0xff]   ;;  %v2991_v6 = vld [vmem:[%s4189_s1 + $0x8] sm:$0xff]  }
   0x3   :  { %141 = vmatpush1.bf16.msra.mxu0 %v2986_v1  ;;  %2783 = vset.pattern.permute.xlu1 %v3120_v2  ;;  %v2992_v7 = vld [vmem:[%s4189_s1 + $0x10] sm:$0xff]  }
   0x4   :  { %142 = vmatprep.subr.bf16.mxu0 %v2987_v3 }
   0x7   :  { %143 = vmatpush1.bf16.msra.mxu0 %v2989_v4 }
   0xa   :  { %2572 = vmatmul.mubr.msk.bf16.vlgmr.msra.gmra.mrb[0].mxu0 %vm121_vm0, %v2990_v5 }
   0xb   :  { %182 = vmatprep.mubr.bf16.mxu0 %v3120_v2 }
  0x12   :  { %2573 = vmatmul.mubr.msk.bf16.gmra.mrb[4].mxu0 %vm121_vm0, %v2991_v6 }
  0x13   :  { %192 = vmatprep.mubr.bf16.mxu0 %v3120_v2 }
  0x14   :  { %12 = vsyncpa [#allocation3], 0  ;;  %v2993_v8 = vld [vmem:[%s4189_s1 + $0x18] sm:$0xff]   ;;  %v2994_v9 = vld [vmem:[%s4189_s1 + $0x20] sm:$0xff]   ;;  %s3121_s8 = smov 1   ;;  %s3122_s9 = smov 127  }
  0x15   :  { %v2995_v10 = vld [vmem:[%s4189_s1 + $0x28] sm:$0xff]   ;;  %v3236_v11 = vld [vmem:[%s4194_s6] sm:$0xff]  ;;  %v3241_v12 = vld [vmem:[%s4194_s6 + $0x10] sm:$0xff]  ;;  %vm534_vm10 = vcmask 785408   ;;  %s3127_s17 = smov 2   ;;  %s3128_s18 = smov 126  }
  0x16   :  { %319 = vperm.xlu0 %2782, %v3236_v11   ;;  %329 = vperm.xlu1 %2783, %v3241_v12   ;;  %v3248_v13 = vld [vmem:[%s4194_s6 + $0x8] sm:$0xff]  ;;  %v3253_v14 = vld [vmem:[%s4194_s6 + $0x18] sm:$0xff]  ;;  %s3133_s11 = smov 4   ;;  %s3134_s12 = smov 124  }
  0x17   :  { %s3139_s20 = smov 8   ;;  %s3140_s21 = smov 120  }
  0x1a   :  { %2574 = vmatmul.mubr.msk.bf16.gmra.mrb[8].mxu0 %vm121_vm0, %v2992_v7  ;;  %324 = vperm.xlu0 %2782, %v3248_v13  }
  0x1b   :  { %202 = vmatprep.mubr.bf16.mxu0 %v3120_v2  ;;  %334 = vperm.xlu1 %2783, %v3253_v14  }
  0x22   :  { %2575 = vmatmul.mubr.msk.bf16.gmra.mrb[12].mxu0 %vm121_vm0, %v2993_v8 }
  0x23   :  { %212 = vmatprep.mubr.bf16.mxu0 %v3120_v2 }
  0x2a   :  { %2576 = vmatmul.mubr.msk.bf16.gmra.mrb[16].mxu0 %vm121_vm0, %v2994_v9 }
  0x2b   :  { %222 = vmatprep.mubr.bf16.mxu0 %v3120_v2 }
  0x32   :  { %2577 = vmatmul.mubr.msk.bf16.gmra.mrb[20].mxu0 %vm121_vm0, %v2995_v10 }
  0x33   :  { %1009 = vmatprep.mubr.bf16.mxu0 %v3120_v2 }
  0xdd   :  { %v174_v15 = vpop.f32.mrb[0].mxu0 }
  0xde   :  { %v176_v16 = vpop.f32.mrb[1].mxu0 }
  0xdf   :  { %v178_v17 = vpop.f32.mrb[2].mxu0 }
  0xe0   :  { %v180_v18 = vpop.f32.mrb[3].mxu0 }
  0xe5   :  { %v184_v19 = vpop.f32.mrb[4].mxu0 }
  0xe6   :  { %v186_v20 = vpop.f32.mrb[5].mxu0 }
  0xe7   :  { %v188_v21 = vpop.f32.mrb[6].mxu0 }
  0xe8   :  { %v190_v22 = vpop.f32.mrb[7].mxu0 }
  0xed   :  { %v194_v23 = vpop.f32.mrb[8].mxu0 }
  0xee   :  { %v2578_v24 = vmul.f32 -1.442695, %v194_v23  ;;  %v196_v25 = vpop.f32.mrb[9].mxu0 }
  0xef   :  { %v2579_v26 = vmul.f32 -1.442695, %v196_v25  ;;  %v198_v27 = vpop.f32.mrb[10].mxu0 }
  0xf0   :  { %3016 = vpow2.f32 %v2578_v24  ;;  %v2580_v28 = vmul.f32 -1.442695, %v198_v27  ;;  %v200_v29 = vpop.f32.mrb[11].mxu0 }
  0xf1   :  { %3018 = vpow2.f32 %v2579_v26  ;;  %v2581_v30 = vmul.f32 -1.442695, %v200_v29 }
  0xf2   :  { %3020 = vpow2.f32 %v2580_v28 }
  0xf3   :  { %3022 = vpow2.f32 %v2581_v30 }
  0xf4   :  { %3024 = vtanh.f32 %v174_v15 }
  0xf5   :  { %v204_v31 = vpop.f32.mrb[12].mxu0  ;;  %3026 = vtanh.f32 %v176_v16 }
  0xf6   :  { %v2582_v32 = vmul.f32 -1.442695, %v204_v31  ;;  %v206_v33 = vpop.f32.mrb[13].mxu0  ;;  %3028 = vtanh.f32 %v178_v17 }
  0xf7   :  { %v2583_v34 = vmul.f32 -1.442695, %v206_v33  ;;  %v208_v35 = vpop.f32.mrb[14].mxu0 }
  0xf8   :  { %3030 = vpow2.f32 %v2582_v32  ;;  %v2584_v36 = vmul.f32 -1.442695, %v208_v35  ;;  %v210_v37 = vpop.f32.mrb[15].mxu0 }
  0xf9   :  { %3032 = vpow2.f32 %v2583_v34  ;;  %v2585_v38 = vmul.f32 -1.442695, %v210_v37 }
  0xfa   :  { %v3017_v39 = vpop.eup %3016  ;;  %3034 = vpow2.f32 %v2584_v36 }
  0xfb   :  { %v3019_v40 = vpop.eup %3018  ;;  %v265_v41 = vadd.f32 1.0, %v3017_v39  ;;  %3036 = vpow2.f32 %v2585_v38 }
  0xfc   :  { %v3021_v42 = vpop.eup %3020  ;;  %3038 = vtanh.f32 %v180_v18  ;;  %v266_v43 = vadd.f32 1.0, %v3019_v40  ;;  %v2996_v40 = vld [vmem:[%s4190_s2] sm:$0xff]  }
  0xfd   :  { %v3023_v44 = vpop.eup %3022  ;;  %3040 = vrcp.f32 %v265_v41  ;;  %v267_v45 = vadd.f32 1.0, %v3021_v42  ;;  %v214_v46 = vpop.f32.mrb[16].mxu0  ;;  %v2997_v41 = vld [vmem:[%s4190_s2 + $0x8] sm:$0xff]  }
  0xfe   :  { %3042 = vrcp.f32 %v266_v43  ;;  %v268_v47 = vadd.f32 1.0, %v3023_v44  ;;  %v216_v48 = vpop.f32.mrb[17].mxu0  ;;  %v3025_v49 = vpop.eup %3024 }
  0xff   :  { %3044 = vrcp.f32 %v267_v45  ;;  %v218_v50 = vpop.f32.mrb[18].mxu0  ;;  %v3027_v51 = vpop.eup %3026 }
 0x100   :  { %3046 = vrcp.f32 %v268_v47  ;;  %v220_v52 = vpop.f32.mrb[19].mxu0  ;;  %v3029_v53 = vpop.eup %3028 }
 0x101   :  { %3048 = vtanh.f32 %v184_v19  ;;  %v320_v42 = vpop.permute.xlu0 %319 }
 0x102   :  { %v3031_v54 = vpop.eup %3030  ;;  %3050 = vtanh.f32 %v186_v20 }
 0x103   :  { %v3033_v55 = vpop.eup %3032  ;;  %3052 = vtanh.f32 %v188_v21  ;;  %v269_v56 = vadd.f32 1.0, %v3031_v54 }
 0x104   :  { %v3035_v57 = vpop.eup %3034  ;;  %3054 = vtanh.f32 %v190_v22  ;;  %v270_v58 = vadd.f32 1.0, %v3033_v55 }
 0x105   :  { %v3037_v59 = vpop.eup %3036  ;;  %3056 = vrcp.f32 %v269_v56  ;;  %v271_v60 = vadd.f32 1.0, %v3035_v57  ;;  %v224_v61 = vpop.f32.mrb[20].mxu0 }
 0x106   :  { %v3039_v62 = vpop.eup %3038  ;;  %3058 = vrcp.f32 %v270_v58  ;;  %v272_v63 = vadd.f32 1.0, %v3037_v59  ;;  %v226_v0 = vpop.f32.mrb[21].mxu0 }
 0x107   :  { %v3041_v1 = vpop.eup %3040  ;;  %3060 = vrcp.f32 %v271_v60  ;;  %v228_v3 = vpop.f32.mrb[22].mxu0 }
 0x108   :  { %v3043_v4 = vpop.eup %3042  ;;  %3062 = vrcp.f32 %v272_v63  ;;  %v289_v5 = vmul.f32 %v3041_v1, %v3025_v49  ;;  %v230_v6 = vpop.f32.mrb[23].mxu0 }
 0x109   :  { %v3045_v7 = vpop.eup %3044  ;;  %v290_v8 = vmul.f32 %v3043_v4, %v3027_v51  ;;  %v325_v44 = vpop.permute.xlu0 %324 }
 0x10a   :  { %v3047_v9 = vpop.eup %3046  ;;  %v297_v10 = vadd.f32 %v289_v5, %v214_v46  ;;  %v291_v15 = vmul.f32 %v3045_v7, %v3029_v53  ;;  %v330_v51 = vpop.permute.xlu1 %329 }
 0x10b   :  { %v3049_v16 = vpop.eup %3048  ;;  %v298_v17 = vadd.f32 %v290_v8, %v216_v48  ;;  %v292_v18 = vmul.f32 %v3047_v9, %v3039_v62 }
 0x10c   :  { %v3051_v19 = vpop.eup %3050  ;;  %v299_v20 = vadd.f32 %v291_v15, %v218_v50 }
 0x10d   :  { %v3053_v21 = vpop.eup %3052  ;;  %v300_v22 = vadd.f32 %v292_v18, %v220_v52 }
 0x10e   :  { %v3055_v23 = vpop.eup %3054  ;;  %v309_v24 = vpack.c.bf16 %v299_v20, %v297_v10  ;;  %v28_v20 = vlaneseq }
 0x10f   :  { %v3057_v25 = vpop.eup %3056  ;;  %v310_v26 = vpack.c.bf16 %v300_v22, %v298_v17 }
 0x110   :  { %v3059_v27 = vpop.eup %3058  ;;  %v293_v28 = vmul.f32 %v3057_v25, %v3049_v16 }
 0x111   :  { %v3061_v29 = vpop.eup %3060  ;;  %v294_v30 = vmul.f32 %v3059_v27, %v3051_v19  ;;  %353 = vmatprep.subr.bf16.mxu1 %v310_v26  ;;  %v3123_v19 = vmov 1  }
 0x112   :  { %v3063_v31 = vpop.eup %3062  ;;  %v301_v32 = vadd.f32 %v293_v28, %v224_v61  ;;  %v295_v33 = vmul.f32 %v3061_v29, %v3053_v21  ;;  %354 = vmatpush1.bf16.msra.mxu1 %v309_v24  ;;  %2824 = vset.pattern.permute.xlu0 %v3123_v19  ;;  %v3279_v21 = vand.u32 127, %v28_v20 }
 0x113   :  { %v302_v34 = vadd.f32 %v294_v30, %v226_v0  ;;  %v296_v35 = vmul.f32 %v3063_v31, %v3055_v23  ;;  %v335_v0 = vpop.permute.xlu1 %334  ;;  %2825 = vset.pattern.permute.xlu1 %v3123_v19 }
 0x114   :  { %v303_v36 = vadd.f32 %v295_v33, %v228_v3  ;;  %v30_v22 = vadd.s32 128, %v3279_v21  ;;  %vm432_vm1 = vcmp.lt.s32.totalorder %v3279_v21, 1  ;;  %vm414_vm3 = vcmp.ge.s32.totalorder %v3279_v21, 1 }
 0x115   :  { %v304_v37 = vadd.f32 %v296_v35, %v230_v6  ;;  %vm3299_vm5 = vmpackc.low %vm414_vm3, %vm414_vm3  ;;  %vm457_vm6 = vcmp.lt.s32.totalorder %v3279_v21, 127  ;;  %vm868_vm11 = vcmp.lt.s32.totalorder %v3279_v21, 2  ;;  %vm850_vm13 = vcmp.ge.s32.totalorder %v3279_v21, 2 }
 0x116   :  { %v311_v38 = vpack.c.bf16 %v303_v36, %v301_v32  ;;  %v3282_v23 = vand.u32 127, %v30_v22  ;;  %vm2607_vm9 = vmpackc.low %vm457_vm6, %vm457_vm6 }
 0x117   :  { %v312_v39 = vpack.c.bf16 %v304_v37, %v302_v34  ;;  %vm3475_vm15 = vmpackc.low %vm850_vm13, %vm850_vm13 }
 0x118   :  { %vm415_vm2 = vcmp.ge.s32.totalorder %v3282_v23, 1  ;;  %vm458_vm7 = vcmp.lt.s32.totalorder %v3282_v23, 127  ;;  %vm851_vm12 = vcmp.ge.s32.totalorder %v3282_v23, 2 }
 0x119   :  { %355 = vmatprep.subr.bf16.mxu1 %v312_v39  ;;  %vm3295_vm4 = vmpackc.low %vm415_vm2, %vm415_vm2  ;;  %vm894_vm2 = vcmp.lt.s32.totalorder %v3282_v23, 126 }
 0x11a   :  { %356 = vmatpush1.bf16.msra.mxu1 %v311_v38  ;;  %vm2604_vm8 = vmpackc.low %vm458_vm7, %vm458_vm7  ;;  %vm1294_vm7 = vcmp.ge.s32.totalorder %v3279_v21, 4 }
 0x11b   :  { %vm3471_vm14 = vmpackc.low %vm851_vm12, %vm851_vm12  ;;  %vm1338_vm12 = vcmp.lt.s32.totalorder %v3282_v23, 124 }
 0x11c   :  { %vm2644_vm3 = vmpackc.low %vm894_vm2, %vm894_vm2  ;;  %vm1738_vm2 = vcmp.ge.s32.totalorder %v3279_v21, 8 }
 0x11d   :  { %2588 = vmatmul.mubr.msk.bf16.vlgmr.msra.gmra.mrb[0].mxu1 %vm121_vm0, %v2996_v40  ;;  %vm2684_vm13 = vmpackc.low %vm1338_vm12, %vm1338_vm12 }
 0x11e   :  { %395 = vmatprep.mubr.bf16.mxu1 %v3120_v2 }
 0x125   :  { %2589 = vmatmul.mubr.msk.bf16.gmra.mrb[4].mxu1 %vm121_vm0, %v2997_v41 }
 0x126   :  { %573 = vmatprep.mubr.bf16.mxu1 %v3120_v2 }
 0x1f0   :  { %v387_v43 = vpop.f32.mrb[0].mxu1 }
 0x1f1   :  { %v388_v45 = vadd.f32 %v387_v43, %v320_v42  ;;  %v389_v46 = vpop.f32.mrb[1].mxu1 }
 0x1f2   :  { %v390_v47 = vadd.f32 %v389_v46, %v320_v42  ;;  %v391_v48 = vpop.f32.mrb[2].mxu1 }
 0x1f3   :  { %v392_v49 = vadd.f32 %v391_v48, %v325_v44  ;;  %v393_v50 = vpop.f32.mrb[3].mxu1  ;;  %v406_v53 = vmax.f32 %v388_v45, 0.0 }
 0x1f4   :  { %v394_v52 = vadd.f32 %v393_v50, %v325_v44  ;;  %v407_v55 = vmax.f32 %v390_v47, 0.0 }
 0x1f5   :  { %v408_v54 = vmax.f32 %v392_v49, 0.0 }
 0x1f6   :  { %v409_v56 = vmax.f32 %v394_v52, 0.0 }
 0x1f7   :  { %v3267_v57 = vpack.c.bf16 %v408_v54, %v406_v53  ;;  %v2784_v58 = vpack.i.bf16 %v408_v54, %v406_v53 }
 0x1f8   :  { %v397_v59 = vpop.f32.mrb[4].mxu1  ;;  %v2789_v60 = vpack.i.bf16 %v409_v56, %v407_v55  ;;  %v3269_v61 = vpack.c.bf16 %v409_v56, %v407_v55 }
 0x1f9   :  { %v398_v62 = vadd.f32 %v397_v59, %v330_v51  ;;  %v399_v63 = vpop.f32.mrb[5].mxu1  ;;  %2785 = vrot.lane.b32.xlu0 %v2784_v58, %s3121_s8 }
 0x1fa   :  { %v400_v1 = vadd.f32 %v399_v63, %v330_v51  ;;  %v401_v3 = vpop.f32.mrb[6].mxu1  ;;  %2790 = vrot.lane.b32.xlu1 %v2789_v60, %s3121_s8 }
 0x1fb   :  { %v402_v4 = vadd.f32 %v401_v3, %v335_v0  ;;  %v403_v5 = vpop.f32.mrb[7].mxu1  ;;  %v410_v7 = vmax.f32 %v398_v62, 0.0 }
 0x1fc   :  { %v404_v6 = vadd.f32 %v403_v5, %v335_v0  ;;  %v411_v9 = vmax.f32 %v400_v1, 0.0 }
 0x1fd   :  { %v412_v8 = vmax.f32 %v402_v4, 0.0 }
 0x1fe   :  { %v413_v10 = vmax.f32 %v404_v6, 0.0 }
 0x1ff   :  { %v3271_v15 = vpack.c.bf16 %v412_v8, %v410_v7  ;;  %v2794_v16 = vpack.i.bf16 %v412_v8, %v410_v7 }
 0x200   :  { %v2799_v17 = vpack.i.bf16 %v413_v10, %v411_v9  ;;  %v3273_v18 = vpack.c.bf16 %v413_v10, %v411_v9 }
 0x201   :  { %2795 = vrot.lane.b32.xlu0 %v2794_v16, %s3121_s8 }
 0x202   :  { %2800 = vrot.lane.b32.xlu1 %v2799_v17, %s3121_s8 }
 0x205   :  { %2805 = vrot.lane.b32.xlu0 %v2784_v58, %s3122_s9 }
 0x206   :  { %2810 = vrot.lane.b32.xlu1 %v2789_v60, %s3122_s9 }
 0x209   :  { %2815 = vrot.lane.b32.xlu0 %v2794_v16, %s3122_s9  ;;  %v2999_v16 = vld [vmem:[%s4191_s3 + $0x8] sm:$0xff]  }
 0x20a   :  { %2820 = vrot.lane.b32.xlu1 %v2799_v17, %s3122_s9  ;;  %v3124_v17 = vmov 2  }
 0x20d   :  { %509 = vperm.xlu0 %2824, %v3236_v11  }
 0x20e   :  { %513 = vperm.xlu1 %2825, %v3248_v13  }
 0x211   :  { %521 = vperm.xlu0 %2824, %v3253_v14  }
 0x212   :  { %517 = vperm.xlu1 %2825, %v3241_v12  }
 0x215   :  { %2826 = vset.pattern.permute.xlu0 %v3124_v17 }
 0x216   :  { %2827 = vset.pattern.permute.xlu1 %v3124_v17 }
 0x26b   :  { %v2786_v24 = vpop.permute.xlu0 %2785 }
 0x26c   :  { %v2788_v25 = vunpack.i.h.bf16 %v2786_v24  ;;  %v2787_v26 = vunpack.i.l.bf16 %v2786_v24  ;;  %v2791_v27 = vpop.permute.xlu1 %2790 }
 0x26d   :  { %v2793_v28 = vunpack.i.h.bf16 %v2791_v27  ;;  %v2792_v29 = vunpack.i.l.bf16 %v2791_v27 }
 0x26f   :  { %v433_v30 = vsel %vm432_vm1, %v2787_v26, %v2792_v29  ;;  %v434_v31 = vsel %vm432_vm1, %v2788_v25, %v2793_v28  ;;  %v437_v32 = vsel %vm432_vm1, %v2792_v29, %v2787_v26  ;;  %v438_v33 = vsel %vm432_vm1, %v2793_v28, %v2788_v25 }
 0x270   :  { %v2596_v35 = vpack.c.bf16 %v438_v33, %v437_v32  ;;  %v2593_v36 = vpack.c.bf16 %v434_v31, %v433_v30 }
 0x272   :  { %2594 = vmatprep.subr.msk.bf16.mxu1 %vm3295_vm4, %v2593_v36 }
 0x273   :  { %v2796_v38 = vpop.permute.xlu0 %2795  ;;  %2597 = vmatpush1.bf16.msk.msra.mxu1 %vm3299_vm5, %v2596_v35 }
 0x274   :  { %v2798_v39 = vunpack.i.h.bf16 %v2796_v38  ;;  %v2797_v40 = vunpack.i.l.bf16 %v2796_v38  ;;  %v2801_v41 = vpop.permute.xlu1 %2800 }
 0x275   :  { %v2803_v42 = vunpack.i.h.bf16 %v2801_v41  ;;  %v2802_v43 = vunpack.i.l.bf16 %v2801_v41 }
 0x277   :  { %v435_v44 = vsel %vm432_vm1, %v2797_v40, %v2802_v43  ;;  %v436_v45 = vsel %vm432_vm1, %v2798_v39, %v2803_v42  ;;  %v439_v46 = vsel %vm432_vm1, %v2802_v43, %v2797_v40  ;;  %v440_v47 = vsel %vm432_vm1, %v2803_v42, %v2798_v39  ;;  %v2806_v48 = vpop.permute.xlu0 %2805 }
 0x278   :  { %v2602_v49 = vpack.c.bf16 %v440_v47, %v439_v46  ;;  %v2811_v50 = vpop.permute.xlu1 %2810  ;;  %v2599_v51 = vpack.c.bf16 %v436_v45, %v435_v44  ;;  %v2808_v52 = vunpack.i.h.bf16 %v2806_v48  ;;  %v2807_v53 = vunpack.i.l.bf16 %v2806_v48 }
 0x279   :  { %v2813_v54 = vunpack.i.h.bf16 %v2811_v50  ;;  %v2812_v55 = vunpack.i.l.bf16 %v2811_v50  ;;  %v3125_v48 = vmov 3   ;;  %vm893_vm1 = vcmp.lt.s32.totalorder %v3279_v21, 126 }
 0x27a   :  { %2600 = vmatprep.subr.msk.bf16.mxu1 %vm3295_vm4, %v2599_v51  ;;  %vm2647_vm4 = vmpackc.low %vm893_vm1, %vm893_vm1 }
 0x27b   :  { %2603 = vmatpush1.bf16.msk.msra.mxu1 %vm3299_vm5, %v2602_v49  ;;  %v2816_v56 = vpop.permute.xlu0 %2815  ;;  %v480_v59 = vsel %vm457_vm6, %v2812_v55, %v2807_v53  ;;  %v481_v60 = vsel %vm457_vm6, %v2813_v54, %v2808_v52  ;;  %v477_v3 = vsel %vm457_vm6, %v2808_v52, %v2813_v54  ;;  %v3126_v49 = vmov 4  }
 0x27c   :  { %v2821_v58 = vpop.permute.xlu1 %2820  ;;  %545 = vmatprep.subr.bf16.mxu1 %v3269_v61  ;;  %v2818_v62 = vunpack.i.h.bf16 %v2816_v56  ;;  %v2817_v63 = vunpack.i.l.bf16 %v2816_v56  ;;  %v476_v61 = vsel %vm457_vm6, %v2807_v53, %v2812_v55  ;;  %v2605_v4 = vpack.c.bf16 %v481_v60, %v480_v59 }
 0x27d   :  { %v2823_v0 = vunpack.i.h.bf16 %v2821_v58  ;;  %v2822_v1 = vunpack.i.l.bf16 %v2821_v58  ;;  %vm1312_vm5 = vcmp.lt.s32.totalorder %v3279_v21, 4 }
 0x27f   :  { %546 = vmatpush1.bf16.msra.mxu1 %v3267_v57  ;;  %v482_v5 = vsel %vm457_vm6, %v2822_v1, %v2817_v63  ;;  %v483_v6 = vsel %vm457_vm6, %v2823_v0, %v2818_v62  ;;  %v2608_v57 = vpack.c.bf16 %v477_v3, %v476_v61  ;;  %v478_v7 = vsel %vm457_vm6, %v2817_v63, %v2822_v1 }
 0x280   :  { %547 = vmatprep.subr.bf16.mxu1 %v3273_v18  ;;  %v479_v8 = vsel %vm457_vm6, %v2818_v62, %v2823_v0  ;;  %v2611_v9 = vpack.c.bf16 %v483_v6, %v482_v5  ;;  %vm1295_vm6 = vcmp.ge.s32.totalorder %v3282_v23, 4 }
 0x281   :  { %v2614_v10 = vpack.c.bf16 %v479_v8, %v478_v7 }
 0x283   :  { %548 = vmatpush1.bf16.msra.mxu1 %v3271_v15  ;;  %v2998_v15 = vld [vmem:[%s4191_s3] sm:$0xff]  }
 0x284   :  { %2606 = vmatprep.subr.msk.bf16.mxu1 %vm2604_vm8, %v2605_v4 }
 0x287   :  { %2609 = vmatpush1.bf16.msk.msra.mxu1 %vm2607_vm9, %v2608_v57 }
 0x288   :  { %2612 = vmatprep.subr.msk.bf16.mxu1 %vm2604_vm8, %v2611_v9  ;;  %vm3667_vm8 = vmpackc.low %vm1295_vm6, %vm1295_vm6  ;;  %vm1782_vm6 = vcmp.lt.s32.totalorder %v3282_v23, 120 }
 0x28b   :  { %2615 = vmatpush1.bf16.msk.msra.mxu1 %vm2607_vm9, %v2614_v10  ;;  %vm3671_vm9 = vmpackc.low %vm1294_vm7, %vm1294_vm7 }
 0x28c   :  { %v510_v18 = vpop.permute.xlu0 %509  ;;  %vm2724_vm7 = vmpackc.low %vm1782_vm6, %vm1782_vm6 }
 0x28d   :  { %v514_v26 = vpop.permute.xlu1 %513 }
 0x28e   :  { %2616 = vmatmul.mubr.msk.bf16.vlgmr.msra.gmra.mrb[8].mxu1 %vm534_vm10, %v2998_v15 }
 0x28f   :  { %583 = vmatprep.mubr.bf16.mxu1 %v3120_v2 }
 0x290   :  { %v522_v41 = vpop.permute.xlu0 %521 }
 0x291   :  { %v518_v38 = vpop.permute.xlu1 %517 }
 0x296   :  { %2617 = vmatmul.mubr.msk.bf16.gmra.mrb[12].mxu1 %vm534_vm10, %v2999_v16 }
 0x297   :  { %821 = vmatprep.mubr.bf16.mxu1 %v3120_v2 }
 0x361   :  { %v575_v19 = vpop.f32.mrb[8].mxu1 }
 0x362   :  { %v3354_v20 = vadd.f32 %v575_v19, %v510_v18  ;;  %v577_v22 = vpop.f32.mrb[9].mxu1 }
 0x363   :  { %v3356_v24 = vadd.f32 %v577_v22, %v510_v18  ;;  %v579_v25 = vpop.f32.mrb[10].mxu1 }
 0x364   :  { %v581_v27 = vpop.f32.mrb[11].mxu1  ;;  %594 = vadd.xlane.f32.xlu0 %v3354_v20  ;;  %v611_v28 = vmul.f32 %v3354_v20, %v3354_v20  ;;  %v3362_v29 = vadd.f32 %v579_v25, %v514_v26 }
 0x365   :  { %647 = vadd.xlane.f32.xlu1 %v3356_v24  ;;  %v3365_v31 = vadd.f32 %v581_v27, %v514_v26  ;;  %v664_v34 = vmul.f32 %v3356_v24, %v3356_v24 }
 0x366   :  { %v612_v37 = vmul.f32 %v3362_v29, %v3362_v29 }
 0x367   :  { %v665_v36 = vmul.f32 %v3365_v31, %v3365_v31 }
 0x368   :  { %615 = vadd.xlane.f32.xlu0 %v611_v28 }
 0x369   :  { %v585_v30 = vpop.f32.mrb[12].mxu1  ;;  %596 = vadd.xlane.f32.xlu1 %v3362_v29 }
 0x36a   :  { %v587_v32 = vpop.f32.mrb[13].mxu1  ;;  %v3376_v40 = vadd.f32 %v585_v30, %v518_v38 }
 0x36b   :  { %v589_v33 = vpop.f32.mrb[14].mxu1  ;;  %v3374_v39 = vadd.f32 %v587_v32, %v518_v38 }
 0x36c   :  { %v591_v35 = vpop.f32.mrb[15].mxu1  ;;  %649 = vadd.xlane.f32.xlu0 %v3365_v31  ;;  %v3380_v42 = vadd.f32 %v589_v33, %v522_v41  ;;  %v613_v43 = vmul.f32 %v3376_v40, %v3376_v40 }
 0x36d   :  { %668 = vadd.xlane.f32.xlu1 %v664_v34  ;;  %v3385_v44 = vadd.f32 %v591_v35, %v522_v41  ;;  %v666_v45 = vmul.f32 %v3374_v39, %v3374_v39 }
 0x36e   :  { %v614_v47 = vmul.f32 %v3380_v42, %v3380_v42 }
 0x36f   :  { %v667_v46 = vmul.f32 %v3385_v44, %v3385_v44 }
 0x370   :  { %670 = vadd.xlane.f32.xlu0 %v665_v36 }
 0x371   :  { %617 = vadd.xlane.f32.xlu1 %v612_v37 }
 0x374   :  { %651 = vadd.xlane.f32.xlu0 %v3374_v39 }
 0x375   :  { %598 = vadd.xlane.f32.xlu1 %v3376_v40 }
 0x378   :  { %600 = vadd.xlane.f32.xlu0 %v3380_v42 }
 0x379   :  { %619 = vadd.xlane.f32.xlu1 %v613_v43 }
 0x37c   :  { %653 = vadd.xlane.f32.xlu0 %v3385_v44 }
 0x37d   :  { %672 = vadd.xlane.f32.xlu1 %v666_v45 }
 0x380   :  { %674 = vadd.xlane.f32.xlu0 %v667_v46 }
 0x381   :  { %621 = vadd.xlane.f32.xlu1 %v614_v47 }
 0x392   :  { %705 = vperm.xlu1 %2827, %v3248_v13  }
 0x396   :  { %2828 = vset.pattern.permute.xlu1 %v3125_v48  ;;  %701 = vperm.xlu0 %2826, %v3236_v11  }
 0x397   :  { %725 = vperm.xlu1 %2828, %v3236_v11  }
 0x39a   :  { %2832 = vset.pattern.permute.xlu0 %v3126_v49 }
 0x39b   :  { %729 = vperm.xlu1 %2828, %v3248_v13   ;;  %762 = vperm.xlu0 %2832, %v3248_v13  }
 0x39f   :  { %2829 = vset.pattern.permute.xlu1 %v3124_v17 }
 0x3a0   :  { %709 = vperm.xlu1 %2829, %v3241_v12  }
 0x3a4   :  { %713 = vperm.xlu1 %2829, %v3253_v14  }
 0x3a8   :  { %2830 = vset.pattern.permute.xlu1 %v3125_v48 }
 0x3a9   :  { %733 = vperm.xlu1 %2830, %v3241_v12  }
 0x3ad   :  { %737 = vperm.xlu1 %2830, %v3253_v14  }
 0x3b1   :  { %2831 = vset.pattern.permute.xlu1 %v3126_v49 }
 0x3b2   :  { %758 = vperm.xlu1 %2831, %v3236_v11  }
 0x3b6   :  { %766 = vperm.xlu1 %2831, %v3241_v12  }
 0x3ba   :  { %770 = vperm.xlu1 %2831, %v3253_v14  }
 0x3f1   :  { %v595_v50 = vpop.xlane.xlu0 %594 }
 0x3f2   :  { %v648_v51 = vpop.xlane.xlu1 %647 }
 0x3f5   :  { %v616_v52 = vpop.xlane.xlu0 %615 }
 0x3f6   :  { %v597_v53 = vpop.xlane.xlu1 %596 }
 0x3f7   :  { %v602_v59 = vadd.f32 %v597_v53, %v595_v50 }
 0x3f9   :  { %v650_v54 = vpop.xlane.xlu0 %649 }
 0x3fa   :  { %v669_v55 = vpop.xlane.xlu1 %668  ;;  %v655_v1 = vadd.f32 %v650_v54, %v648_v51 }
 0x3fd   :  { %v671_v56 = vpop.xlane.xlu0 %670 }
 0x3fe   :  { %v618_v58 = vpop.xlane.xlu1 %617  ;;  %v676_v6 = vadd.f32 %v671_v56, %v669_v55 }
 0x3ff   :  { %v623_v10 = vadd.f32 %v618_v58, %v616_v52 }
 0x401   :  { %v652_v60 = vpop.xlane.xlu0 %651 }
 0x402   :  { %v599_v62 = vpop.xlane.xlu1 %598  ;;  %v656_v4 = vadd.f32 %v655_v1, %v652_v60 }
 0x403   :  { %v603_v63 = vadd.f32 %v602_v59, %v599_v62 }
 0x405   :  { %v601_v0 = vpop.xlane.xlu0 %600 }
 0x406   :  { %v604_v61 = vadd.f32 %v603_v63, %v601_v0  ;;  %v620_v3 = vpop.xlane.xlu1 %619 }
 0x407   :  { %v624_v18 = vadd.f32 %v623_v10, %v620_v3 }
 0x408   :  { %v605_v5 = vrot.slane %v604_v61, 4 }
 0x409   :  { %v654_v57 = vpop.xlane.xlu0 %653 }
 0x40a   :  { %v606_v7 = vadd.f32 %v605_v5, %v604_v61  ;;  %v657_v8 = vadd.f32 %v656_v4, %v654_v57  ;;  %v673_v9 = vpop.xlane.xlu1 %672 }
 0x40b   :  { %v677_v15 = vadd.f32 %v676_v6, %v673_v9 }
 0x40c   :  { %v607_v16 = vrot.slane %v606_v7, 2  ;;  %v658_v17 = vrot.slane %v657_v8, 4 }
 0x40d   :  { %v675_v19 = vpop.xlane.xlu0 %674 }
 0x40e   :  { %v608_v22 = vadd.f32 %v607_v16, %v606_v7  ;;  %v659_v25 = vadd.f32 %v658_v17, %v657_v8  ;;  %v678_v26 = vadd.f32 %v677_v15, %v675_v19  ;;  %v622_v27 = vpop.xlane.xlu1 %621 }
 0x40f   :  { %v625_v28 = vadd.f32 %v624_v18, %v622_v27 }
 0x410   :  { %v660_v30 = vrot.slane %v659_v25, 2  ;;  %v679_v32 = vrot.slane %v678_v26, 4  ;;  %v609_v33 = vrot.slane %v608_v22, 1 }
 0x411   :  { %v626_v34 = vrot.slane %v625_v28, 4 }
 0x412   :  { %v661_v35 = vadd.f32 %v660_v30, %v659_v25  ;;  %v680_v36 = vadd.f32 %v679_v32, %v678_v26  ;;  %v706_v37 = vpop.permute.xlu1 %705  ;;  %v610_v45 = vadd.f32 %v609_v33, %v608_v22 }
 0x413   :  { %v627_v38 = vadd.f32 %v626_v34, %v625_v28 }
 0x414   :  { %v662_v41 = vrot.slane %v661_v35, 1  ;;  %v681_v43 = vrot.slane %v680_v36, 2  ;;  %v632_v53 = vmul.f32 0.00024414063, %v610_v45 }
 0x415   :  { %v628_v46 = vrot.slane %v627_v38, 2  ;;  %v702_v25 = vpop.permute.xlu0 %701 }
 0x416   :  { %v663_v47 = vadd.f32 %v662_v41, %v661_v35  ;;  %v682_v48 = vadd.f32 %v681_v43, %v680_v36  ;;  %v726_v49 = vpop.permute.xlu1 %725  ;;  %v634_v63 = vmul.f32 %v632_v53, %v632_v53  ;;  %v640_v17 = vsub.f32 %v3362_v29, %v632_v53 }
 0x417   :  { %v629_v50 = vadd.f32 %v628_v46, %v627_v38  ;;  %v641_v18 = vsub.f32 %v3376_v40, %v632_v53  ;;  %v642_v19 = vsub.f32 %v3380_v42, %v632_v53  ;;  %v639_v22 = vsub.f32 %v3354_v20, %v632_v53 }
 0x418   :  { %v685_v51 = vmul.f32 0.00024414063, %v663_v47  ;;  %v683_v52 = vrot.slane %v682_v48, 1 }
 0x419   :  { %v630_v54 = vrot.slane %v629_v50, 1 }
 0x41a   :  { %v684_v55 = vadd.f32 %v683_v52, %v682_v48  ;;  %v730_v56 = vpop.permute.xlu1 %729  ;;  %v687_v59 = vmul.f32 %v685_v51, %v685_v51  ;;  %v693_v8 = vsub.f32 %v3365_v31, %v685_v51  ;;  %v694_v9 = vsub.f32 %v3374_v39, %v685_v51 }
 0x41b   :  { %v631_v58 = vadd.f32 %v630_v54, %v629_v50  ;;  %v695_v10 = vsub.f32 %v3385_v44, %v685_v51  ;;  %v692_v15 = vsub.f32 %v3356_v24, %v685_v51  ;;  %v3000_v54 = vld [vmem:[%s4190_s2 + $0x10] sm:$0xff]  }
 0x41c   :  { %v686_v60 = vmul.f32 0.00024414063, %v684_v55  ;;  %v3001_v55 = vld [vmem:[%s4190_s2 + $0x18] sm:$0xff]  }
 0x41d   :  { %v633_v62 = vmul.f32 0.00024414063, %v631_v58 }
 0x41e   :  { %v688_v0 = vsub.f32 %v686_v60, %v687_v59  ;;  %v763_v59 = vpop.permute.xlu0 %762 }
 0x41f   :  { %v635_v1 = vsub.f32 %v633_v62, %v634_v63  ;;  %v710_v61 = vpop.permute.xlu1 %709 }
 0x420   :  { %v689_v3 = vmax.f32 %v688_v0, 0.0 }
 0x421   :  { %v636_v4 = vmax.f32 %v635_v1, 0.0 }
 0x422   :  { %v690_v5 = vadd.f32 1e-05, %v689_v3 }
 0x423   :  { %v637_v6 = vadd.f32 1e-05, %v636_v4  ;;  %v714_v57 = vpop.permute.xlu1 %713 }
 0x424   :  { %3064 = vrsqrt.f32 %v690_v5 }
 0x425   :  { %3066 = vrsqrt.f32 %v637_v6 }
 0x428   :  { %v734_v7 = vpop.permute.xlu1 %733 }
 0x42c   :  { %v738_v24 = vpop.permute.xlu1 %737 }
 0x42e   :  { %v3065_v16 = vpop.eup %3064 }
 0x42f   :  { %v3067_v26 = vpop.eup %3066  ;;  %v697_v27 = vmul.f32 %v3065_v16, %v693_v8  ;;  %v698_v28 = vmul.f32 %v3065_v16, %v694_v9  ;;  %v699_v31 = vmul.f32 %v3065_v16, %v695_v10  ;;  %v696_v30 = vmul.f32 %v3065_v16, %v692_v15 }
 0x430   :  { %v644_v39 = vmul.f32 %v3067_v26, %v640_v17  ;;  %v645_v32 = vmul.f32 %v3067_v26, %v641_v18  ;;  %v646_v44 = vmul.f32 %v3067_v26, %v642_v19  ;;  %v643_v33 = vmul.f32 %v3067_v26, %v639_v22 }
 0x431   :  { %v719_v34 = vmul.f32 %v706_v37, %v697_v27  ;;  %v721_v35 = vmul.f32 %v710_v61, %v698_v28  ;;  %v723_v29 = vmul.f32 %v714_v57, %v699_v31  ;;  %v717_v36 = vmul.f32 %v702_v25, %v696_v30 }
 0x432   :  { %v718_v40 = vmul.f32 %v706_v37, %v644_v39  ;;  %v720_v38 = vmul.f32 %v710_v61, %v645_v32  ;;  %v722_v42 = vmul.f32 %v714_v57, %v646_v44  ;;  %v716_v41 = vmul.f32 %v702_v25, %v643_v33 }
 0x433   :  { %v3414_v20 = vadd.f32 %v730_v56, %v719_v34  ;;  %v3416_v43 = vadd.f32 %v734_v7, %v721_v35  ;;  %v3418_v45 = vadd.f32 %v726_v49, %v717_v36  ;;  %v3420_v46 = vadd.f32 %v738_v24, %v723_v29 }
 0x434   :  { %v3422_v47 = vadd.f32 %v730_v56, %v718_v40  ;;  %v3424_v48 = vadd.f32 %v726_v49, %v716_v41  ;;  %v3428_v51 = vadd.f32 %v734_v7, %v720_v38  ;;  %v3430_v37 = vadd.f32 %v738_v24, %v722_v42  ;;  %v759_v56 = vpop.permute.xlu1 %758 }
 0x435   :  { %v754_v50 = vpack.c.bf16 %v3414_v20, %v3418_v45  ;;  %v756_v53 = vpack.c.bf16 %v3420_v46, %v3416_v43  ;;  %v3129_v35 = vmov 5  }
 0x436   :  { %v753_v52 = vpack.c.bf16 %v3422_v47, %v3424_v48  ;;  %v755_v49 = vpack.c.bf16 %v3430_v37, %v3428_v51  ;;  %2873 = vset.pattern.permute.xlu0 %v3129_v35  ;;  %2874 = vset.pattern.permute.xlu1 %v3129_v35  ;;  %v3130_v35 = vmov 6  }
 0x437   :  { %789 = vmatprep.subr.bf16.mxu1 %v754_v50 }
 0x438   :  { %790 = vmatpush1.bf16.msra.mxu1 %v753_v52  ;;  %v767_v3 = vpop.permute.xlu1 %766 }
 0x439   :  { %791 = vmatprep.subr.bf16.mxu1 %v756_v53 }
 0x43c   :  { %792 = vmatpush1.bf16.msra.mxu1 %v755_v49  ;;  %v771_v19 = vpop.permute.xlu1 %770 }
 0x43f   :  { %2624 = vmatmul.mubr.msk.bf16.vlgmr.msra.gmra.mrb[16].mxu1 %vm121_vm0, %v3000_v54 }
 0x440   :  { %831 = vmatprep.mubr.bf16.mxu1 %v3120_v2 }
 0x447   :  { %2625 = vmatmul.mubr.msk.bf16.gmra.mrb[20].mxu1 %vm121_vm0, %v3001_v55 }
 0x448   :  { %1265 = vmatprep.mubr.bf16.mxu1 %v3120_v2 }
 0x512   :  { %v823_v58 = vpop.f32.mrb[16].mxu1 }
 0x513   :  { %v824_v60 = vadd.f32 %v823_v58, %v759_v56  ;;  %v825_v62 = vpop.f32.mrb[17].mxu1 }
 0x514   :  { %v826_v63 = vadd.f32 %v825_v62, %v759_v56  ;;  %v827_v0 = vpop.f32.mrb[18].mxu1 }
 0x515   :  { %v828_v1 = vadd.f32 %v827_v0, %v763_v59  ;;  %v829_v61 = vpop.f32.mrb[19].mxu1  ;;  %v842_v5 = vmax.f32 %v824_v60, 0.0 }
 0x516   :  { %v830_v4 = vadd.f32 %v829_v61, %v763_v59  ;;  %v843_v57 = vmax.f32 %v826_v63, 0.0 }
 0x517   :  { %v844_v6 = vmax.f32 %v828_v1, 0.0 }
 0x518   :  { %v845_v7 = vmax.f32 %v830_v4, 0.0 }
 0x519   :  { %v2833_v8 = vpack.i.bf16 %v844_v6, %v842_v5  ;;  %v3448_v9 = vpack.c.bf16 %v844_v6, %v842_v5 }
 0x51a   :  { %v833_v10 = vpop.f32.mrb[20].mxu1  ;;  %v2838_v15 = vpack.i.bf16 %v845_v7, %v843_v57  ;;  %v3450_v16 = vpack.c.bf16 %v845_v7, %v843_v57 }
 0x51b   :  { %v834_v17 = vadd.f32 %v833_v10, %v767_v3  ;;  %v835_v18 = vpop.f32.mrb[21].mxu1  ;;  %2834 = vrot.lane.b32.xlu0 %v2833_v8, %s3127_s17 }
 0x51c   :  { %v836_v22 = vadd.f32 %v835_v18, %v767_v3  ;;  %v837_v25 = vpop.f32.mrb[22].mxu1  ;;  %2839 = vrot.lane.b32.xlu1 %v2838_v15, %s3127_s17 }
 0x51d   :  { %v838_v26 = vadd.f32 %v837_v25, %v771_v19  ;;  %v839_v27 = vpop.f32.mrb[23].mxu1  ;;  %v846_v31 = vmax.f32 %v834_v17, 0.0 }
 0x51e   :  { %v840_v28 = vadd.f32 %v839_v27, %v771_v19  ;;  %v847_v39 = vmax.f32 %v836_v22, 0.0 }
 0x51f   :  { %v848_v30 = vmax.f32 %v838_v26, 0.0 }
 0x520   :  { %v849_v32 = vmax.f32 %v840_v28, 0.0 }
 0x521   :  { %v3452_v44 = vpack.c.bf16 %v848_v30, %v846_v31  ;;  %v2843_v33 = vpack.i.bf16 %v848_v30, %v846_v31 }
 0x522   :  { %v2848_v24 = vpack.i.bf16 %v849_v32, %v847_v39  ;;  %v3454_v34 = vpack.c.bf16 %v849_v32, %v847_v39 }
 0x523   :  { %2844 = vrot.lane.b32.xlu0 %v2843_v33, %s3127_s17 }
 0x524   :  { %2849 = vrot.lane.b32.xlu1 %v2848_v24, %s3127_s17  ;;  %s3146_s17 = smov [#allocation2]  }
 0x527   :  { %2854 = vrot.lane.b32.xlu0 %v2833_v8, %s3128_s18 }
 0x528   :  { %2859 = vrot.lane.b32.xlu1 %v2838_v15, %s3128_s18 }
 0x52b   :  { %2864 = vrot.lane.b32.xlu0 %v2843_v33, %s3128_s18 }
 0x52c   :  { %2869 = vrot.lane.b32.xlu1 %v2848_v24, %s3128_s18  ;;  %s2554_s18 = sshll.u32 %s3146_s17, 4  ;;  %s2555_s18 = int_to_ptr.vmem [resolvable:$true] %s2554_s18 }
 0x52d   :  { %s3096_s19 = scalar_lea.vmem %s2555_s18, 128  ;;  %p3101_p1 = scmp.lt.s32.totalorder %s2555_s18, %s2555_s18 }
 0x52e   :  { %p3097_p0 = scmp.ne.s32.totalorder %s2555_s18, %s3096_s19  ;;  %p3102_p2 = scmp.lt.s32.totalorder %s3096_s19, %s3096_s19 }
 0x52f   :  { %946 = vperm.xlu0 %2873, %v3236_v11  }
 0x530   :  { %950 = vperm.xlu1 %2874, %v3248_v13   ;;  %p3103_p3 = por %p3102_p2, %p3101_p1 }
 0x532   :  { %p3104_p4 = pnand %p3103_p3, %p3097_p0 }
 0x533   :  { %958 = vperm.xlu0 %2873, %v3253_v14  }
 0x534   :  { %954 = vperm.xlu1 %2874, %v3241_v12  }
 0x537   :  { %2875 = vset.pattern.permute.xlu0 %v3130_v35 }
 0x538   :  { %2876 = vset.pattern.permute.xlu1 %v3130_v35 }
 0x58d   :  { %v2835_v29 = vpop.permute.xlu0 %2834 }
 0x58e   :  { %v2837_v36 = vunpack.i.h.bf16 %v2835_v29  ;;  %v2836_v40 = vunpack.i.l.bf16 %v2835_v29  ;;  %v2840_v38 = vpop.permute.xlu1 %2839 }
 0x58f   :  { %v2842_v42 = vunpack.i.h.bf16 %v2840_v38  ;;  %v2841_v41 = vunpack.i.l.bf16 %v2840_v38 }
 0x591   :  { %v869_v11 = vsel %vm868_vm11, %v2836_v40, %v2841_v41  ;;  %v870_v13 = vsel %vm868_vm11, %v2837_v36, %v2842_v42  ;;  %v873_v12 = vsel %vm868_vm11, %v2841_v41, %v2836_v40  ;;  %v874_v14 = vsel %vm868_vm11, %v2842_v42, %v2837_v36 }
 0x592   :  { %v2636_v52 = vpack.c.bf16 %v874_v14, %v873_v12  ;;  %v2633_v53 = vpack.c.bf16 %v870_v13, %v869_v11 }
 0x594   :  { %2634 = vmatprep.subr.msk.bf16.mxu0 %vm3471_vm14, %v2633_v53 }
 0x595   :  { %v2845_v54 = vpop.permute.xlu0 %2844  ;;  %2637 = vmatpush1.bf16.msk.msra.mxu0 %vm3475_vm15, %v2636_v52 }
 0x596   :  { %v2847_v55 = vunpack.i.h.bf16 %v2845_v54  ;;  %v2846_v56 = vunpack.i.l.bf16 %v2845_v54  ;;  %v2850_v58 = vpop.permute.xlu1 %2849 }
 0x597   :  { %v2852_v59 = vunpack.i.h.bf16 %v2850_v58  ;;  %v2851_v60 = vunpack.i.l.bf16 %v2850_v58 }
 0x599   :  { %v871_v62 = vsel %vm868_vm11, %v2846_v56, %v2851_v60  ;;  %v872_v63 = vsel %vm868_vm11, %v2847_v55, %v2852_v59  ;;  %v875_v0 = vsel %vm868_vm11, %v2851_v60, %v2846_v56  ;;  %v876_v1 = vsel %vm868_vm11, %v2852_v59, %v2847_v55  ;;  %v2855_v61 = vpop.permute.xlu0 %2854 }
 0x59a   :  { %v2642_v3 = vpack.c.bf16 %v876_v1, %v875_v0  ;;  %v2860_v4 = vpop.permute.xlu1 %2859  ;;  %v2639_v5 = vpack.c.bf16 %v872_v63, %v871_v62  ;;  %v2857_v6 = vunpack.i.h.bf16 %v2855_v61  ;;  %v2856_v57 = vunpack.i.l.bf16 %v2855_v61 }
 0x59b   :  { %v2862_v7 = vunpack.i.h.bf16 %v2860_v4  ;;  %v2861_v8 = vunpack.i.l.bf16 %v2860_v4  ;;  %vm1337_vm11 = vcmp.lt.s32.totalorder %v3279_v21, 124 }
 0x59c   :  { %2640 = vmatprep.subr.msk.bf16.mxu0 %vm3471_vm14, %v2639_v5  ;;  %vm2687_vm14 = vmpackc.low %vm1337_vm11, %vm1337_vm11 }
 0x59d   :  { %2643 = vmatpush1.bf16.msk.msra.mxu0 %vm3475_vm15, %v2642_v3  ;;  %v2865_v10 = vpop.permute.xlu0 %2864  ;;  %v916_v17 = vsel %vm893_vm1, %v2861_v8, %v2856_v57  ;;  %v917_v18 = vsel %vm893_vm1, %v2862_v7, %v2857_v6  ;;  %v913_v27 = vsel %vm893_vm1, %v2857_v6, %v2862_v7  ;;  %v3573_v6 = vld [vmem:[%s4194_s6 + $0x8] sm:$0xff]  ;;  %v3579_v7 = vld [vmem:[%s4194_s6] sm:$0xff]  ;;  %vm1756_vm15 = vcmp.lt.s32.totalorder %v3279_v21, 8 }
 0x59e   :  { %v2870_v15 = vpop.permute.xlu1 %2869  ;;  %981 = vmatprep.subr.bf16.mxu0 %v3450_v16  ;;  %v2867_v19 = vunpack.i.h.bf16 %v2865_v10  ;;  %v2866_v22 = vunpack.i.l.bf16 %v2865_v10  ;;  %v912_v16 = vsel %vm893_vm1, %v2856_v57, %v2861_v8  ;;  %v2645_v28 = vpack.c.bf16 %v917_v18, %v916_v17  ;;  %v3587_v8 = vld [vmem:[%s4194_s6 + $0x10] sm:$0xff]  ;;  %v3593_v10 = vld [vmem:[%s4194_s6 + $0x18] sm:$0xff] }
 0x59f   :  { %v2872_v25 = vunpack.i.h.bf16 %v2870_v15  ;;  %v2871_v26 = vunpack.i.l.bf16 %v2870_v15  ;;  %v3131_v57 = vmov 7   ;;  %v3132_v15 = vmov 8  }
 0x5a1   :  { %982 = vmatpush1.bf16.msra.mxu0 %v3448_v9  ;;  %v918_v31 = vsel %vm893_vm1, %v2871_v26, %v2866_v22  ;;  %v919_v30 = vsel %vm893_vm1, %v2872_v25, %v2867_v19  ;;  %v2648_v9 = vpack.c.bf16 %v913_v27, %v912_v16  ;;  %v914_v39 = vsel %vm893_vm1, %v2866_v22, %v2871_v26 }
 0x5a2   :  { %983 = vmatprep.subr.bf16.mxu0 %v3454_v34  ;;  %v915_v32 = vsel %vm893_vm1, %v2867_v19, %v2872_v25  ;;  %v2651_v33 = vpack.c.bf16 %v919_v30, %v918_v31  ;;  %v3003_v34 = vld [vmem:[%s4191_s3 + $0x18] sm:$0xff]   ;;  %vm1739_vm1 = vcmp.ge.s32.totalorder %v3282_v23, 8 }
 0x5a3   :  { %v2654_v24 = vpack.c.bf16 %v915_v32, %v914_v39 }
 0x5a5   :  { %984 = vmatpush1.bf16.msra.mxu0 %v3452_v44  ;;  %v3002_v44 = vld [vmem:[%s4191_s3 + $0x10] sm:$0xff]  }
 0x5a6   :  { %2646 = vmatprep.subr.msk.bf16.mxu0 %vm2644_vm3, %v2645_v28 }
 0x5a9   :  { %2649 = vmatpush1.bf16.msk.msra.mxu0 %vm2647_vm4, %v2648_v9 }
 0x5aa   :  { %2652 = vmatprep.subr.msk.bf16.mxu0 %vm2644_vm3, %v2651_v33  ;;  %vm3901_vm3 = vmpackc.low %vm1739_vm1, %vm1739_vm1 }
 0x5ad   :  { %2655 = vmatpush1.bf16.msk.msra.mxu0 %vm2647_vm4, %v2654_v24  ;;  %vm3905_vm4 = vmpackc.low %vm1738_vm2, %vm1738_vm2 }
 0x5ae   :  { %v947_v29 = vpop.permute.xlu0 %946 }
 0x5af   :  { %v951_v11 = vpop.permute.xlu1 %950 }
 0x5b0   :  { %2656 = vmatmul.mubr.msk.bf16.vlgmr.msra.gmra.mrb[24].mxu0 %vm534_vm10, %v3002_v44 }
 0x5b1   :  { %1019 = vmatprep.mubr.bf16.mxu0 %v3120_v2 }
 0x5b2   :  { %v959_v63 = vpop.permute.xlu0 %958 }
 0x5b3   :  { %v955_v59 = vpop.permute.xlu1 %954 }
 0x5b8   :  { %2657 = vmatmul.mubr.msk.bf16.gmra.mrb[28].mxu0 %vm534_vm10, %v3003_v34 }
 0x5b9   :  { %1453 = vmatprep.mubr.bf16.mxu0 %v3120_v2 }
 0x683   :  { %v1011_v36 = vpop.f32.mrb[24].mxu0 }
 0x684   :  { %v3530_v40 = vadd.f32 %v1011_v36, %v947_v29  ;;  %v1013_v38 = vpop.f32.mrb[25].mxu0 }
 0x685   :  { %v3532_v42 = vadd.f32 %v1013_v38, %v947_v29  ;;  %v1015_v41 = vpop.f32.mrb[26].mxu0 }
 0x686   :  { %1030 = vadd.xlane.f32.xlu0 %v3530_v40  ;;  %v1017_v13 = vpop.f32.mrb[27].mxu0  ;;  %v1047_v12 = vmul.f32 %v3530_v40, %v3530_v40  ;;  %v3538_v14 = vadd.f32 %v1015_v41, %v951_v11 }
 0x687   :  { %1083 = vadd.xlane.f32.xlu1 %v3532_v42  ;;  %v3541_v52 = vadd.f32 %v1017_v13, %v951_v11  ;;  %v1100_v54 = vmul.f32 %v3532_v42, %v3532_v42 }
 0x688   :  { %v1048_v58 = vmul.f32 %v3538_v14, %v3538_v14 }
 0x689   :  { %v1101_v56 = vmul.f32 %v3541_v52, %v3541_v52 }
 0x68a   :  { %1051 = vadd.xlane.f32.xlu0 %v1047_v12 }
 0x68b   :  { %1032 = vadd.xlane.f32.xlu1 %v3538_v14  ;;  %v1021_v50 = vpop.f32.mrb[28].mxu0 }
 0x68c   :  { %v1023_v53 = vpop.f32.mrb[29].mxu0  ;;  %v3552_v62 = vadd.f32 %v1021_v50, %v955_v59 }
 0x68d   :  { %v1025_v49 = vpop.f32.mrb[30].mxu0  ;;  %v3550_v60 = vadd.f32 %v1023_v53, %v955_v59 }
 0x68e   :  { %1085 = vadd.xlane.f32.xlu0 %v3541_v52  ;;  %v1027_v55 = vpop.f32.mrb[31].mxu0  ;;  %v3556_v0 = vadd.f32 %v1025_v49, %v959_v63  ;;  %v1049_v1 = vmul.f32 %v3552_v62, %v3552_v62 }
 0x68f   :  { %1104 = vadd.xlane.f32.xlu1 %v1100_v54  ;;  %v3561_v61 = vadd.f32 %v1027_v55, %v959_v63  ;;  %v1102_v3 = vmul.f32 %v3550_v60, %v3550_v60 }
 0x690   :  { %v1050_v5 = vmul.f32 %v3556_v0, %v3556_v0 }
 0x691   :  { %v1103_v4 = vmul.f32 %v3561_v61, %v3561_v61 }
 0x692   :  { %1106 = vadd.xlane.f32.xlu0 %v1101_v56 }
 0x693   :  { %1053 = vadd.xlane.f32.xlu1 %v1048_v58 }
 0x696   :  { %1087 = vadd.xlane.f32.xlu0 %v3550_v60 }
 0x697   :  { %1034 = vadd.xlane.f32.xlu1 %v3552_v62 }
 0x69a   :  { %1036 = vadd.xlane.f32.xlu0 %v3556_v0 }
 0x69b   :  { %1055 = vadd.xlane.f32.xlu1 %v1049_v1 }
 0x69e   :  { %1089 = vadd.xlane.f32.xlu0 %v3561_v61 }
 0x69f   :  { %1108 = vadd.xlane.f32.xlu1 %v1102_v3 }
 0x6a2   :  { %1110 = vadd.xlane.f32.xlu0 %v1103_v4 }
 0x6a3   :  { %1057 = vadd.xlane.f32.xlu1 %v1050_v5 }
 0x6b4   :  { %1141 = vperm.xlu1 %2876, %v3573_v6  }
 0x6b8   :  { %2877 = vset.pattern.permute.xlu1 %v3131_v57  ;;  %1137 = vperm.xlu0 %2875, %v3579_v7  }
 0x6b9   :  { %1161 = vperm.xlu1 %2877, %v3579_v7  }
 0x6bc   :  { %2880 = vset.pattern.permute.xlu0 %v3132_v15 }
 0x6bd   :  { %1165 = vperm.xlu1 %2877, %v3573_v6   ;;  %1202 = vperm.xlu0 %2880, %v3579_v7  }
 0x6c1   :  { %2878 = vset.pattern.permute.xlu1 %v3130_v35  ;;  %1214 = vperm.xlu0 %2880, %v3593_v10  }
 0x6c2   :  { %1145 = vperm.xlu1 %2878, %v3587_v8  }
 0x6c6   :  { %1149 = vperm.xlu1 %2878, %v3593_v10  }
 0x6ca   :  { %2879 = vset.pattern.permute.xlu1 %v3131_v57 }
 0x6cb   :  { %1169 = vperm.xlu1 %2879, %v3587_v8  }
 0x6cf   :  { %1173 = vperm.xlu1 %2879, %v3593_v10  }
 0x6d3   :  { %2881 = vset.pattern.permute.xlu1 %v3132_v15 }
 0x6d4   :  { %1206 = vperm.xlu1 %2881, %v3573_v6  }
 0x6d8   :  { %1210 = vperm.xlu1 %2881, %v3587_v8  }
 0x713   :  { %v1031_v17 = vpop.xlane.xlu0 %1030 }
 0x714   :  { %v1084_v18 = vpop.xlane.xlu1 %1083 }
 0x717   :  { %v1052_v19 = vpop.xlane.xlu0 %1051 }
 0x718   :  { %v1033_v22 = vpop.xlane.xlu1 %1032 }
 0x719   :  { %v1038_v28 = vadd.f32 %v1033_v22, %v1031_v17 }
 0x71b   :  { %v1086_v25 = vpop.xlane.xlu0 %1085 }
 0x71c   :  { %v1105_v26 = vpop.xlane.xlu1 %1104  ;;  %v1091_v32 = vadd.f32 %v1086_v25, %v1084_v18 }
 0x71f   :  { %v1107_v16 = vpop.xlane.xlu0 %1106 }
 0x720   :  { %v1054_v27 = vpop.xlane.xlu1 %1053  ;;  %v1112_v35 = vadd.f32 %v1107_v16, %v1105_v26 }
 0x721   :  { %v1059_v11 = vadd.f32 %v1054_v27, %v1052_v19 }
 0x723   :  { %v1088_v31 = vpop.xlane.xlu0 %1087 }
 0x724   :  { %v1035_v30 = vpop.xlane.xlu1 %1034  ;;  %v1092_v44 = vadd.f32 %v1091_v32, %v1088_v31 }
 0x725   :  { %v1039_v9 = vadd.f32 %v1038_v28, %v1035_v30 }
 0x727   :  { %v1037_v39 = vpop.xlane.xlu0 %1036 }
 0x728   :  { %v1040_v33 = vadd.f32 %v1039_v9, %v1037_v39  ;;  %v1056_v24 = vpop.xlane.xlu1 %1055 }
 0x729   :  { %v1060_v53 = vadd.f32 %v1059_v11, %v1056_v24 }
 0x72a   :  { %v1041_v34 = vrot.slane %v1040_v33, 4 }
 0x72b   :  { %v1090_v29 = vpop.xlane.xlu0 %1089 }
 0x72c   :  { %v1042_v36 = vadd.f32 %v1041_v34, %v1040_v33  ;;  %v1093_v38 = vadd.f32 %v1092_v44, %v1090_v29  ;;  %v1109_v41 = vpop.xlane.xlu1 %1108 }
 0x72d   :  { %v1113_v13 = vadd.f32 %v1112_v35, %v1109_v41 }
 0x72e   :  { %v1043_v12 = vrot.slane %v1042_v36, 2  ;;  %v1094_v50 = vrot.slane %v1093_v38, 4 }
 0x72f   :  { %v1111_v49 = vpop.xlane.xlu0 %1110 }
 0x730   :  { %v1044_v54 = vadd.f32 %v1043_v12, %v1042_v36  ;;  %v1095_v55 = vadd.f32 %v1094_v50, %v1093_v38  ;;  %v1114_v56 = vadd.f32 %v1113_v13, %v1111_v49  ;;  %v1058_v58 = vpop.xlane.xlu1 %1057 }
 0x731   :  { %v1061_v59 = vadd.f32 %v1060_v53, %v1058_v58 }
 0x732   :  { %v1096_v63 = vrot.slane %v1095_v55, 2  ;;  %v1115_v1 = vrot.slane %v1114_v56, 4  ;;  %v1045_v3 = vrot.slane %v1044_v54, 1 }
 0x733   :  { %v1062_v4 = vrot.slane %v1061_v59, 4 }
 0x734   :  { %v1097_v5 = vadd.f32 %v1096_v63, %v1095_v55  ;;  %v1116_v57 = vadd.f32 %v1115_v1, %v1114_v56  ;;  %v1142_v15 = vpop.permute.xlu1 %1141  ;;  %v1046_v22 = vadd.f32 %v1045_v3, %v1044_v54 }
 0x735   :  { %v1063_v17 = vadd.f32 %v1062_v4, %v1061_v59 }
 0x736   :  { %v1098_v18 = vrot.slane %v1097_v5, 1  ;;  %v1117_v19 = vrot.slane %v1116_v57, 2  ;;  %v1068_v9 = vmul.f32 0.00024414063, %v1046_v22 }
 0x737   :  { %v1064_v25 = vrot.slane %v1063_v17, 2 }
 0x738   :  { %v1099_v26 = vadd.f32 %v1098_v18, %v1097_v5  ;;  %v1118_v16 = vadd.f32 %v1117_v19, %v1116_v57  ;;  %v1162_v27 = vpop.permute.xlu1 %1161  ;;  %v1070_v29 = vmul.f32 %v1068_v9, %v1068_v9  ;;  %v1076_v63 = vsub.f32 %v3538_v14, %v1068_v9  ;;  %v1138_v5 = vpop.permute.xlu0 %1137 }
 0x739   :  { %v1065_v28 = vadd.f32 %v1064_v25, %v1063_v17  ;;  %v1077_v1 = vsub.f32 %v3552_v62, %v1068_v9  ;;  %v1078_v3 = vsub.f32 %v3556_v0, %v1068_v9  ;;  %v1075_v4 = vsub.f32 %v3530_v40, %v1068_v9 }
 0x73a   :  { %v1121_v31 = vmul.f32 0.00024414063, %v1099_v26  ;;  %v1119_v30 = vrot.slane %v1118_v16, 1 }
 0x73b   :  { %v1066_v39 = vrot.slane %v1065_v28, 1 }
 0x73c   :  { %v1120_v32 = vadd.f32 %v1119_v30, %v1118_v16  ;;  %v1166_v33 = vpop.permute.xlu1 %1165  ;;  %v1123_v44 = vmul.f32 %v1121_v31, %v1121_v31  ;;  %v1129_v54 = vsub.f32 %v3541_v52, %v1121_v31  ;;  %v1130_v55 = vsub.f32 %v3550_v60, %v1121_v31 }
 0x73d   :  { %v1067_v24 = vadd.f32 %v1066_v39, %v1065_v28  ;;  %v1131_v56 = vsub.f32 %v3561_v61, %v1121_v31  ;;  %v1128_v58 = vsub.f32 %v3532_v42, %v1121_v31 }
 0x73e   :  { %v1122_v34 = vmul.f32 0.00024414063, %v1120_v32 }
 0x73f   :  { %v1069_v35 = vmul.f32 0.00024414063, %v1067_v24 }
 0x740   :  { %v1124_v36 = vsub.f32 %v1122_v34, %v1123_v44 }
 0x741   :  { %v1071_v38 = vsub.f32 %v1069_v35, %v1070_v29  ;;  %v1146_v11 = vpop.permute.xlu1 %1145 }
 0x742   :  { %v1125_v41 = vmax.f32 %v1124_v36, 0.0  ;;  %v3004_v36 = vld [vmem:[%s4190_s2 + $0x20] sm:$0xff]  }
 0x743   :  { %v1072_v13 = vmax.f32 %v1071_v38, 0.0  ;;  %v3005_v38 = vld [vmem:[%s4190_s2 + $0x28] sm:$0xff]  }
 0x744   :  { %v1126_v12 = vadd.f32 1e-05, %v1125_v41  ;;  %v1203_v41 = vpop.permute.xlu0 %1202 }
 0x745   :  { %v1073_v50 = vadd.f32 1e-05, %v1072_v13  ;;  %v1150_v53 = vpop.permute.xlu1 %1149 }
 0x746   :  { %3068 = vrsqrt.f32 %v1126_v12 }
 0x747   :  { %3070 = vrsqrt.f32 %v1073_v50 }
 0x74a   :  { %v1170_v49 = vpop.permute.xlu1 %1169 }
 0x74e   :  { %v1174_v31 = vpop.permute.xlu1 %1173 }
 0x750   :  { %v3069_v59 = vpop.eup %3068 }
 0x751   :  { %v3071_v57 = vpop.eup %3070  ;;  %v1133_v17 = vmul.f32 %v3069_v59, %v1129_v54  ;;  %v1134_v18 = vmul.f32 %v3069_v59, %v1130_v55  ;;  %v1135_v52 = vmul.f32 %v3069_v59, %v1131_v56  ;;  %v1132_v19 = vmul.f32 %v3069_v59, %v1128_v58 }
 0x752   :  { %v1080_v60 = vmul.f32 %v3071_v57, %v1076_v63  ;;  %v1081_v22 = vmul.f32 %v3071_v57, %v1077_v1  ;;  %v1082_v61 = vmul.f32 %v3071_v57, %v1078_v3  ;;  %v1079_v25 = vmul.f32 %v3071_v57, %v1075_v4 }
 0x753   :  { %v1155_v42 = vmul.f32 %v1142_v15, %v1133_v17  ;;  %v1157_v26 = vmul.f32 %v1146_v11, %v1134_v18  ;;  %v1159_v16 = vmul.f32 %v1150_v53, %v1135_v52  ;;  %v1153_v14 = vmul.f32 %v1138_v5, %v1132_v19  ;;  %v1207_v13 = vpop.permute.xlu1 %1206 }
 0x754   :  { %v1154_v28 = vmul.f32 %v1142_v15, %v1080_v60  ;;  %v1152_v62 = vmul.f32 %v1138_v5, %v1079_v25  ;;  %v1156_v9 = vmul.f32 %v1146_v11, %v1081_v22  ;;  %v1158_v39 = vmul.f32 %v1150_v53, %v1082_v61  ;;  %v1215_v61 = vpop.permute.xlu0 %1214 }
 0x755   :  { %v3610_v0 = vadd.f32 %v1166_v33, %v1155_v42  ;;  %v3612_v40 = vadd.f32 %v1162_v27, %v1153_v14  ;;  %v3618_v24 = vadd.f32 %v1170_v49, %v1157_v26  ;;  %v3620_v44 = vadd.f32 %v1174_v31, %v1159_v16 }
 0x756   :  { %v3614_v30 = vadd.f32 %v1166_v33, %v1154_v28  ;;  %v3616_v32 = vadd.f32 %v1162_v27, %v1152_v62  ;;  %v3626_v35 = vadd.f32 %v1170_v49, %v1156_v9  ;;  %v3628_v29 = vadd.f32 %v1174_v31, %v1158_v39 }
 0x757   :  { %v1198_v34 = vpack.c.bf16 %v3610_v0, %v3612_v40  ;;  %v1200_v33 = vpack.c.bf16 %v3620_v44, %v3618_v24  ;;  %v1211_v3 = vpop.permute.xlu1 %1210 }
 0x758   :  { %v1197_v15 = vpack.c.bf16 %v3614_v30, %v3616_v32  ;;  %v1199_v27 = vpack.c.bf16 %v3628_v29, %v3626_v35 }
 0x759   :  { %1233 = vmatprep.subr.bf16.mxu1 %v1198_v34 }
 0x75a   :  { %1234 = vmatpush1.bf16.msra.mxu1 %v1197_v15  ;;  %v3135_v15 = vmov 9  }
 0x75b   :  { %1235 = vmatprep.subr.bf16.mxu1 %v1200_v33  ;;  %2922 = vset.pattern.permute.xlu1 %v3135_v15 }
 0x75c   :  { %2923 = vset.pattern.permute.xlu0 %v3135_v15 }
 0x75e   :  { %1236 = vmatpush1.bf16.msra.mxu1 %v1199_v27 }
 0x761   :  { %2664 = vmatmul.mubr.msk.bf16.vlgmr.msra.gmra.mrb[24].mxu1 %vm121_vm0, %v3004_v36 }
 0x762   :  { %1275 = vmatprep.mubr.bf16.mxu1 %v3120_v2 }
 0x769   :  { %2665 = vmatmul.mubr.msk.bf16.gmra.mrb[28].mxu1 %vm121_vm0, %v3005_v38 }
 0x76a   :  { %1709 = vmatprep.mubr.bf16.mxu1 %v3120_v2 }
 0x834   :  { %v1267_v11 = vpop.f32.mrb[24].mxu1 }
 0x835   :  { %v1269_v12 = vpop.f32.mrb[25].mxu1  ;;  %v1268_v50 = vadd.f32 %v1267_v11, %v1203_v41 }
 0x836   :  { %v1271_v53 = vpop.f32.mrb[26].mxu1  ;;  %v1270_v49 = vadd.f32 %v1269_v12, %v1203_v41 }
 0x837   :  { %v1272_v54 = vadd.f32 %v1271_v53, %v1207_v13  ;;  %v1273_v55 = vpop.f32.mrb[27].mxu1  ;;  %v1286_v59 = vmax.f32 %v1268_v50, 0.0 }
 0x838   :  { %v1274_v56 = vadd.f32 %v1273_v55, %v1207_v13  ;;  %v1287_v63 = vmax.f32 %v1270_v49, 0.0  ;;  %v3007_v49 = vld [vmem:[%s4191_s3 + $0x28] sm:$0xff]  }
 0x839   :  { %v1288_v58 = vmax.f32 %v1272_v54, 0.0 }
 0x83a   :  { %v1289_v1 = vmax.f32 %v1274_v56, 0.0 }
 0x83b   :  { %v2882_v4 = vpack.i.bf16 %v1288_v58, %v1286_v59  ;;  %v3644_v5 = vpack.c.bf16 %v1288_v58, %v1286_v59 }
 0x83c   :  { %v1277_v57 = vpop.f32.mrb[28].mxu1  ;;  %v2887_v17 = vpack.i.bf16 %v1289_v1, %v1287_v63  ;;  %v3646_v18 = vpack.c.bf16 %v1289_v1, %v1287_v63 }
 0x83d   :  { %v1279_v52 = vpop.f32.mrb[29].mxu1  ;;  %v1278_v19 = vadd.f32 %v1277_v57, %v1211_v3  ;;  %2883 = vrot.lane.b32.xlu1 %v2882_v4, %s3133_s11 }
 0x83e   :  { %v1280_v60 = vadd.f32 %v1279_v52, %v1211_v3  ;;  %v1281_v22 = vpop.f32.mrb[30].mxu1  ;;  %2888 = vrot.lane.b32.xlu0 %v2887_v17, %s3133_s11 }
 0x83f   :  { %v1282_v25 = vadd.f32 %v1281_v22, %v1215_v61  ;;  %v1283_v42 = vpop.f32.mrb[31].mxu1  ;;  %v1290_v16 = vmax.f32 %v1278_v19, 0.0 }
 0x840   :  { %v1284_v26 = vadd.f32 %v1283_v42, %v1215_v61  ;;  %v1291_v28 = vmax.f32 %v1280_v60, 0.0 }
 0x841   :  { %v1292_v14 = vmax.f32 %v1282_v25, 0.0 }
 0x842   :  { %v1293_v62 = vmax.f32 %v1284_v26, 0.0 }
 0x843   :  { %v2912_v31 = vpack.i.bf16 %v1292_v14, %v1290_v16  ;;  %v3648_v9 = vpack.c.bf16 %v1292_v14, %v1290_v16 }
 0x844   :  { %v2897_v39 = vpack.i.bf16 %v1293_v62, %v1291_v28  ;;  %v3650_v34 = vpack.c.bf16 %v1293_v62, %v1291_v28 }
 0x845   :  { %2893 = vrot.lane.b32.xlu1 %v2912_v31, %s3133_s11 }
 0x846   :  { %2898 = vrot.lane.b32.xlu0 %v2897_v39, %s3133_s11 }
 0x849   :  { %2903 = vrot.lane.b32.xlu1 %v2882_v4, %s3134_s12 }
 0x84a   :  { %2908 = vrot.lane.b32.xlu0 %v2887_v17, %s3134_s12 }
 0x84d   :  { %2913 = vrot.lane.b32.xlu1 %v2912_v31, %s3134_s12 }
 0x84e   :  { %2918 = vrot.lane.b32.xlu0 %v2897_v39, %s3134_s12 }
 0x851   :  { %1390 = vperm.xlu1 %2922, %v3579_v7  }
 0x852   :  { %1394 = vperm.xlu0 %2923, %v3573_v6  }
 0x855   :  { %1398 = vperm.xlu1 %2922, %v3587_v8  }
 0x859   :  { %1402 = vperm.xlu1 %2922, %v3593_v10  }
 0x8af   :  { %v2884_v33 = vpop.permute.xlu1 %2883 }
 0x8b0   :  { %v2886_v27 = vunpack.i.h.bf16 %v2884_v33  ;;  %v2885_v36 = vunpack.i.l.bf16 %v2884_v33  ;;  %v2889_v38 = vpop.permute.xlu0 %2888 }
 0x8b1   :  { %v2891_v41 = vunpack.i.h.bf16 %v2889_v38  ;;  %v2890_v11 = vunpack.i.l.bf16 %v2889_v38 }
 0x8b3   :  { %v1314_v13 = vsel %vm1312_vm5, %v2886_v27, %v2891_v41  ;;  %v1318_v12 = vsel %vm1312_vm5, %v2891_v41, %v2886_v27  ;;  %v1313_v50 = vsel %vm1312_vm5, %v2885_v36, %v2890_v11  ;;  %v1317_v53 = vsel %vm1312_vm5, %v2890_v11, %v2885_v36 }
 0x8b4   :  { %v2673_v54 = vpack.c.bf16 %v1314_v13, %v1313_v50  ;;  %v2676_v55 = vpack.c.bf16 %v1318_v12, %v1317_v53 }
 0x8b6   :  { %2674 = vmatprep.subr.msk.bf16.mxu0 %vm3667_vm8, %v2673_v54  ;;  %v3136_v54 = vmov 10  }
 0x8b7   :  { %v2894_v58 = vpop.permute.xlu1 %2893  ;;  %2677 = vmatpush1.bf16.msk.msra.mxu0 %vm3671_vm9, %v2676_v55  ;;  %2924 = vset.pattern.permute.xlu1 %v3136_v54 }
 0x8b8   :  { %v2896_v59 = vunpack.i.h.bf16 %v2894_v58  ;;  %v2895_v63 = vunpack.i.l.bf16 %v2894_v58  ;;  %v2899_v1 = vpop.permute.xlu0 %2898  ;;  %2925 = vset.pattern.permute.xlu0 %v3136_v54 }
 0x8b9   :  { %v2901_v3 = vunpack.i.h.bf16 %v2899_v1  ;;  %v2900_v4 = vunpack.i.l.bf16 %v2899_v1 }
 0x8bb   :  { %v1316_v57 = vsel %vm1312_vm5, %v2896_v59, %v2901_v3  ;;  %v1320_v17 = vsel %vm1312_vm5, %v2901_v3, %v2896_v59  ;;  %v1315_v52 = vsel %vm1312_vm5, %v2895_v63, %v2900_v4  ;;  %v1319_v19 = vsel %vm1312_vm5, %v2900_v4, %v2895_v63  ;;  %v2904_v60 = vpop.permute.xlu1 %2903 }
 0x8bc   :  { %v2679_v22 = vpack.c.bf16 %v1316_v57, %v1315_v52  ;;  %v2682_v61 = vpack.c.bf16 %v1320_v17, %v1319_v19  ;;  %v2909_v25 = vpop.permute.xlu0 %2908  ;;  %v2906_v42 = vunpack.i.h.bf16 %v2904_v60  ;;  %v2905_v26 = vunpack.i.l.bf16 %v2904_v60 }
 0x8bd   :  { %v2911_v16 = vunpack.i.h.bf16 %v2909_v25  ;;  %v2910_v14 = vunpack.i.l.bf16 %v2909_v25  ;;  %vm1781_vm5 = vcmp.lt.s32.totalorder %v3279_v21, 120  ;;  %v3142_v21 = vmov 14  }
 0x8be   :  { %2680 = vmatprep.subr.msk.bf16.mxu0 %vm3667_vm8, %v2679_v22  ;;  %vm2727_vm8 = vmpackc.low %vm1781_vm5, %vm1781_vm5 }
 0x8bf   :  { %2683 = vmatpush1.bf16.msk.msra.mxu0 %vm3671_vm9, %v2682_v61  ;;  %v2914_v28 = vpop.permute.xlu1 %2913  ;;  %v1361_v31 = vsel %vm1337_vm11, %v2911_v16, %v2906_v42  ;;  %v1360_v39 = vsel %vm1337_vm11, %v2910_v14, %v2905_v26  ;;  %v1356_v38 = vsel %vm1337_vm11, %v2905_v26, %v2910_v14 }
 0x8c0   :  { %v2919_v62 = vpop.permute.xlu0 %2918  ;;  %1425 = vmatprep.subr.bf16.mxu0 %v3646_v18  ;;  %v2916_v15 = vunpack.i.h.bf16 %v2914_v28  ;;  %v2915_v33 = vunpack.i.l.bf16 %v2914_v28  ;;  %v1357_v18 = vsel %vm1337_vm11, %v2906_v42, %v2911_v16  ;;  %v2685_v41 = vpack.c.bf16 %v1361_v31, %v1360_v39 }
 0x8c1   :  { %v2921_v27 = vunpack.i.h.bf16 %v2919_v62  ;;  %v2920_v36 = vunpack.i.l.bf16 %v2919_v62 }
 0x8c3   :  { %1426 = vmatpush1.bf16.msra.mxu0 %v3644_v5  ;;  %v1363_v11 = vsel %vm1337_vm11, %v2921_v27, %v2916_v15  ;;  %v1362_v13 = vsel %vm1337_vm11, %v2920_v36, %v2915_v33  ;;  %v2688_v5 = vpack.c.bf16 %v1357_v18, %v1356_v38  ;;  %v1358_v12 = vsel %vm1337_vm11, %v2915_v33, %v2920_v36 }
 0x8c4   :  { %1427 = vmatprep.subr.bf16.mxu0 %v3650_v34  ;;  %v1359_v34 = vsel %vm1337_vm11, %v2916_v15, %v2921_v27  ;;  %v2691_v50 = vpack.c.bf16 %v1363_v11, %v1362_v13  ;;  %v3137_v36 = vmov 11  }
 0x8c5   :  { %v2694_v53 = vpack.c.bf16 %v1359_v34, %v1358_v12 }
 0x8c7   :  { %1428 = vmatpush1.bf16.msra.mxu0 %v3648_v9  ;;  %v3006_v9 = vld [vmem:[%s4191_s3 + $0x20] sm:$0xff]  }
 0x8c8   :  { %2686 = vmatprep.subr.msk.bf16.mxu0 %vm2684_vm13, %v2685_v41 }
 0x8cb   :  { %2689 = vmatpush1.bf16.msk.msra.mxu0 %vm2687_vm14, %v2688_v5 }
 0x8cc   :  { %2692 = vmatprep.subr.msk.bf16.mxu0 %vm2684_vm13, %v2691_v50  ;;  %v3138_v50 = vmov 12  }
 0x8cf   :  { %2695 = vmatpush1.bf16.msk.msra.mxu0 %vm2687_vm14, %v2694_v53 }
 0x8d0   :  { %v1391_v55 = vpop.permute.xlu1 %1390 }
 0x8d1   :  { %v1395_v4 = vpop.permute.xlu0 %1394 }
 0x8d2   :  { %2696 = vmatmul.mubr.msk.bf16.vlgmr.msra.gmra.mrb[32].mxu0 %vm534_vm10, %v3006_v9 }
 0x8d3   :  { %1463 = vmatprep.mubr.bf16.mxu0 %v3120_v2 }
 0x8d4   :  { %v1399_v42 = vpop.permute.xlu1 %1398 }
 0x8d8   :  { %v1403_v28 = vpop.permute.xlu1 %1402 }
 0x8da   :  { %2697 = vmatmul.mubr.msk.bf16.gmra.mrb[36].mxu0 %vm534_vm10, %v3007_v49 }
 0x8db   :  { %1897 = vmatprep.mubr.bf16.mxu0 %v3120_v2 }
 0x9a5   :  { %v1455_v56 = vpop.f32.mrb[32].mxu0 }
 0x9a6   :  { %v3726_v58 = vadd.f32 %v1455_v56, %v1391_v55  ;;  %v1457_v59 = vpop.f32.mrb[33].mxu0 }
 0x9a7   :  { %v1459_v63 = vpop.f32.mrb[34].mxu0  ;;  %v3731_v57 = vadd.f32 %v1457_v59, %v1391_v55 }
 0x9a8   :  { %1474 = vadd.xlane.f32.xlu0 %v3726_v58  ;;  %v1491_v1 = vmul.f32 %v3726_v58, %v3726_v58  ;;  %v1461_v3 = vpop.f32.mrb[35].mxu0  ;;  %v3736_v19 = vadd.f32 %v1459_v63, %v1395_v4 }
 0x9a9   :  { %v3733_v17 = vadd.f32 %v1461_v3, %v1395_v4  ;;  %v1544_v26 = vmul.f32 %v3731_v57, %v3731_v57 }
 0x9aa   :  { %1495 = vadd.xlane.f32.xlu1 %v1491_v1  ;;  %v1492_v14 = vmul.f32 %v3736_v19, %v3736_v19 }
 0x9ab   :  { %v1545_v25 = vmul.f32 %v3733_v17, %v3733_v17 }
 0x9ac   :  { %1527 = vadd.xlane.f32.xlu0 %v3731_v57 }
 0x9ad   :  { %v1465_v52 = vpop.f32.mrb[36].mxu0 }
 0x9ae   :  { %1529 = vadd.xlane.f32.xlu1 %v3733_v17  ;;  %v1467_v60 = vpop.f32.mrb[37].mxu0  ;;  %v3751_v31 = vadd.f32 %v1465_v52, %v1399_v42 }
 0x9af   :  { %v1469_v22 = vpop.f32.mrb[38].mxu0  ;;  %v3744_v16 = vadd.f32 %v1467_v60, %v1399_v42 }
 0x9b0   :  { %1476 = vadd.xlane.f32.xlu0 %v3736_v19  ;;  %v1471_v61 = vpop.f32.mrb[39].mxu0  ;;  %v3749_v62 = vadd.f32 %v1469_v22, %v1403_v28  ;;  %v1493_v15 = vmul.f32 %v3751_v31, %v3751_v31 }
 0x9b1   :  { %v3754_v39 = vadd.f32 %v1471_v61, %v1403_v28  ;;  %v1546_v33 = vmul.f32 %v3744_v16, %v3744_v16 }
 0x9b2   :  { %1550 = vadd.xlane.f32.xlu1 %v1545_v25  ;;  %v1494_v27 = vmul.f32 %v3749_v62, %v3749_v62 }
 0x9b3   :  { %v1547_v18 = vmul.f32 %v3754_v39, %v3754_v39 }
 0x9b4   :  { %1548 = vadd.xlane.f32.xlu0 %v1544_v26 }
 0x9b6   :  { %1531 = vadd.xlane.f32.xlu1 %v3744_v16 }
 0x9b8   :  { %1497 = vadd.xlane.f32.xlu0 %v1492_v14 }
 0x9ba   :  { %1480 = vadd.xlane.f32.xlu1 %v3749_v62 }
 0x9bc   :  { %1478 = vadd.xlane.f32.xlu0 %v3751_v31 }
 0x9be   :  { %1533 = vadd.xlane.f32.xlu1 %v3754_v39 }
 0x9c0   :  { %1499 = vadd.xlane.f32.xlu0 %v1493_v15 }
 0x9c4   :  { %1552 = vadd.xlane.f32.xlu0 %v1546_v33 }
 0x9c8   :  { %1501 = vadd.xlane.f32.xlu0 %v1494_v27 }
 0x9cf   :  { %1581 = vperm.xlu1 %2924, %v3579_v7  }
 0x9d3   :  { %2926 = vset.pattern.permute.xlu1 %v3137_v36 }
 0x9d4   :  { %1605 = vperm.xlu1 %2926, %v3579_v7  }
 0x9d8   :  { %1609 = vperm.xlu1 %2926, %v3573_v6  }
 0x9dc   :  { %2927 = vset.pattern.permute.xlu1 %v3136_v54 }
 0x9de   :  { %1585 = vperm.xlu0 %2925, %v3573_v6  }
 0x9e2   :  { %2930 = vset.pattern.permute.xlu0 %v3138_v50 }
 0x9e3   :  { %1654 = vperm.xlu0 %2930, %v3587_v8  }
 0x9fc   :  { %1554 = vadd.xlane.f32.xlu1 %v1547_v18 }
 0xa0d   :  { %1589 = vperm.xlu1 %2927, %v3587_v8  }
 0xa11   :  { %1593 = vperm.xlu1 %2927, %v3593_v10  }
 0xa15   :  { %2928 = vset.pattern.permute.xlu1 %v3137_v36 }
 0xa16   :  { %1613 = vperm.xlu1 %2928, %v3587_v8  }
 0xa1a   :  { %1617 = vperm.xlu1 %2928, %v3593_v10  }
 0xa1e   :  { %2929 = vset.pattern.permute.xlu1 %v3138_v50 }
 0xa1f   :  { %1646 = vperm.xlu1 %2929, %v3579_v7  }
 0xa23   :  { %1650 = vperm.xlu1 %2929, %v3573_v6  }
 0xa27   :  { %1658 = vperm.xlu1 %2929, %v3593_v10  }
 0xa35   :  { %v1475_v38 = vpop.xlane.xlu0 %1474 }
 0xa37   :  { %v1496_v41 = vpop.xlane.xlu1 %1495 }
 0xa39   :  { %v1528_v11 = vpop.xlane.xlu0 %1527 }
 0xa3b   :  { %v1530_v13 = vpop.xlane.xlu1 %1529 }
 0xa3d   :  { %v1477_v5 = vpop.xlane.xlu0 %1476 }
 0xa3e   :  { %v1482_v49 = vadd.f32 %v1477_v5, %v1475_v38 }
 0xa3f   :  { %v3774_v34 = vpop.xlane.xlu1 %1550 }
 0xa41   :  { %v3776_v12 = vpop.xlane.xlu0 %1548 }
 0xa43   :  { %v1532_v53 = vpop.xlane.xlu1 %1531 }
 0xa45   :  { %v1498_v9 = vpop.xlane.xlu0 %1497 }
 0xa46   :  { %v1503_v52 = vadd.f32 %v1498_v9, %v1496_v41  ;;  %v1535_v9 = vadd.f32 %v1530_v13, %v1528_v11  ;;  %v1186_v11 = vadd.f32 %v3614_v30, %v3422_v47  ;;  %v1556_v47 = vadd.f32 %v3774_v34, %v3776_v12 }
 0xa47   :  { %v1481_v56 = vpop.xlane.xlu1 %1480 }
 0xa49   :  { %v1479_v54 = vpop.xlane.xlu0 %1478 }
 0xa4a   :  { %v1483_v55 = vadd.f32 %v1482_v49, %v1479_v54 }
 0xa4b   :  { %v1534_v38 = vpop.xlane.xlu1 %1533 }
 0xa4c   :  { %v1484_v59 = vadd.f32 %v1483_v55, %v1481_v56 }
 0xa4d   :  { %v1500_v63 = vpop.xlane.xlu0 %1499 }
 0xa4e   :  { %v1485_v1 = vrot.slane %v1484_v59, 4  ;;  %v1504_v61 = vadd.f32 %v1503_v52, %v1500_v63 }
 0xa4f   :  { %v3782_v50 = vpop.permute.xlu1 %1581 }
 0xa50   :  { %v1486_v3 = vadd.f32 %v1485_v1, %v1484_v59  ;;  %v1536_v59 = vadd.f32 %v1535_v9, %v1532_v53 }
 0xa51   :  { %v1553_v4 = vpop.xlane.xlu0 %1552 }
 0xa52   :  { %v1487_v60 = vrot.slane %v1486_v3, 2  ;;  %v1537_v52 = vadd.f32 %v1536_v59, %v1534_v38 }
 0xa53   :  { %v3784_v49 = vpop.permute.xlu1 %1605 }
 0xa54   :  { %v1488_v22 = vadd.f32 %v1487_v60, %v1486_v3  ;;  %v1538_v53 = vrot.slane %v1537_v52, 4 }
 0xa55   :  { %v1502_v7 = vpop.xlane.xlu0 %1501 }
 0xa56   :  { %v1505_v25 = vadd.f32 %v1504_v61, %v1502_v7  ;;  %v1489_v8 = vrot.slane %v1488_v22, 1 }
 0xa57   :  { %v3792_v61 = vpop.permute.xlu1 %1609 }
 0xa58   :  { %v1506_v42 = vrot.slane %v1505_v25, 4  ;;  %v1490_v14 = vadd.f32 %v1489_v8, %v1488_v22  ;;  %v1539_v8 = vadd.f32 %v1538_v53, %v1537_v52 }
 0xa5a   :  { %v1507_v26 = vadd.f32 %v1506_v42, %v1505_v25  ;;  %v1512_v15 = vmul.f32 0.00024414063, %v1490_v14  ;;  %v1540_v42 = vrot.slane %v1539_v8, 2 }
 0xa5c   :  { %v1508_v6 = vrot.slane %v1507_v26, 2  ;;  %v1514_v10 = vmul.f32 %v1512_v15, %v1512_v15  ;;  %v1519_v54 = vsub.f32 %v3726_v58, %v1512_v15  ;;  %v1520_v55 = vsub.f32 %v3736_v19, %v1512_v15 }
 0xa5d   :  { %v3788_v63 = vpop.permute.xlu0 %1585  ;;  %v1184_v58 = vadd.f32 %v3616_v32, %v3424_v48  ;;  %v1541_v30 = vadd.f32 %v1540_v42, %v1539_v8  ;;  %v1557_v48 = vadd.f32 %v1556_v47, %v1553_v4  ;;  %v1522_v34 = vsub.f32 %v3749_v62, %v1512_v15 }
 0xa5e   :  { %v1509_v28 = vadd.f32 %v1508_v6, %v1507_v26  ;;  %v1188_v4 = vadd.f32 %v3626_v35, %v3428_v51 }
 0xa5f   :  { %v1542_v14 = vrot.slane %v1541_v30, 1 }
 0xa60   :  { %v1510_v33 = vrot.slane %v1509_v28, 1 }
 0xa62   :  { %v1511_v27 = vadd.f32 %v1510_v33, %v1509_v28 }
 0xa64   :  { %v1513_v36 = vmul.f32 0.00024414063, %v1511_v27  ;;  %v1543_v27 = vadd.f32 %v1542_v14, %v1541_v30 }
 0xa66   :  { %v1515_v18 = vsub.f32 %v1513_v36, %v1514_v10  ;;  %v1521_v10 = vsub.f32 %v3751_v31, %v1512_v15 }
 0xa68   :  { %v1516_v5 = vmax.f32 %v1515_v18, 0.0 }
 0xa6a   :  { %v1517_v41 = vadd.f32 1e-05, %v1516_v5 }
 0xa6c   :  { %3072 = vrsqrt.f32 %v1517_v41  ;;  %v1565_v41 = vmul.f32 0.00024414063, %v1543_v27 }
 0xa6e   :  { %v1574_v51 = vsub.f32 %v3744_v16, %v1565_v41  ;;  %v1575_v35 = vsub.f32 %v3754_v39, %v1565_v41  ;;  %v1573_v42 = vsub.f32 %v3733_v17, %v1565_v41  ;;  %v1189_v16 = vadd.f32 %v3618_v24, %v3416_v43 }
 0xa6f   :  { %v1191_v39 = vadd.f32 %v3620_v44, %v3420_v46 }
 0xa76   :  { %v3073_v56 = vpop.eup %3072 }
 0xa77   :  { %v1523_v1 = vmul.f32 %v3073_v56, %v1519_v54  ;;  %v1524_v3 = vmul.f32 %v3073_v56, %v1520_v55  ;;  %v1525_v5 = vmul.f32 %v3073_v56, %v1521_v10  ;;  %v1526_v59 = vmul.f32 %v3073_v56, %v1522_v34 }
 0xa78   :  { %v1572_v56 = vsub.f32 %v3731_v57, %v1565_v41 }
 0xa79   :  { %v1596_v60 = vmul.f32 %v3782_v50, %v1523_v1  ;;  %v1598_v22 = vmul.f32 %v3788_v63, %v1524_v3  ;;  %v1567_v3 = vmul.f32 %v1565_v41, %v1565_v41 }
 0xa7b   :  { %v3799_v19 = vadd.f32 %v3784_v49, %v1596_v60  ;;  %v3802_v13 = vadd.f32 %v3792_v61, %v1598_v22 }
 0xa7d   :  { %v3805_v7 = vadd.f32 %v3799_v19, %v1184_v58  ;;  %v3808_v25 = vadd.f32 %v3802_v13, %v1186_v11  ;;  %v1190_v11 = vadd.f32 %v3628_v29, %v3430_v37  ;;  %v1641_v46 = vpack.c.bf16 %v3802_v13, %v3799_v19 }
 0xa89   :  { %v1555_v32 = vpop.xlane.xlu1 %1554 }
 0xa8a   :  { %v1558_v26 = vadd.f32 %v1557_v48, %v1555_v32 }
 0xa8c   :  { %v1559_v6 = vrot.slane %v1558_v26, 4 }
 0xa8d   :  { %v1590_v28 = vpop.permute.xlu1 %1589 }
 0xa8e   :  { %v1560_v33 = vadd.f32 %v1559_v6, %v1558_v26  ;;  %v1600_v54 = vmul.f32 %v1590_v28, %v1525_v5 }
 0xa90   :  { %v1561_v36 = vrot.slane %v1560_v33, 2 }
 0xa91   :  { %v1594_v18 = vpop.permute.xlu1 %1593 }
 0xa92   :  { %v1562_v38 = vadd.f32 %v1561_v36, %v1560_v33  ;;  %v1602_v60 = vmul.f32 %v1594_v18, %v1526_v59 }
 0xa94   :  { %v1563_v9 = vrot.slane %v1562_v38, 1 }
 0xa95   :  { %v1614_v12 = vpop.permute.xlu1 %1613 }
 0xa96   :  { %v1564_v55 = vadd.f32 %v1563_v9, %v1562_v38  ;;  %v1624_v1 = vadd.f32 %v1614_v12, %v1600_v54 }
 0xa98   :  { %v1566_v52 = vmul.f32 0.00024414063, %v1564_v55  ;;  %v3816_v22 = vadd.f32 %v1624_v1, %v1188_v4  ;;  %v1655_v55 = vpop.permute.xlu0 %1654 }
 0xa99   :  { %v1618_v31 = vpop.permute.xlu1 %1617 }
 0xa9a   :  { %v1568_v58 = vsub.f32 %v1566_v52, %v1567_v3  ;;  %v1626_v53 = vadd.f32 %v1618_v31, %v1602_v60 }
 0xa9c   :  { %v1569_v8 = vmax.f32 %v1568_v58, 0.0  ;;  %v3820_v62 = vadd.f32 %v1626_v53, %v1190_v11 }
 0xa9e   :  { %v1570_v15 = vadd.f32 1e-05, %v1569_v8 }
 0xaa0   :  { %3074 = vrsqrt.f32 %v1570_v15 }
 0xaaa   :  { %v3075_v47 = vpop.eup %3074 }
 0xaab   :  { %v1578_v30 = vmul.f32 %v3075_v47, %v1574_v51  ;;  %v1579_v48 = vmul.f32 %v3075_v47, %v1575_v35  ;;  %v1576_v32 = vmul.f32 %v3075_v47, %v1572_v56  ;;  %v1577_v37 = vmul.f32 %v3075_v47, %v1573_v42 }
 0xaad   :  { %v1601_v29 = vmul.f32 %v1590_v28, %v1578_v30  ;;  %v1603_v26 = vmul.f32 %v1594_v18, %v1579_v48  ;;  %v1597_v14 = vmul.f32 %v3782_v50, %v1576_v32  ;;  %v1599_v6 = vmul.f32 %v3788_v63, %v1577_v37 }
 0xaae   :  { %v1187_v28 = vadd.f32 %v3610_v0, %v3414_v20  ;;  %v1185_v50 = vadd.f32 %v3612_v40, %v3418_v45  ;;  %v1643_v20 = vpack.c.bf16 %v1626_v53, %v1624_v1  ;;  %v3008_v45 = vld [vmem:[%s4190_s2 + $0x30] sm:$0xff]   ;;  %v3009_v0 = vld [vmem:[%s4190_s2 + $0x38] sm:$0xff]   ;;  %v1647_v40 = vpop.permute.xlu1 %1646 }
 0xaaf   :  { %v1625_v57 = vadd.f32 %v1614_v12, %v1601_v29  ;;  %v1627_v33 = vadd.f32 %v1618_v31, %v1603_v26  ;;  %v1621_v17 = vadd.f32 %v3784_v49, %v1597_v14  ;;  %v1623_v27 = vadd.f32 %v3792_v61, %v1599_v6  ;;  %v3869_v14 = vld [vmem:[%s4194_s6] sm:$0xff]  ;;  %v3875_v6 = vld [vmem:[%s4194_s6 + $0x8] sm:$0xff] }
 0xab0   :  { %v3141_v26 = vmov 13  }
 0xab1   :  { %v3838_v36 = vadd.f32 %v1625_v57, %v1189_v16  ;;  %v3840_v63 = vadd.f32 %v1627_v33, %v1191_v39  ;;  %v1642_v43 = vpack.c.bf16 %v1623_v27, %v1621_v17  ;;  %v3844_v24 = vadd.f32 %v1621_v17, %v1185_v50  ;;  %2971 = vset.pattern.permute.xlu1 %v3141_v26  ;;  %v3881_v16 = vld [vmem:[%s4194_s6 + $0x10] sm:$0xff]  ;;  %v3887_v39 = vld [vmem:[%s4194_s6 + $0x18] sm:$0xff] }
 0xab2   :  { %v3846_v44 = vadd.f32 %v1623_v27, %v1187_v28  ;;  %v1644_v49 = vpack.c.bf16 %v1627_v33, %v1625_v57  ;;  %v1651_v38 = vpop.permute.xlu1 %1650  ;;  %2972 = vset.pattern.permute.xlu0 %v3141_v26 }
 0xab3   :  { %1677 = vmatprep.subr.bf16.mxu1 %v1642_v43 }
 0xab4   :  { %1678 = vmatpush1.bf16.msra.mxu1 %v1641_v46 }
 0xab5   :  { %1679 = vmatprep.subr.bf16.mxu1 %v1644_v49 }
 0xab6   :  { %v1659_v8 = vpop.permute.xlu1 %1658 }
 0xab8   :  { %1680 = vmatpush1.bf16.msra.mxu1 %v1643_v20 }
 0xabb   :  { %2704 = vmatmul.mubr.msk.bf16.vlgmr.msra.gmra.mrb[32].mxu1 %vm121_vm0, %v3008_v45 }
 0xabc   :  { %1719 = vmatprep.mubr.bf16.mxu1 %v3120_v2 }
 0xac3   :  { %2705 = vmatmul.mubr.msk.bf16.gmra.mrb[36].mxu1 %vm121_vm0, %v3009_v0 }
 0xac4   :  { %2153 = vmatprep.mubr.bf16.mxu1 %v3120_v2 }
 0xb8e   :  { %v1711_v61 = vpop.f32.mrb[32].mxu1 }
 0xb8f   :  { %v1712_v19 = vadd.f32 %v1711_v61, %v1647_v40  ;;  %v1713_v13 = vpop.f32.mrb[33].mxu1 }
 0xb90   :  { %v1714_v10 = vadd.f32 %v1713_v13, %v1647_v40  ;;  %v1715_v18 = vpop.f32.mrb[34].mxu1 }
 0xb91   :  { %v1716_v5 = vadd.f32 %v1715_v18, %v1651_v38  ;;  %v1717_v41 = vpop.f32.mrb[35].mxu1  ;;  %v1730_v54 = vmax.f32 %v1712_v19, 0.0 }
 0xb92   :  { %v1718_v9 = vadd.f32 %v1717_v41, %v1651_v38  ;;  %v1731_v12 = vmax.f32 %v1714_v10, 0.0 }
 0xb93   :  { %v1732_v34 = vmax.f32 %v1716_v5, 0.0 }
 0xb94   :  { %v1733_v4 = vmax.f32 %v1718_v9, 0.0 }
 0xb95   :  { %v2951_v59 = vpack.i.bf16 %v1732_v34, %v1730_v54  ;;  %v3858_v1 = vpack.c.bf16 %v1732_v34, %v1730_v54 }
 0xb96   :  { %v2956_v3 = vpack.i.bf16 %v1733_v4, %v1731_v12  ;;  %v1721_v52 = vpop.f32.mrb[36].mxu1  ;;  %v3860_v60 = vpack.c.bf16 %v1733_v4, %v1731_v12 }
 0xb97   :  { %v1723_v31 = vpop.f32.mrb[37].mxu1  ;;  %v1722_v11 = vadd.f32 %v1721_v52, %v1655_v55  ;;  %2932 = vrot.lane.b32.xlu1 %v2951_v59, %s3139_s20 }
 0xb98   :  { %v1724_v58 = vadd.f32 %v1723_v31, %v1655_v55  ;;  %v1725_v53 = vpop.f32.mrb[38].mxu1  ;;  %2937 = vrot.lane.b32.xlu0 %v2956_v3, %s3139_s20 }
 0xb99   :  { %v1726_v15 = vadd.f32 %v1725_v53, %v1659_v8  ;;  %v1727_v51 = vpop.f32.mrb[39].mxu1  ;;  %v1734_v56 = vmax.f32 %v1722_v11, 0.0 }
 0xb9a   :  { %v1728_v35 = vadd.f32 %v1727_v51, %v1659_v8  ;;  %v1735_v47 = vmax.f32 %v1724_v58, 0.0 }
 0xb9b   :  { %v1736_v42 = vmax.f32 %v1726_v15, 0.0 }
 0xb9c   :  { %v1737_v30 = vmax.f32 %v1728_v35, 0.0 }
 0xb9d   :  { %v2961_v48 = vpack.i.bf16 %v1736_v42, %v1734_v56  ;;  %v3862_v32 = vpack.c.bf16 %v1736_v42, %v1734_v56 }
 0xb9e   :  { %v2966_v37 = vpack.i.bf16 %v1737_v30, %v1735_v47  ;;  %v3864_v29 = vpack.c.bf16 %v1737_v30, %v1735_v47 }
 0xb9f   :  { %2942 = vrot.lane.b32.xlu1 %v2961_v48, %s3139_s20 }
 0xba0   :  { %2947 = vrot.lane.b32.xlu0 %v2966_v37, %s3139_s20 }
 0xba3   :  { %2952 = vrot.lane.b32.xlu1 %v2951_v59, %s3140_s21 }
 0xba4   :  { %2957 = vrot.lane.b32.xlu0 %v2956_v3, %s3140_s21 }
 0xba7   :  { %2962 = vrot.lane.b32.xlu1 %v2961_v48, %s3140_s21 }
 0xba8   :  { %2967 = vrot.lane.b32.xlu0 %v2966_v37, %s3140_s21 }
 0xbab   :  { %1834 = vperm.xlu1 %2971, %v3869_v14  }
 0xbac   :  { %1838 = vperm.xlu0 %2972, %v3875_v6  }
 0xbaf   :  { %1842 = vperm.xlu1 %2971, %v3881_v16  }
 0xbb0   :  { %2974 = vset.pattern.permute.xlu0 %v3142_v21 }
 0xbb3   :  { %1846 = vperm.xlu1 %2971, %v3887_v39  }
 0xbb7   :  { %2973 = vset.pattern.permute.xlu1 %v3142_v21 }
 0xc09   :  { %v2933_v57 = vpop.permute.xlu1 %2932 }
 0xc0a   :  { %v2935_v33 = vunpack.i.h.bf16 %v2933_v57  ;;  %v2934_v17 = vunpack.i.l.bf16 %v2933_v57  ;;  %v2938_v27 = vpop.permute.xlu0 %2937 }
 0xc0b   :  { %v2940_v28 = vunpack.i.h.bf16 %v2938_v27  ;;  %v2939_v50 = vunpack.i.l.bf16 %v2938_v27 }
 0xc0d   :  { %v1757_v43 = vsel %vm1756_vm15, %v2934_v17, %v2939_v50  ;;  %v1758_v46 = vsel %vm1756_vm15, %v2935_v33, %v2940_v28  ;;  %v1761_v49 = vsel %vm1756_vm15, %v2939_v50, %v2934_v17  ;;  %v1762_v20 = vsel %vm1756_vm15, %v2940_v28, %v2935_v33  ;;  %v3011_v33 = vld [vmem:[%s4191_s3 + $0x38] sm:$0xff]  }
 0xc0e   :  { %v2713_v0 = vpack.c.bf16 %v1758_v46, %v1757_v43  ;;  %v2716_v40 = vpack.c.bf16 %v1762_v20, %v1761_v49 }
 0xc10   :  { %2714 = vmatprep.subr.msk.bf16.mxu0 %vm3901_vm3, %v2713_v0 }
 0xc11   :  { %v2943_v19 = vpop.permute.xlu1 %2942  ;;  %2717 = vmatpush1.bf16.msk.msra.mxu0 %vm3905_vm4, %v2716_v40 }
 0xc12   :  { %v2945_v13 = vunpack.i.h.bf16 %v2943_v19  ;;  %v2944_v10 = vunpack.i.l.bf16 %v2943_v19  ;;  %v2948_v18 = vpop.permute.xlu0 %2947 }
 0xc13   :  { %v2950_v38 = vunpack.i.h.bf16 %v2948_v18  ;;  %v2949_v5 = vunpack.i.l.bf16 %v2948_v18 }
 0xc15   :  { %v1759_v41 = vsel %vm1756_vm15, %v2944_v10, %v2949_v5  ;;  %v1760_v9 = vsel %vm1756_vm15, %v2945_v13, %v2950_v38  ;;  %v1763_v54 = vsel %vm1756_vm15, %v2949_v5, %v2944_v10  ;;  %v1764_v34 = vsel %vm1756_vm15, %v2950_v38, %v2945_v13  ;;  %v2953_v12 = vpop.permute.xlu1 %2952 }
 0xc16   :  { %v2719_v4 = vpack.c.bf16 %v1760_v9, %v1759_v41  ;;  %v2722_v55 = vpack.c.bf16 %v1764_v34, %v1763_v54  ;;  %v2958_v59 = vpop.permute.xlu0 %2957  ;;  %v2955_v3 = vunpack.i.h.bf16 %v2953_v12  ;;  %v2954_v52 = vunpack.i.l.bf16 %v2953_v12 }
 0xc17   :  { %v2960_v31 = vunpack.i.h.bf16 %v2958_v59  ;;  %v2959_v11 = vunpack.i.l.bf16 %v2958_v59 }
 0xc18   :  { %2720 = vmatprep.subr.msk.bf16.mxu0 %vm3901_vm3, %v2719_v4 }
 0xc19   :  { %2723 = vmatpush1.bf16.msk.msra.mxu0 %vm3905_vm4, %v2722_v55  ;;  %v2963_v58 = vpop.permute.xlu1 %2962  ;;  %v1804_v8 = vsel %vm1781_vm5, %v2959_v11, %v2954_v52  ;;  %v1805_v15 = vsel %vm1781_vm5, %v2960_v31, %v2955_v3  ;;  %v1801_v47 = vsel %vm1781_vm5, %v2955_v3, %v2960_v31 }
 0xc1a   :  { %v2968_v53 = vpop.permute.xlu0 %2967  ;;  %1869 = vmatprep.subr.bf16.mxu0 %v3860_v60  ;;  %v2965_v51 = vunpack.i.h.bf16 %v2963_v58  ;;  %v2964_v35 = vunpack.i.l.bf16 %v2963_v58  ;;  %v1800_v60 = vsel %vm1781_vm5, %v2954_v52, %v2959_v11  ;;  %v2725_v30 = vpack.c.bf16 %v1805_v15, %v1804_v8 }
 0xc1b   :  { %v2970_v56 = vunpack.i.h.bf16 %v2968_v53  ;;  %v2969_v42 = vunpack.i.l.bf16 %v2968_v53  ;;  %v3143_v52 = vmov 15  }
 0xc1d   :  { %1870 = vmatpush1.bf16.msra.mxu0 %v3858_v1  ;;  %v1806_v48 = vsel %vm1781_vm5, %v2969_v42, %v2964_v35  ;;  %v1807_v23 = vsel %vm1781_vm5, %v2970_v56, %v2965_v51  ;;  %v2728_v1 = vpack.c.bf16 %v1801_v47, %v1800_v60  ;;  %v1802_v37 = vsel %vm1781_vm5, %v2964_v35, %v2969_v42 }
 0xc1e   :  { %1871 = vmatprep.subr.bf16.mxu0 %v3864_v29  ;;  %v1803_v29 = vsel %vm1781_vm5, %v2965_v51, %v2970_v56  ;;  %v2731_v26 = vpack.c.bf16 %v1807_v23, %v1806_v48  ;;  %v3144_v60 = vmov 16  }
 0xc1f   :  { %v2734_v57 = vpack.c.bf16 %v1803_v29, %v1802_v37 }
 0xc21   :  { %1872 = vmatpush1.bf16.msra.mxu0 %v3862_v32  ;;  %v3010_v32 = vld [vmem:[%s4191_s3 + $0x30] sm:$0xff]  }
 0xc22   :  { %2726 = vmatprep.subr.msk.bf16.mxu0 %vm2724_vm7, %v2725_v30 }
 0xc25   :  { %2729 = vmatpush1.bf16.msk.msra.mxu0 %vm2727_vm8, %v2728_v1 }
 0xc26   :  { %2732 = vmatprep.subr.msk.bf16.mxu0 %vm2724_vm7, %v2731_v26 }
 0xc29   :  { %2735 = vmatpush1.bf16.msk.msra.mxu0 %vm2727_vm8, %v2734_v57 }
 0xc2a   :  { %v1835_v17 = vpop.permute.xlu1 %1834 }
 0xc2b   :  { %v1839_v20 = vpop.permute.xlu0 %1838 }
 0xc2c   :  { %2736 = vmatmul.mubr.msk.bf16.vlgmr.msra.gmra.mrb[40].mxu0 %vm534_vm10, %v3010_v32 }
 0xc2d   :  { %1907 = vmatprep.mubr.bf16.mxu0 %v3120_v2 }
 0xc2e   :  { %v1843_v38 = vpop.permute.xlu1 %1842 }
 0xc32   :  { %v1847_v54 = vpop.permute.xlu1 %1846 }
 0xc34   :  { %2737 = vmatmul.mubr.msk.bf16.gmra.mrb[44].mxu0 %vm534_vm10, %v3011_v33 }
 0xc35   :  { %2534 = vmatprep.mubr.bf16.mxu0 %v3120_v2 }
 0xcff   :  { %v1899_v27 = vpop.f32.mrb[40].mxu0 }
 0xd00   :  { %v3960_v28 = vadd.f32 %v1899_v27, %v1835_v17  ;;  %v1901_v50 = vpop.f32.mrb[41].mxu0 }
 0xd01   :  { %v1903_v43 = vpop.f32.mrb[42].mxu0  ;;  %v3965_v45 = vadd.f32 %v1901_v50, %v1835_v17 }
 0xd02   :  { %1918 = vadd.xlane.f32.xlu0 %v3960_v28  ;;  %v1935_v46 = vmul.f32 %v3960_v28, %v3960_v28  ;;  %v1905_v49 = vpop.f32.mrb[43].mxu0  ;;  %v3970_v61 = vadd.f32 %v1903_v43, %v1839_v20 }
 0xd03   :  { %v3967_v0 = vadd.f32 %v1905_v49, %v1839_v20  ;;  %v1988_v5 = vmul.f32 %v3965_v45, %v3965_v45 }
 0xd04   :  { %1939 = vadd.xlane.f32.xlu1 %v1935_v46  ;;  %v1936_v9 = vmul.f32 %v3970_v61, %v3970_v61 }
 0xd05   :  { %v1989_v18 = vmul.f32 %v3967_v0, %v3967_v0 }
 0xd06   :  { %1971 = vadd.xlane.f32.xlu0 %v3965_v45 }
 0xd07   :  { %v1909_v40 = vpop.f32.mrb[44].mxu0 }
 0xd08   :  { %1973 = vadd.xlane.f32.xlu1 %v3967_v0  ;;  %v1911_v19 = vpop.f32.mrb[45].mxu0  ;;  %v3985_v12 = vadd.f32 %v1909_v40, %v1843_v38 }
 0xd09   :  { %v1913_v13 = vpop.f32.mrb[46].mxu0  ;;  %v3978_v41 = vadd.f32 %v1911_v19, %v1843_v38 }
 0xd0a   :  { %1920 = vadd.xlane.f32.xlu0 %v3970_v61  ;;  %v1915_v10 = vpop.f32.mrb[47].mxu0  ;;  %v3983_v34 = vadd.f32 %v1913_v13, %v1847_v54  ;;  %v1937_v55 = vmul.f32 %v3985_v12, %v3985_v12 }
 0xd0b   :  { %v3988_v4 = vadd.f32 %v1915_v10, %v1847_v54  ;;  %v1990_v59 = vmul.f32 %v3978_v41, %v3978_v41 }
 0xd0c   :  { %1994 = vadd.xlane.f32.xlu1 %v1989_v18  ;;  %v1938_v3 = vmul.f32 %v3983_v34, %v3983_v34 }
 0xd0d   :  { %v1991_v31 = vmul.f32 %v3988_v4, %v3988_v4 }
 0xd0e   :  { %1992 = vadd.xlane.f32.xlu0 %v1988_v5 }
 0xd10   :  { %1975 = vadd.xlane.f32.xlu1 %v3978_v41 }
 0xd12   :  { %1941 = vadd.xlane.f32.xlu0 %v1936_v9 }
 0xd14   :  { %1924 = vadd.xlane.f32.xlu1 %v3983_v34 }
 0xd16   :  { %1922 = vadd.xlane.f32.xlu0 %v3985_v12 }
 0xd18   :  { %1977 = vadd.xlane.f32.xlu1 %v3988_v4 }
 0xd1a   :  { %1943 = vadd.xlane.f32.xlu0 %v1937_v55 }
 0xd1e   :  { %1996 = vadd.xlane.f32.xlu0 %v1990_v59 }
 0xd22   :  { %1945 = vadd.xlane.f32.xlu0 %v1938_v3 }
 0xd29   :  { %2025 = vperm.xlu1 %2973, %v3869_v14  }
 0xd2d   :  { %2975 = vset.pattern.permute.xlu1 %v3143_v52 }
 0xd2e   :  { %2049 = vperm.xlu1 %2975, %v3869_v14  }
 0xd32   :  { %2053 = vperm.xlu1 %2975, %v3875_v6  }
 0xd36   :  { %2976 = vset.pattern.permute.xlu1 %v3142_v21 }
 0xd38   :  { %2029 = vperm.xlu0 %2974, %v3875_v6  }
 0xd3c   :  { %2979 = vset.pattern.permute.xlu0 %v3144_v60 }
 0xd3d   :  { %2094 = vperm.xlu0 %2979, %v3875_v6  }
 0xd56   :  { %1998 = vadd.xlane.f32.xlu1 %v1991_v31 }
 0xd67   :  { %2033 = vperm.xlu1 %2976, %v3881_v16  }
 0xd6b   :  { %2037 = vperm.xlu1 %2976, %v3887_v39  }
 0xd6f   :  { %2977 = vset.pattern.permute.xlu1 %v3143_v52 }
 0xd70   :  { %2057 = vperm.xlu1 %2977, %v3881_v16  }
 0xd74   :  { %2061 = vperm.xlu1 %2977, %v3887_v39  }
 0xd78   :  { %2978 = vset.pattern.permute.xlu1 %v3144_v60 }
 0xd79   :  { %2090 = vperm.xlu1 %2978, %v3869_v14  }
 0xd7d   :  { %2098 = vperm.xlu1 %2978, %v3881_v16  }
 0xd81   :  { %2102 = vperm.xlu1 %2978, %v3887_v39  }
 0xd8f   :  { %v1919_v11 = vpop.xlane.xlu0 %1918 }
 0xd91   :  { %v1940_v58 = vpop.xlane.xlu1 %1939 }
 0xd93   :  { %v1972_v53 = vpop.xlane.xlu0 %1971 }
 0xd95   :  { %v1974_v8 = vpop.xlane.xlu1 %1973 }
 0xd96   :  { %v1979_v52 = vadd.f32 %v1974_v8, %v1972_v53 }
 0xd97   :  { %v1921_v15 = vpop.xlane.xlu0 %1920 }
 0xd98   :  { %v1926_v47 = vadd.f32 %v1921_v15, %v1919_v11 }
 0xd99   :  { %v4008_v51 = vpop.xlane.xlu1 %1994 }
 0xd9b   :  { %v4010_v35 = vpop.xlane.xlu0 %1992 }
 0xd9d   :  { %v1976_v56 = vpop.xlane.xlu1 %1975 }
 0xd9f   :  { %v1942_v42 = vpop.xlane.xlu0 %1941 }
 0xda0   :  { %v1947_v32 = vadd.f32 %v1942_v42, %v1940_v58  ;;  %v1980_v42 = vadd.f32 %v1979_v52, %v1976_v56 }
 0xda1   :  { %v1925_v23 = vpop.xlane.xlu1 %1924 }
 0xda3   :  { %v1923_v30 = vpop.xlane.xlu0 %1922 }
 0xda4   :  { %v1927_v48 = vadd.f32 %v1926_v47, %v1923_v30 }
 0xda5   :  { %v1978_v54 = vpop.xlane.xlu1 %1977 }
 0xda6   :  { %v1928_v1 = vadd.f32 %v1927_v48, %v1925_v23  ;;  %v1981_v48 = vadd.f32 %v1980_v42, %v1978_v54 }
 0xda7   :  { %v1944_v37 = vpop.xlane.xlu0 %1943 }
 0xda8   :  { %v1929_v29 = vrot.slane %v1928_v1, 4  ;;  %v1948_v17 = vadd.f32 %v1947_v32, %v1944_v37  ;;  %v1982_v53 = vrot.slane %v1981_v48, 4 }
 0xda9   :  { %v4016_v3 = vpop.permute.xlu1 %2025 }
 0xdaa   :  { %v1930_v26 = vadd.f32 %v1929_v29, %v1928_v1  ;;  %v1983_v56 = vadd.f32 %v1982_v53, %v1981_v48 }
 0xdab   :  { %v1997_v57 = vpop.xlane.xlu0 %1996 }
 0xdac   :  { %v1931_v33 = vrot.slane %v1930_v26, 2  ;;  %v1984_v32 = vrot.slane %v1983_v56, 2 }
 0xdad   :  { %v4018_v31 = vpop.permute.xlu1 %2049 }
 0xdae   :  { %v1932_v21 = vadd.f32 %v1931_v33, %v1930_v26  ;;  %v2000_v33 = vadd.f32 %v4008_v51, %v4010_v35 }
 0xdaf   :  { %v1946_v27 = vpop.xlane.xlu0 %1945 }
 0xdb0   :  { %v1949_v50 = vadd.f32 %v1948_v17, %v1946_v27  ;;  %v1933_v43 = vrot.slane %v1932_v21, 1  ;;  %v2001_v17 = vadd.f32 %v2000_v33, %v1997_v57 }
 0xdb1   :  { %v2054_v37 = vpop.permute.xlu1 %2053 }
 0xdb2   :  { %v1950_v46 = vrot.slane %v1949_v50, 4  ;;  %v1934_v20 = vadd.f32 %v1933_v43, %v1932_v21  ;;  %v1985_v21 = vadd.f32 %v1984_v32, %v1983_v56 }
 0xdb4   :  { %v1951_v49 = vadd.f32 %v1950_v46, %v1949_v50  ;;  %v1956_v13 = vmul.f32 0.00024414063, %v1934_v20  ;;  %v1986_v43 = vrot.slane %v1985_v21, 1 }
 0xdb6   :  { %v1952_v40 = vrot.slane %v1951_v49, 2  ;;  %v1958_v5 = vmul.f32 %v1956_v13, %v1956_v13  ;;  %v1963_v11 = vsub.f32 %v3960_v28, %v1956_v13  ;;  %v1964_v58 = vsub.f32 %v3970_v61, %v1956_v13 }
 0xdb7   :  { %v2030_v60 = vpop.permute.xlu0 %2029  ;;  %v1987_v20 = vadd.f32 %v1986_v43, %v1985_v21 }
 0xdb8   :  { %v1953_v19 = vadd.f32 %v1952_v40, %v1951_v49 }
 0xdba   :  { %v1954_v10 = vrot.slane %v1953_v19, 1 }
 0xdbc   :  { %v1955_v18 = vadd.f32 %v1954_v10, %v1953_v19  ;;  %v1965_v10 = vsub.f32 %v3985_v12, %v1956_v13 }
 0xdbe   :  { %v1957_v38 = vmul.f32 0.00024414063, %v1955_v18  ;;  %v2009_v18 = vmul.f32 0.00024414063, %v1987_v20 }
 0xdc0   :  { %v1959_v9 = vsub.f32 %v1957_v38, %v1958_v5 }
 0xdc2   :  { %v1960_v55 = vmax.f32 %v1959_v9, 0.0  ;;  %v1966_v9 = vsub.f32 %v3983_v34, %v1956_v13  ;;  %v2018_v34 = vsub.f32 %v3978_v41, %v2009_v18  ;;  %v2019_v13 = vsub.f32 %v3988_v4, %v2009_v18 }
 0xdc4   :  { %v1961_v59 = vadd.f32 1e-05, %v1960_v55  ;;  %v2011_v55 = vmul.f32 %v2009_v18, %v2009_v18 }
 0xdc6   :  { %3076 = vrsqrt.f32 %v1961_v59 }
 0xdd0   :  { %v3077_v15 = vpop.eup %3076 }
 0xdd1   :  { %v1967_v47 = vmul.f32 %v3077_v15, %v1963_v11  ;;  %v1968_v30 = vmul.f32 %v3077_v15, %v1964_v58  ;;  %v1969_v5 = vmul.f32 %v3077_v15, %v1965_v10  ;;  %v1970_v54 = vmul.f32 %v3077_v15, %v1966_v9 }
 0xdd2   :  { %v2016_v15 = vsub.f32 %v3965_v45, %v2009_v18 }
 0xdd3   :  { %v2040_v23 = vmul.f32 %v4016_v3, %v1967_v47  ;;  %v2042_v1 = vmul.f32 %v2030_v60, %v1968_v30 }
 0xdd5   :  { %v2064_v29 = vadd.f32 %v4018_v31, %v2040_v23  ;;  %v2066_v26 = vadd.f32 %v2054_v37, %v2042_v1 }
 0xdd7   :  { %v4025_v8 = vadd.f32 %v2064_v29, %v3805_v7  ;;  %v4028_v28 = vadd.f32 %v2066_v26, %v3808_v25  ;;  %v2017_v29 = vsub.f32 %v3967_v0, %v2009_v18 }
 0xdd9   :  { %v2085_v61 = vpack.c.bf16 %v4028_v28, %v4025_v8 }
 0xde3   :  { %v1999_v27 = vpop.xlane.xlu1 %1998 }
 0xde4   :  { %v2002_v50 = vadd.f32 %v2001_v17, %v1999_v27 }
 0xde6   :  { %v2003_v46 = vrot.slane %v2002_v50, 4 }
 0xde7   :  { %v2034_v49 = vpop.permute.xlu1 %2033 }
 0xde8   :  { %v2004_v7 = vadd.f32 %v2003_v46, %v2002_v50  ;;  %v2044_v57 = vmul.f32 %v2034_v49, %v1969_v5 }
 0xdea   :  { %v2005_v40 = vrot.slane %v2004_v7, 2 }
 0xdeb   :  { %v2038_v25 = vpop.permute.xlu1 %2037 }
 0xdec   :  { %v2006_v19 = vadd.f32 %v2005_v40, %v2004_v7  ;;  %v2046_v52 = vmul.f32 %v2038_v25, %v1970_v54 }
 0xdee   :  { %v2007_v38 = vrot.slane %v2006_v19, 1 }
 0xdef   :  { %v2058_v51 = vpop.permute.xlu1 %2057 }
 0xdf0   :  { %v2008_v35 = vadd.f32 %v2007_v38, %v2006_v19  ;;  %v2068_v11 = vadd.f32 %v2058_v51, %v2044_v57 }
 0xdf2   :  { %v2010_v59 = vmul.f32 0.00024414063, %v2008_v35  ;;  %v2076_v48 = vadd.f32 %v2068_v11, %v3816_v22 }
 0xdf3   :  { %v2062_v58 = vpop.permute.xlu1 %2061 }
 0xdf4   :  { %v2012_v42 = vsub.f32 %v2010_v59, %v2011_v55  ;;  %v2070_v47 = vadd.f32 %v2062_v58, %v2046_v52 }
 0xdf6   :  { %v2013_v30 = vmax.f32 %v2012_v42, 0.0  ;;  %v2078_v12 = vadd.f32 %v2070_v47, %v3820_v62  ;;  %v3145_v47 = vmov 17  }
 0xdf7   :  { %2980 = vset.pattern.permute.xlu1 %v3145_v47  ;;  %2981 = vset.pattern.permute.xlu0 %v3145_v47 }
 0xdf8   :  { %v2014_v23 = vadd.f32 1e-05, %v2013_v30  ;;  %v2087_v1 = vpack.c.bf16 %v2078_v12, %v2076_v48 }
 0xdfa   :  { %3078 = vrsqrt.f32 %v2014_v23 }
 0xe04   :  { %v3079_v26 = vpop.eup %3078 }
 0xe05   :  { %v2022_v53 = vmul.f32 %v3079_v26, %v2018_v34  ;;  %v2023_v8 = vmul.f32 %v3079_v26, %v2019_v13  ;;  %v2020_v28 = vmul.f32 %v3079_v26, %v2016_v15  ;;  %v2021_v56 = vmul.f32 %v3079_v26, %v2017_v29 }
 0xe07   :  { %v2045_v32 = vmul.f32 %v2034_v49, %v2022_v53  ;;  %v2047_v22 = vmul.f32 %v2038_v25, %v2023_v8  ;;  %v2041_v62 = vmul.f32 %v4016_v3, %v2020_v28  ;;  %v2043_v33 = vmul.f32 %v2030_v60, %v2021_v56  ;;  %v3012_v3 = vld [vmem:[%s4190_s2 + $0x40] sm:$0xff]   ;;  %v2095_v49 = vpop.permute.xlu0 %2094 }
 0xe09   :  { %v2069_v21 = vadd.f32 %v2058_v51, %v2045_v32  ;;  %v2071_v17 = vadd.f32 %v2062_v58, %v2047_v22  ;;  %v2065_v41 = vadd.f32 %v4018_v31, %v2041_v62  ;;  %v2067_v27 = vadd.f32 %v2054_v37, %v2043_v33 }
 0xe0b   :  { %v2077_v4 = vadd.f32 %v2069_v21, %v3838_v36  ;;  %v2079_v45 = vadd.f32 %v2071_v17, %v3840_v63  ;;  %v2073_v0 = vadd.f32 %v2065_v41, %v3844_v24  ;;  %v2075_v50 = vadd.f32 %v2067_v27, %v3846_v44  ;;  %v3013_v36 = vld [vmem:[%s4190_s2 + $0x48] sm:$0xff]   ;;  %v2091_v24 = vpop.permute.xlu1 %2090 }
 0xe0d   :  { %v2086_v43 = vpack.c.bf16 %v2075_v50, %v2073_v0  ;;  %v2088_v46 = vpack.c.bf16 %v2079_v45, %v2077_v4 }
 0xe0f   :  { %2121 = vmatprep.subr.bf16.mxu1 %v2086_v43  ;;  %v2099_v5 = vpop.permute.xlu1 %2098 }
 0xe10   :  { %2122 = vmatpush1.bf16.msra.mxu1 %v2085_v61 }
 0xe11   :  { %2123 = vmatprep.subr.bf16.mxu1 %v2088_v46 }
 0xe13   :  { %v2103_v57 = vpop.permute.xlu1 %2102 }
 0xe14   :  { %2124 = vmatpush1.bf16.msra.mxu1 %v2087_v1 }
 0xe17   :  { %2744 = vmatmul.mubr.msk.bf16.vlgmr.msra.gmra.mrb[40].mxu1 %vm121_vm0, %v3012_v3 }
 0xe18   :  { %2163 = vmatprep.mubr.bf16.mxu1 %v3120_v2 }
 0xe1f   :  { %2745 = vmatmul.mubr.msk.bf16.gmra.mrb[44].mxu1 %vm121_vm0, %v3013_v36 }
 0xe20   :  { %2353 = vmatprep.mubr.bf16.mxu1 %v3120_v2 }
 0xeea   :  { %v2155_v63 = vpop.f32.mrb[40].mxu1 }
 0xeeb   :  { %v4058_v44 = vadd.f32 %v2155_v63, %v2091_v24  ;;  %v2157_v31 = vpop.f32.mrb[41].mxu1 }
 0xeec   :  { %v2159_v60 = vpop.f32.mrb[42].mxu1  ;;  %v4063_v7 = vadd.f32 %v2157_v31, %v2091_v24 }
 0xeed   :  { %2174 = vadd.xlane.f32.xlu0 %v4058_v44  ;;  %v2191_v37 = vmul.f32 %v4058_v44, %v4058_v44  ;;  %v2161_v61 = vpop.f32.mrb[43].mxu1  ;;  %v4068_v25 = vadd.f32 %v2159_v60, %v2095_v49 }
 0xeee   :  { %v4065_v20 = vadd.f32 %v2161_v61, %v2095_v49  ;;  %v2244_v9 = vmul.f32 %v4063_v7, %v4063_v7 }
 0xeef   :  { %2195 = vadd.xlane.f32.xlu1 %v2191_v37  ;;  %v2192_v35 = vmul.f32 %v4068_v25, %v4068_v25 }
 0xef0   :  { %v2245_v38 = vmul.f32 %v4065_v20, %v4065_v20 }
 0xef1   :  { %2227 = vadd.xlane.f32.xlu0 %v4063_v7 }
 0xef2   :  { %v2165_v40 = vpop.f32.mrb[44].mxu1 }
 0xef3   :  { %2229 = vadd.xlane.f32.xlu1 %v4065_v20  ;;  %v2167_v19 = vpop.f32.mrb[45].mxu1  ;;  %v4083_v55 = vadd.f32 %v2165_v40, %v2099_v5 }
 0xef4   :  { %v2169_v10 = vpop.f32.mrb[46].mxu1  ;;  %v4076_v51 = vadd.f32 %v2167_v19, %v2099_v5 }
 0xef5   :  { %2176 = vadd.xlane.f32.xlu0 %v4068_v25  ;;  %v2171_v18 = vpop.f32.mrb[47].mxu1  ;;  %v4081_v54 = vadd.f32 %v2169_v10, %v2103_v57  ;;  %v2193_v52 = vmul.f32 %v4083_v55, %v4083_v55 }
 0xef6   :  { %v4086_v59 = vadd.f32 %v2171_v18, %v2103_v57  ;;  %v2246_v58 = vmul.f32 %v4076_v51, %v4076_v51 }
 0xef7   :  { %2250 = vadd.xlane.f32.xlu1 %v2245_v38  ;;  %v2194_v42 = vmul.f32 %v4081_v54, %v4081_v54 }
 0xef8   :  { %v2247_v11 = vmul.f32 %v4086_v59, %v4086_v59 }
 0xef9   :  { %2248 = vadd.xlane.f32.xlu0 %v2244_v9 }
 0xefb   :  { %2231 = vadd.xlane.f32.xlu1 %v4076_v51 }
 0xefd   :  { %2197 = vadd.xlane.f32.xlu0 %v2192_v35 }
 0xeff   :  { %2180 = vadd.xlane.f32.xlu1 %v4081_v54 }
 0xf01   :  { %2178 = vadd.xlane.f32.xlu0 %v4083_v55 }
 0xf03   :  { %2233 = vadd.xlane.f32.xlu1 %v4086_v59 }
 0xf05   :  { %2199 = vadd.xlane.f32.xlu0 %v2193_v52 }
 0xf07   :  { %2254 = vadd.xlane.f32.xlu1 %v2247_v11 }
 0xf09   :  { %2252 = vadd.xlane.f32.xlu0 %v2246_v58 }
 0xf0d   :  { %2201 = vadd.xlane.f32.xlu0 %v2194_v42 }
 0xf18   :  { %2290 = vperm.xlu1 %2980, %v3869_v14  }
 0xf1c   :  { %2298 = vperm.xlu1 %2980, %v3881_v16  }
 0xf20   :  { %2302 = vperm.xlu1 %2980, %v3887_v39  }
 0xf23   :  { %2294 = vperm.xlu0 %2981, %v3875_v6  }
 0xf24   :  { %2982 = vset.pattern.permute.xlu1 %v3120_v2 }
 0xf27   :  { %2983 = vset.pattern.permute.xlu0 %v3120_v2 }
 0xf7a   :  { %v2175_v30 = vpop.xlane.xlu0 %2174 }
 0xf7c   :  { %v2196_v48 = vpop.xlane.xlu1 %2195 }
 0xf7e   :  { %v2228_v12 = vpop.xlane.xlu0 %2227 }
 0xf80   :  { %v2230_v23 = vpop.xlane.xlu1 %2229 }
 0xf81   :  { %v2235_v26 = vadd.f32 %v2230_v23, %v2228_v12 }
 0xf82   :  { %v2177_v1 = vpop.xlane.xlu0 %2176 }
 0xf83   :  { %v2182_v6 = vadd.f32 %v2177_v1, %v2175_v30 }
 0xf84   :  { %v2251_v34 = vpop.xlane.xlu1 %2250 }
 0xf86   :  { %v2249_v13 = vpop.xlane.xlu0 %2248 }
 0xf87   :  { %v2256_v33 = vadd.f32 %v2251_v34, %v2249_v13 }
 0xf88   :  { %v2232_v15 = vpop.xlane.xlu1 %2231 }
 0xf89   :  { %v2236_v16 = vadd.f32 %v2235_v26, %v2232_v15 }
 0xf8a   :  { %v2198_v29 = vpop.xlane.xlu0 %2197 }
 0xf8b   :  { %v2203_v27 = vadd.f32 %v2198_v29, %v2196_v48 }
 0xf8c   :  { %v2181_v14 = vpop.xlane.xlu1 %2180 }
 0xf8e   :  { %v2179_v53 = vpop.xlane.xlu0 %2178 }
 0xf8f   :  { %v2183_v8 = vadd.f32 %v2182_v6, %v2179_v53 }
 0xf90   :  { %v2234_v28 = vpop.xlane.xlu1 %2233 }
 0xf91   :  { %v2184_v56 = vadd.f32 %v2183_v8, %v2181_v14  ;;  %v2237_v39 = vadd.f32 %v2236_v16, %v2234_v28 }
 0xf92   :  { %v2200_v32 = vpop.xlane.xlu0 %2199 }
 0xf93   :  { %v2185_v22 = vrot.slane %v2184_v56, 4  ;;  %v2238_v62 = vrot.slane %v2237_v39, 4  ;;  %v2204_v3 = vadd.f32 %v2203_v27, %v2200_v32 }
 0xf94   :  { %v2255_v50 = vpop.xlane.xlu1 %2254 }
 0xf95   :  { %v2186_v21 = vadd.f32 %v2185_v22, %v2184_v56  ;;  %v2239_v17 = vadd.f32 %v2238_v62, %v2237_v39 }
 0xf96   :  { %v2253_v41 = vpop.xlane.xlu0 %2252 }
 0xf97   :  { %v2187_v4 = vrot.slane %v2186_v21, 2  ;;  %v2240_v45 = vrot.slane %v2239_v17, 2  ;;  %v2257_v0 = vadd.f32 %v2256_v33, %v2253_v41 }
 0xf99   :  { %v2188_v43 = vadd.f32 %v2187_v4, %v2186_v21  ;;  %v2241_v46 = vadd.f32 %v2240_v45, %v2239_v17  ;;  %v2258_v36 = vadd.f32 %v2257_v0, %v2255_v50 }
 0xf9a   :  { %v2202_v63 = vpop.xlane.xlu0 %2201 }
 0xf9b   :  { %v2242_v24 = vrot.slane %v2241_v46, 1  ;;  %v2259_v31 = vrot.slane %v2258_v36, 4  ;;  %v2205_v60 = vadd.f32 %v2204_v3, %v2202_v63  ;;  %v2189_v37 = vrot.slane %v2188_v43, 1 }
 0xf9d   :  { %v2260_v61 = vadd.f32 %v2259_v31, %v2258_v36  ;;  %v2206_v49 = vrot.slane %v2205_v60, 4  ;;  %v2243_v40 = vadd.f32 %v2242_v24, %v2241_v46  ;;  %v2190_v18 = vadd.f32 %v2189_v37, %v2188_v43 }
 0xf9f   :  { %v2261_v19 = vrot.slane %v2260_v61, 2  ;;  %v2207_v10 = vadd.f32 %v2206_v49, %v2205_v60  ;;  %v2265_v9 = vmul.f32 0.00024414063, %v2243_v40  ;;  %v2212_v52 = vmul.f32 0.00024414063, %v2190_v18 }
 0xfa1   :  { %v2262_v38 = vadd.f32 %v2261_v19, %v2260_v61  ;;  %v2208_v5 = vrot.slane %v2207_v10, 2  ;;  %v2267_v47 = vmul.f32 %v2265_v9, %v2265_v9  ;;  %v2214_v23 = vmul.f32 %v2212_v52, %v2212_v52 }
 0xfa2   :  { %v2272_v14 = vsub.f32 %v4063_v7, %v2265_v9  ;;  %v2273_v26 = vsub.f32 %v4065_v20, %v2265_v9  ;;  %v2274_v53 = vsub.f32 %v4076_v51, %v2265_v9  ;;  %v2275_v16 = vsub.f32 %v4086_v59, %v2265_v9  ;;  %v2295_v45 = vpop.permute.xlu0 %2294 }
 0xfa3   :  { %v2263_v35 = vrot.slane %v2262_v38, 1  ;;  %v2209_v57 = vadd.f32 %v2208_v5, %v2207_v10  ;;  %v2219_v56 = vsub.f32 %v4058_v44, %v2212_v52  ;;  %v2220_v39 = vsub.f32 %v4068_v25, %v2212_v52  ;;  %v3014_v25 = vld [vmem:[%s4190_s2 + $0x50] sm:$0xff]  }
 0xfa4   :  { %v2221_v33 = vsub.f32 %v4083_v55, %v2212_v52  ;;  %v2222_v20 = vsub.f32 %v4081_v54, %v2212_v52  ;;  %v3015_v54 = vld [vmem:[%s4190_s2 + $0x58] sm:$0xff]   ;;  %v2291_v55 = vpop.permute.xlu1 %2290 }
 0xfa5   :  { %v2264_v11 = vadd.f32 %v2263_v35, %v2262_v38  ;;  %v2210_v58 = vrot.slane %v2209_v57, 1 }
 0xfa7   :  { %v2266_v42 = vmul.f32 0.00024414063, %v2264_v11  ;;  %v2211_v30 = vadd.f32 %v2210_v58, %v2209_v57 }
 0xfa8   :  { %v2299_v61 = vpop.permute.xlu1 %2298 }
 0xfa9   :  { %v2268_v48 = vsub.f32 %v2266_v42, %v2267_v47  ;;  %v2213_v12 = vmul.f32 0.00024414063, %v2211_v30 }
 0xfab   :  { %v2269_v1 = vmax.f32 %v2268_v48, 0.0  ;;  %v2215_v34 = vsub.f32 %v2213_v12, %v2214_v23 }
 0xfac   :  { %v2303_v35 = vpop.permute.xlu1 %2302 }
 0xfad   :  { %v2270_v13 = vadd.f32 1e-05, %v2269_v1  ;;  %v2216_v15 = vmax.f32 %v2215_v34, 0.0  ;;  %v2493_v34 = vld [vmem:[%s4193_s5] sm:$0xf] }
 0xfaf   :  { %3080 = vrsqrt.f32 %v2270_v13  ;;  %v2217_v29 = vadd.f32 1e-05, %v2216_v15 }
 0xfb1   :  { %3082 = vrsqrt.f32 %v2217_v29 }
 0xfb9   :  { %v3081_v6 = vpop.eup %3080 }
 0xfba   :  { %v2276_v8 = vmul.f32 %v3081_v6, %v2272_v14  ;;  %v2277_v28 = vmul.f32 %v3081_v6, %v2273_v26  ;;  %v2278_v22 = vmul.f32 %v3081_v6, %v2274_v53  ;;  %v2279_v62 = vmul.f32 %v3081_v6, %v2275_v16 }
 0xfbb   :  { %v3083_v32 = vpop.eup %3082 }
 0xfbc   :  { %v2286_v21 = vpack.c.bf16 %v2277_v28, %v2276_v8  ;;  %v2223_v7 = vmul.f32 %v3083_v32, %v2219_v56  ;;  %v2224_v17 = vmul.f32 %v3083_v32, %v2220_v39  ;;  %v2225_v41 = vmul.f32 %v3083_v32, %v2221_v33 }
 0xfbd   :  { %v2226_v59 = vmul.f32 %v3083_v32, %v2222_v20  ;;  %v2288_v27 = vpack.c.bf16 %v2279_v62, %v2278_v22 }
 0xfbe   :  { %2321 = vmatprep.subr.bf16.mxu1 %v2286_v21  ;;  %v2285_v51 = vpack.c.bf16 %v2224_v17, %v2223_v7 }
 0xfbf   :  { %v2287_v44 = vpack.c.bf16 %v2226_v59, %v2225_v41 }
 0xfc0   :  { %2322 = vmatpush1.bf16.msra.mxu1 %v2285_v51 }
 0xfc1   :  { %2323 = vmatprep.subr.bf16.mxu1 %v2288_v27 }
 0xfc4   :  { %2324 = vmatpush1.bf16.msra.mxu1 %v2287_v44 }
 0xfc7   :  { %2752 = vmatmul.mubr.msk.bf16.vlgmr.msra.gmra.mrb[48].mxu1 %vm121_vm0, %v3014_v25 }
 0xfc8   :  { %2363 = vmatprep.mubr.bf16.mxu1 %v3120_v2 }
 0xfcf   :  { %2753 = vmatmul.mubr.msk.bf16.gmra.mrb[52].mxu1 %vm121_vm0, %v3015_v54 }
0x109a   :  { %v2355_v4 = vpop.f32.mrb[48].mxu1 }
0x109b   :  { %v2356_v0 = vadd.f32 %v2355_v4, %v2291_v55  ;;  %v2357_v50 = vpop.f32.mrb[49].mxu1 }
0x109c   :  { %v2359_v43 = vpop.f32.mrb[50].mxu1  ;;  %v2358_v3 = vadd.f32 %v2357_v50, %v2291_v55 }
0x109d   :  { %v4121_v46 = vmax.f32 %v2356_v0, 0.0  ;;  %v2360_v36 = vadd.f32 %v2359_v43, %v2295_v45  ;;  %v2361_v63 = vpop.f32.mrb[51].mxu1 }
0x109e   :  { %v2362_v24 = vadd.f32 %v2361_v63, %v2295_v45  ;;  %v4128_v60 = vmax.f32 %v2358_v3, 0.0 }
0x109f   :  { %2382 = vadd.xlane.f32.xlu1 %v4121_v46  ;;  %v4124_v2 = vmax.f32 %v2360_v36, 0.0  ;;  %v2399_v9 = vmul.f32 %v4121_v46, %v4121_v46 }
0x10a0   :  { %v4126_v31 = vmax.f32 %v2362_v24, 0.0  ;;  %v2452_v58 = vmul.f32 %v4128_v60, %v4128_v60 }
0x10a1   :  { %v2400_v10 = vmul.f32 %v4124_v2, %v4124_v2 }
0x10a2   :  { %2437 = vadd.xlane.f32.xlu0 %v4126_v31  ;;  %v2365_v37 = vpop.f32.mrb[52].mxu1  ;;  %v2453_v30 = vmul.f32 %v4126_v31, %v4126_v31 }
0x10a3   :  { %2435 = vadd.xlane.f32.xlu1 %v4128_v60  ;;  %v2367_v49 = vpop.f32.mrb[53].mxu1  ;;  %v2366_v40 = vadd.f32 %v2365_v37, %v2299_v61 }
0x10a4   :  { %v2369_v19 = vpop.f32.mrb[54].mxu1  ;;  %v2368_v5 = vadd.f32 %v2367_v49, %v2299_v61 }
0x10a5   :  { %v2371_v18 = vpop.f32.mrb[55].mxu1  ;;  %v4135_v38 = vmax.f32 %v2366_v40, 0.0  ;;  %v2370_v52 = vadd.f32 %v2369_v19, %v2303_v35 }
0x10a6   :  { %2405 = vadd.xlane.f32.xlu0 %v2400_v10  ;;  %v4140_v57 = vmax.f32 %v2368_v5, 0.0  ;;  %v2372_v12 = vadd.f32 %v2371_v18, %v2303_v35 }
0x10a7   :  { %2384 = vadd.xlane.f32.xlu1 %v4124_v2  ;;  %v2401_v11 = vmul.f32 %v4135_v38, %v4135_v38  ;;  %v4146_v42 = vmax.f32 %v2370_v52, 0.0 }
0x10a8   :  { %v2454_v47 = vmul.f32 %v4140_v57, %v4140_v57  ;;  %v4156_v23 = vmax.f32 %v2372_v12, 0.0 }
0x10a9   :  { %v2402_v48 = vmul.f32 %v4146_v42, %v4146_v42 }
0x10aa   :  { %2386 = vadd.xlane.f32.xlu0 %v4135_v38  ;;  %v2455_v1 = vmul.f32 %v4156_v23, %v4156_v23 }
0x10ab   :  { %2403 = vadd.xlane.f32.xlu1 %v2399_v9 }
0x10ae   :  { %2407 = vadd.xlane.f32.xlu0 %v2401_v11 }
0x10af   :  { %2456 = vadd.xlane.f32.xlu1 %v2452_v58 }
0x10b2   :  { %2460 = vadd.xlane.f32.xlu0 %v2454_v47 }
0x10b3   :  { %2458 = vadd.xlane.f32.xlu1 %v2453_v30 }
0x10b6   :  { %2409 = vadd.xlane.f32.xlu0 %v2402_v48 }
0x10b7   :  { %2439 = vadd.xlane.f32.xlu1 %v4140_v57 }
0x10bb   :  { %2388 = vadd.xlane.f32.xlu1 %v4146_v42 }
0x10bf   :  { %2441 = vadd.xlane.f32.xlu1 %v4156_v23 }
0x10c3   :  { %2462 = vadd.xlane.f32.xlu1 %v2455_v1 }
0x10d4   :  { %2496 = vperm.xlu1 %2982, %v2493_v34  }
0x112c   :  { %v2383_v13 = vpop.xlane.xlu1 %2382 }
0x112f   :  { %v2438_v15 = vpop.xlane.xlu0 %2437 }
0x1130   :  { %v2436_v29 = vpop.xlane.xlu1 %2435 }
0x1131   :  { %v2443_v41 = vadd.f32 %v2438_v15, %v2436_v29 }
0x1133   :  { %v2406_v14 = vpop.xlane.xlu0 %2405 }
0x1134   :  { %v2385_v26 = vpop.xlane.xlu1 %2384 }
0x1135   :  { %v2390_v22 = vadd.f32 %v2385_v26, %v2383_v13 }
0x1137   :  { %v2387_v6 = vpop.xlane.xlu0 %2386 }
0x1138   :  { %v2404_v53 = vpop.xlane.xlu1 %2403  ;;  %v2391_v17 = vadd.f32 %v2390_v22, %v2387_v6 }
0x1139   :  { %v2411_v28 = vadd.f32 %v2406_v14, %v2404_v53 }
0x113b   :  { %v2408_v16 = vpop.xlane.xlu0 %2407 }
0x113c   :  { %v2457_v8 = vpop.xlane.xlu1 %2456  ;;  %v2412_v32 = vadd.f32 %v2411_v28, %v2408_v16 }
0x113f   :  { %v2461_v56 = vpop.xlane.xlu0 %2460 }
0x1140   :  { %v2459_v39 = vpop.xlane.xlu1 %2458 }
0x1141   :  { %v2464_v44 = vadd.f32 %v2459_v39, %v2457_v8 }
0x1143   :  { %v2410_v62 = vpop.xlane.xlu0 %2409  ;;  %v2465_v3 = vadd.f32 %v2464_v44, %v2461_v56 }
0x1144   :  { %v2413_v33 = vadd.f32 %v2412_v32, %v2410_v62  ;;  %v2440_v21 = vpop.xlane.xlu1 %2439 }
0x1145   :  { %v2444_v25 = vadd.f32 %v2443_v41, %v2440_v21 }
0x1146   :  { %v2414_v7 = vrot.slane %v2413_v33, 4 }
0x1148   :  { %v2415_v20 = vadd.f32 %v2414_v7, %v2413_v33  ;;  %v2389_v51 = vpop.xlane.xlu1 %2388 }
0x1149   :  { %v2392_v59 = vadd.f32 %v2391_v17, %v2389_v51 }
0x114a   :  { %v2416_v27 = vrot.slane %v2415_v20, 2 }
0x114b   :  { %v2393_v54 = vrot.slane %v2392_v59, 4 }
0x114c   :  { %v2442_v55 = vpop.xlane.xlu1 %2441  ;;  %v2417_v4 = vadd.f32 %v2416_v27, %v2415_v20 }
0x114d   :  { %v2394_v45 = vadd.f32 %v2393_v54, %v2392_v59  ;;  %v2445_v0 = vadd.f32 %v2444_v25, %v2442_v55 }
0x114e   :  { %v2418_v63 = vrot.slane %v2417_v4, 1 }
0x114f   :  { %v2395_v50 = vrot.slane %v2394_v45, 2  ;;  %v2446_v43 = vrot.slane %v2445_v0, 4 }
0x1150   :  { %v2463_v36 = vpop.xlane.xlu1 %2462  ;;  %v2419_v10 = vadd.f32 %v2418_v63, %v2417_v4 }
0x1151   :  { %v2396_v24 = vadd.f32 %v2395_v50, %v2394_v45  ;;  %v2447_v37 = vadd.f32 %v2446_v43, %v2445_v0  ;;  %v2466_v61 = vadd.f32 %v2465_v3, %v2463_v36 }
0x1152   :  { %v2421_v58 = vmul.f32 0.00024414063, %v2419_v10 }
0x1153   :  { %v2397_v49 = vrot.slane %v2396_v24, 1  ;;  %v2448_v40 = vrot.slane %v2447_v37, 2  ;;  %v2467_v19 = vrot.slane %v2466_v61, 4 }
0x1154   :  { %v2497_v25 = vpop.permute.xlu1 %2496 }
0x1155   :  { %v2398_v18 = vadd.f32 %v2397_v49, %v2396_v24  ;;  %v2449_v5 = vadd.f32 %v2448_v40, %v2447_v37  ;;  %v2468_v9 = vadd.f32 %v2467_v19, %v2466_v61 }
0x1157   :  { %v2420_v35 = vmul.f32 0.00024414063, %v2398_v18  ;;  %v2450_v52 = vrot.slane %v2449_v5, 1  ;;  %v2469_v11 = vrot.slane %v2468_v9, 2 }
0x1159   :  { %v2422_v47 = vmul.f32 %v2420_v35, %v2420_v35  ;;  %v2451_v30 = vadd.f32 %v2450_v52, %v2449_v5  ;;  %v2470_v48 = vadd.f32 %v2469_v11, %v2468_v9  ;;  %v2427_v28 = vsub.f32 %v4121_v46, %v2420_v35 }
0x115a   :  { %v2428_v56 = vsub.f32 %v4124_v2, %v2420_v35  ;;  %v2429_v59 = vsub.f32 %v4135_v38, %v2420_v35  ;;  %v2430_v46 = vsub.f32 %v4146_v42, %v2420_v35 }
0x115b   :  { %v2423_v12 = vsub.f32 %v2421_v58, %v2422_v47  ;;  %v2473_v1 = vmul.f32 0.00024414063, %v2451_v30  ;;  %v2471_v34 = vrot.slane %v2470_v48, 1 }
0x115d   :  { %v2424_v13 = vmax.f32 %v2423_v12, 0.0  ;;  %v2472_v15 = vadd.f32 %v2471_v34, %v2470_v48  ;;  %v2475_v29 = vmul.f32 %v2473_v1, %v2473_v1  ;;  %v2480_v39 = vsub.f32 %v4128_v60, %v2473_v1 }
0x115e   :  { %v2481_v32 = vsub.f32 %v4126_v31, %v2473_v1  ;;  %v2482_v22 = vsub.f32 %v4140_v57, %v2473_v1  ;;  %v2483_v62 = vsub.f32 %v4156_v23, %v2473_v1  ;;  %v2488_v23 = vld [vmem:[%s4192_s4] sm:$0x3] }
0x115f   :  { %v2474_v14 = vmul.f32 0.00024414063, %v2472_v15  ;;  %v2425_v26 = vadd.f32 1e-05, %v2424_v13 }
0x1161   :  { %v2476_v6 = vsub.f32 %v2474_v14, %v2475_v29  ;;  %3084 = vrsqrt.f32 %v2425_v26 }
0x1163   :  { %v2477_v53 = vmax.f32 %v2476_v6, 0.0 }
0x1165   :  { %v2478_v16 = vadd.f32 1e-05, %v2477_v53 }
0x1167   :  { %3086 = vrsqrt.f32 %v2478_v16 }
0x116b   :  { %v3085_v8 = vpop.eup %3084 }
0x116c   :  { %v2431_v21 = vmul.f32 %v3085_v8, %v2427_v28  ;;  %v2432_v7 = vmul.f32 %v3085_v8, %v2428_v56  ;;  %v2433_v60 = vmul.f32 %v3085_v8, %v2429_v59  ;;  %v2434_v44 = vmul.f32 %v3085_v8, %v2430_v46 }
0x116e   :  { %v2489_v27 = vpack.c.bf16 %v2432_v7, %v2431_v21  ;;  %v2491_v57 = vpack.c.bf16 %v2434_v44, %v2433_v60 }
0x1171   :  { %v3087_v33 = vpop.eup %3086 }
0x1172   :  { %v2484_v17 = vmul.f32 %v3087_v33, %v2480_v39  ;;  %v2485_v20 = vmul.f32 %v3087_v33, %v2481_v32  ;;  %v2486_v51 = vmul.f32 %v3087_v33, %v2482_v22  ;;  %v2487_v41 = vmul.f32 %v3087_v33, %v2483_v62 }
0x1174   :  { %v2490_v2 = vpack.c.bf16 %v2485_v20, %v2484_v17  ;;  %v2492_v31 = vpack.c.bf16 %v2487_v41, %v2486_v51 }
0x1176   :  { %2502 = vmatprep.subr.bf16.mxu0 %v2490_v2 }
0x1177   :  { %2503 = vmatpush1.bf16.msra.mxu0 %v2489_v27 }
0x1178   :  { %2504 = vmatprep.subr.bf16.mxu0 %v2492_v31 }
0x117b   :  { %2505 = vmatpush1.bf16.msra.mxu0 %v2491_v57 }
0x117e   :  { %2754 = vmatmul.mubr.msk.bf16.vlgmr.msra.gmra.mrb[48].mxu0 %vm121_vm0, %v2488_v23 }
0x1251   :  { %v2536_v38 = vpop.f32.mrb[48].mxu0 }
0x1252   :  { %v2538_v54 = vpop.f32.mrb[49].mxu0  ;;  %v2537_v42 = vadd.f32 %v2536_v38, %v2497_v25 }
0x1253   :  { %v2540_v55 = vpop.f32.mrb[50].mxu0  ;;  %v2539_v4 = vadd.f32 %v2538_v54, %v2497_v25 }
0x1254   :  { %v2541_v45 = vpop.f32.mrb[51].mxu0 }
0x1255   :  { %v2545_v0 = vcombine.low %v2537_v42, %v2539_v4 }
0x1257   :  { %2547 = vst [vmem:[#allocation2] sm:$0xff] %v2545_v0 }
0x1258   :  { %3107 = shalt.err (!%p3104_p4)
}
0x1259   :  { %s3108_s21 = scalar_lea.hbm %s4195_s7, 128 }
0x125a   :  { %p3109_p5 = scmp.ne.s32.totalorder %s4195_s7, %s3108_s21  ;;  %p3112_p6 = scmp.lt.u32.totalorder %s3108_s21, %s4195_s7 }
0x125c   :  { %p3114_p7 = pnand %p3112_p6, %p3109_p5 }
0x125e   :  { %3117 = shalt.err (!%p3114_p7)
}
0x125f   :  { %2557 = dma.vmem_to_hbm [thread:$0]  %s2555_s18, 128, %s4195_s7, [#allocation3]  }
0x1260   :  { %3118 = dma.done.wait [#allocation3], 128  }
0x1261   :  { %3119 = vsyncadd [#allocation3], 4294967168 }
0x1262   :  { %2561 = vsyncpa [#allocation3], 1 }

</bundles_post_ra>
